<compile_context>
chip_gen: v5e
topology: v5e:2x2
jax: 0.10.0
libtpu: 0.0.40
codegen_flags: <defaults>
</compile_context>

<pallas_src>
import jax
import jax.numpy as jnp
from jax.experimental import pallas as pl
from jax.experimental.pallas import tpu as pltpu

LEAKY_SLOPE = 0.2
BN_EPS = 1e-5


# ------------------------------- helpers ----------------------------------- #

def _round_up(x, m):
    return ((x + m - 1) // m) * m


def _pick_k_tiling(K):
    """Return (Kp, tk): (possibly padded) K and a bounded, aligned K tile."""
    if K <= 2048:
        return K, K
    for cand in (2048, 1024, 512, 256, 128):
        if K % cand == 0:
            return K, cand
    # No aligned divisor: zero-pad K to a 128 multiple so tk stays bounded (v7x VMEM).
    Kp = _round_up(K, 128)
    for cand in (2048, 1024, 512, 256, 128):
        if Kp % cand == 0:
            return Kp, cand
    return Kp, 128


def _pick_tm(M, tk, n, itemsize):
    """Row tile: as large as possible (fewer ~0.35us grid steps), VMEM-bounded."""
    tm = min(1024, _round_up(M, 8))

    def est(tm_):
        # double-buffered x/w/bias tiles + resident f32 out/acc blocks + stats blocks
        return (2 * tm_ * tk * itemsize + 2 * tk * n * itemsize + 2 * n * 4
                + 3 * tm_ * n * 4 + 4 * n * 4)

    while tm > 128 and est(tm) > (40 << 20):   # headroom on v7x's 64 MiB VMEM
        tm = _round_up(tm // 2, 8)
    return tm


# ----------------------------- Pallas kernel -------------------------------- #

def _make_fused_kernel(*, act, want_stats, m_valid, tm, nk):
    """Fused: bf16 matmul (+K-grid accumulator) -> bias -> activation -> BN-stats."""

    def kernel(*refs):
        it = iter(refs)
        x_ref = next(it)
        w_ref = next(it)
        b_ref = next(it)
        o_ref = next(it)
        s_ref = ss_ref = None
        if want_stats:
            s_ref = next(it)
            ss_ref = next(it)
        acc_ref = next(it) if nk > 1 else None

        if want_stats:
            # Stats blocks are resident across the whole grid (constant block index);
            # zero once at the very first grid step, accumulate at every epilogue.
            @pl.when((pl.program_id(0) == 0) & (pl.program_id(1) == 0))
            def _():
                s_ref[...] = jnp.zeros_like(s_ref)
                ss_ref[...] = jnp.zeros_like(ss_ref)

        # bf16 operands, f32 accumulation on the MXU.
        part = jnp.dot(x_ref[...], w_ref[...], preferred_element_type=jnp.float32)

        def epilogue(acc):
            acc = acc + b_ref[...]                       # (1, N) broadcast bias, f32
            if act == "leaky":
                out = jnp.where(acc >= 0, acc, LEAKY_SLOPE * acc)
            elif act == "sigmoid":
                # Numerically-safe sigmoid (no inf intermediate for large |acc|).
                z = jnp.exp(-jnp.abs(acc))
                out = jnp.where(acc >= 0, 1.0, z) * pl.reciprocal(1.0 + z)
            else:
                out = acc
            o_ref[...] = out.astype(o_ref.dtype)
            if want_stats:
                # Per-column sum / sum-of-squares of the raw conv output (pre-BN),
                # zero-padded rows masked out so padding never biases the statistics.
                row = pl.program_id(0) * tm + jax.lax.broadcasted_iota(
                    jnp.int32, (tm, 1), 0)
                a = jnp.where(row < m_valid, acc, 0.0)
                s_ref[...] += jnp.sum(a, axis=0, keepdims=True)
                ss_ref[...] += jnp.sum(a * a, axis=0, keepdims=True)

        if nk == 1:
            epilogue(part)
        else:
            kidx = pl.program_id(1)

            @pl.when(kidx == 0)
            def _():
                acc_ref[...] = jnp.zeros_like(acc_ref)

            acc_ref[...] += part

            @pl.when(kidx == nk - 1)
            def _():
                epilogue(acc_ref[...])

    return kernel


def fused_matmul(x, w, b, *, act="none", want_stats=False):
    """y = act(x @ w + b); x:(M,K) bf16, w:(K,N) bf16, b:(N,) f32.

    want_stats: also return per-column sum and sum-of-squares of (x@w + b) over the
    M valid rows (accumulated in-kernel into a single (1,N) block).
    """
    M, K = x.shape
    N = w.shape[1]

    Kp, tk = _pick_k_tiling(K)
    if Kp != K:
        x = jnp.pad(x, ((0, 0), (0, Kp - K)))
        w = jnp.pad(w, ((0, Kp - K), (0, 0)))
    nk = Kp // tk

    tm = _pick_tm(M, tk, N, jnp.dtype(x.dtype).itemsize)
    Mp = _round_up(M, tm)
    nm = Mp // tm
    if Mp != M:
        x = jnp.pad(x, ((0, Mp - M), (0, 0)))

    kernel = _make_fused_kernel(act=act, want_stats=want_stats,
                                m_valid=M, tm=tm, nk=nk)

    in_specs = [pl.BlockSpec((tm, tk), lambda i, k: (i, k)),
                pl.BlockSpec((tk, N), lambda i, k: (k, 0)),
                pl.BlockSpec((1, N), lambda i, k: (0, 0))]
    args = [x, w, b.reshape(1, N).astype(jnp.float32)]

    out_shapes = [jax.ShapeDtypeStruct((Mp, N), jnp.float32)]
    out_specs = [pl.BlockSpec((tm, N), lambda i, k: (i, 0))]
    if want_stats:
        out_shapes += [jax.ShapeDtypeStruct((1, N), jnp.float32)] * 2
        out_specs += [pl.BlockSpec((1, N), lambda i, k: (0, 0))] * 2

    scratch = [pltpu.VMEM((tm, N), jnp.float32)] if nk > 1 else []

    item = jnp.dtype(x.dtype).itemsize
    est = (2 * tm * tk * item + 2 * tk * N * item + 2 * N * 4
           + 2 * tm * N * 4 + (tm * N * 4 if nk > 1 else 0) + 4 * N * 4)
    vmem_limit = int(min(48 << 20, max(est + (2 << 20), 32 << 20)))

    # Stats accumulation revisits the same output block across i -> i must be
    # sequential ("arbitrary") for stats layers; independent ("parallel") otherwise.
    sem_i = "arbitrary" if want_stats else "parallel"

    outs = pl.pallas_call(
        kernel,
        grid=(nm, nk),
        in_specs=in_specs,
        out_specs=tuple(out_specs) if want_stats else out_specs[0],
        out_shape=tuple(out_shapes) if want_stats else out_shapes[0],
        scratch_shapes=scratch,
        compiler_params=pltpu.CompilerParams(
            dimension_semantics=(sem_i, "arbitrary"),
            vmem_limit_bytes=vmem_limit),
    )(*args)

    if want_stats:
        o, s, ss = outs
        return o[:M], s[0], ss[0]
    return outs[:M]


# ------------------------------- JAX glue ----------------------------------- #

def _im2col(x, k, stride, pad):
    """x: (B,H,W,C) NHWC -> (B*Ho*Wo, C*k*k), column order (c_in, kh, kw)."""
    B, H, W, C = x.shape
    xp = jnp.pad(x, ((0, 0), (pad, pad), (pad, pad), (0, 0))) if pad > 0 else x
    Ho = (H + 2 * pad - k) // stride + 1
    Wo = (W + 2 * pad - k) // stride + 1
    patches = [xp[:, i:i + stride * Ho:stride, j:j + stride * Wo:stride, :]
               for i in range(k) for j in range(k)]
    p = jnp.stack(patches, axis=0)               # (k*k, B, Ho, Wo, C)
    p = jnp.transpose(p, (1, 2, 3, 4, 0))        # (B, Ho, Wo, C, k*k)
    return p.reshape(B * Ho * Wo, C * k * k), Ho, Wo


def _bn_scale_shift(s, ss, count, gamma, beta):
    """Training-mode BN affine form: y = x*scale + shift (biased variance, eps=1e-5).

    Note: E[x^2]-E[x]^2 in f32 is cancellation-prone for large-mean activations; the
    clamp at 0 guards the rsqrt.  # TODO(synk): compensated form if bit-closeness matters.
    """
    mean = s / count
    var = jnp.maximum(ss / count - mean * mean, 0.0)
    scale = gamma * jax.lax.rsqrt(var + BN_EPS)
    shift = beta - mean * scale
    return scale, shift


def conv_layer(x_nhwc, w_oihw, b, *, stride, pad, act="none", want_stats=False):
    """Conv2d via im2col + fused Pallas matmul (bf16 operands, f32 accumulation)."""
    ksz = w_oihw.shape[-1]
    cols, Ho, Wo = _im2col(x_nhwc, ksz, stride, pad)
    wm = w_oihw.reshape(w_oihw.shape[0], -1).T            # (C_in*k*k, C_out)
    res = fused_matmul(cols.astype(jnp.bfloat16), wm.astype(jnp.bfloat16), b,
                       act=act, want_stats=want_stats)
    return res, Ho, Wo


def conditional_discriminator_forward(params, img_nchw, labels):
    B = img_nchw.shape[0]
    # nn.Embedding lookup = gather (XLA glue, not a kernel hot path).
    emb = jnp.take(params["emb"], labels, axis=0)                     # (B, E)
    x = jnp.transpose(img_nchw, (0, 2, 3, 1)).astype(jnp.float32)     # NCHW -> NHWC
    H, W = x.shape[1], x.shape[2]
    emb_map = jnp.broadcast_to(emb[:, None, None, :], (B, H, W, emb.shape[-1]))
    x = jnp.concatenate([x, emb_map], axis=-1)                        # channel concat

    # conv1: fused matmul + bias + LeakyReLU
    y, Ho, Wo = conv_layer(x, params["w1"], params["b1"], stride=2, pad=1, act="leaky")
    fm = y.reshape(B, Ho, Wo, -1)

    # conv2..4: fused matmul + bias + in-kernel BN-stats; BN+LeakyReLU is applied
    # exactly once per feature-map element here (tiny elementwise pass, fused by XLA
    # with the next layer's im2col glue) instead of k*k-redundantly inside the kernel.
    for n in (2, 3, 4):
        (y, s, ss), Ho, Wo = conv_layer(fm, params[f"w{n}"], params[f"b{n}"],
                                        stride=2, pad=1, act="none", want_stats=True)
        scale, shift = _bn_scale_shift(s, ss, B * Ho * Wo,
                                       params[f"g{n}"], params[f"be{n}"])
        yb = y * scale + shift
        fm = jnp.where(yb >= 0, yb, LEAKY_SLOPE * yb).reshape(B, Ho, Wo, -1)

    # conv5: matmul + bias + sigmoid, flatten (C_out=1).
    y, Ho, Wo = conv_layer(fm, params["w5"], params["b5"], stride=1, pad=0, act="sigmoid")
    return y.reshape(B, Ho * Wo)


def init_params(key, d=8, num_classes=10, embedding_dim=8):
    ks = jax.random.split(key, 6)

    def conv_w(k, cout, cin):
        return (0.02 * jax.random.normal(k, (cout, cin, 4, 4))).astype(jnp.float32)

    return {
        "emb": jax.random.normal(ks[0], (num_classes, embedding_dim)).astype(jnp.float32),
        "w1": conv_w(ks[1], d, 1 + embedding_dim),
        "b1": jnp.zeros((d,), jnp.float32),
        "w2": conv_w(ks[2], 2 * d, d), "b2": jnp.zeros((2 * d,), jnp.float32),
        "g2": jnp.ones((2 * d,), jnp.float32), "be2": jnp.zeros((2 * d,), jnp.float32),
        "w3": conv_w(ks[3], 4 * d, 2 * d), "b3": jnp.zeros((4 * d,), jnp.float32),
        "g3": jnp.ones((4 * d,), jnp.float32), "be3": jnp.zeros((4 * d,), jnp.float32),
        "w4": conv_w(ks[4], 8 * d, 4 * d), "b4": jnp.zeros((8 * d,), jnp.float32),
        "g4": jnp.ones((8 * d,), jnp.float32), "be4": jnp.zeros((8 * d,), jnp.float32),
        "w5": conv_w(ks[5], 1, 8 * d), "b5": jnp.zeros((1,), jnp.float32),
    }


if __name__ == "__main__":
    # img_size must be 64 so conv5 (4x4, stride 1, no pad) sees a 4x4 feature map;
    # d and embedding_dim are shrunk for a quick deterministic run.
    d, num_classes, embedding_dim, img_size, B = 8, 10, 8, 64, 2

    key = jax.random.PRNGKey(0)
    pkey, ikey = jax.random.split(key)
    params = init_params(pkey, d=d, num_classes=num_classes, embedding_dim=embedding_dim)

    img = jax.random.normal(ikey, (B, 1, img_size, img_size), dtype=jnp.float32)
    labels = jnp.array([3, 7], dtype=jnp.int32)

    fwd = jax.jit(conditional_discriminator_forward)
    out = fwd(params, img, labels)
    out = jax.block_until_ready(out)
    assert out.shape == (B, 1), out.shape
    assert bool(jnp.all(jnp.isfinite(out)))
    assert bool(jnp.all((out >= 0.0) & (out <= 1.0)))
    print("KERNEL_OK")
</pallas_src>

<mosaic_0001>
module attributes {stable_mosaic.version = 11 : i64} {
  func.func @kernel(%arg0: i32, %arg1: i32, %arg2: memref<1024x144xbf16, #tpu.memory_space<vmem>>, %arg3: memref<144x8xbf16, #tpu.memory_space<vmem>>, %arg4: memref<1x8xf32, #tpu.memory_space<vmem>>, %arg5: memref<1024x8xf32, #tpu.memory_space<vmem>>) attributes {dimension_semantics = [#tpu.dimension_semantics<parallel>, #tpu.dimension_semantics<arbitrary>], iteration_bounds = array<i64: 2, 1>, scalar_prefetch = 0 : i64, scratch_operands = 0 : i64, tpu.core_type = #tpu.core_type<tc>, window_params = [{transform_indices = @transform_0, window_bounds = array<i64: 1024, 144>}, {transform_indices = @transform_1, window_bounds = array<i64: 144, 8>}, {pipeline_mode = #tpu.pipeline_mode<synchronous>, transform_indices = @transform_2, window_bounds = array<i64: 1, 8>}, {transform_indices = @transform_3, window_bounds = array<i64: 1024, 8>}]} {
    %c0 = arith.constant 0 : index
    %c0_0 = arith.constant 0 : index
    %0 = vector.load %arg2[%c0, %c0_0] : memref<1024x144xbf16, #tpu.memory_space<vmem>>, vector<1024x144xbf16>
    %c0_1 = arith.constant 0 : index
    %c0_2 = arith.constant 0 : index
    %1 = vector.load %arg3[%c0_1, %c0_2] : memref<144x8xbf16, #tpu.memory_space<vmem>>, vector<144x8xbf16>
    %cst = arith.constant dense<0.000000e+00> : vector<1024x8xf32>
    %2 = tpu.matmul %0, %1, %cst {dimension_numbers = #tpu.dot_dimension_numbers<[1], [0], [0], [1], [0, 0, 1, 1], [], []>} : vector<1024x144xbf16>, vector<144x8xbf16>, vector<1024x8xf32> -> vector<1024x8xf32>
    %c0_3 = arith.constant 0 : index
    %c0_4 = arith.constant 0 : index
    %3 = vector.load %arg4[%c0_3, %c0_4] : memref<1x8xf32, #tpu.memory_space<vmem>>, vector<1x8xf32>
    %4 = vector.broadcast %3 : vector<1x8xf32> to vector<1024x8xf32>
    %5 = arith.addf %2, %4 : vector<1024x8xf32>
    %cst_5 = arith.constant 0.000000e+00 : f32
    %6 = vector.broadcast %cst_5 : f32 to vector<1024x8xf32>
    %7 = arith.cmpf oge, %5, %6 : vector<1024x8xf32>
    %cst_6 = arith.constant 2.000000e-01 : f32
    %8 = vector.broadcast %cst_6 : f32 to vector<1024x8xf32>
    %9 = arith.mulf %8, %5 : vector<1024x8xf32>
    %10 = arith.select %7, %5, %9 : vector<1024x8xi1>, vector<1024x8xf32>
    %c0_7 = arith.constant 0 : index
    %c0_8 = arith.constant 0 : index
    %11 = vector.load %arg5[%c0_7, %c0_8] : memref<1024x8xf32, #tpu.memory_space<vmem>>, vector<1024x8xf32>
    tpu.vector_store %arg5[%c0_7, %c0_8], %10 {strides = array<i32>} : memref<1024x8xf32, #tpu.memory_space<vmem>>, vector<1024x8xf32>,
    return
  }
  func.func @transform_0(%arg0: i32, %arg1: i32) -> (i32, i32) {
    %c0_i32 = arith.constant 0 : i32
    return %arg0, %arg1 : i32, i32
  }
  func.func @transform_1(%arg0: i32, %arg1: i32) -> (i32, i32) {
    %c0_i32 = arith.constant 0 : i32
    %c0_i32_0 = arith.constant 0 : i32
    return %arg1, %c0_i32 : i32, i32
  }
  func.func @transform_2(%arg0: i32, %arg1: i32) -> (i32, i32) {
    %c0_i32 = arith.constant 0 : i32
    %c0_i32_0 = arith.constant 0 : i32
    %c0_i32_1 = arith.constant 0 : i32
    return %c0_i32, %c0_i32_0 : i32, i32
  }
  func.func @transform_3(%arg0: i32, %arg1: i32) -> (i32, i32) {
    %c0_i32 = arith.constant 0 : i32
    %c0_i32_0 = arith.constant 0 : i32
    return %arg0, %c0_i32 : i32, i32
  }
}

module attributes {stable_mosaic.version = 11 : i64} {
  func.func @kernel(%arg0: i32, %arg1: i32, %arg2: memref<512x128xbf16, #tpu.memory_space<vmem>>, %arg3: memref<128x16xbf16, #tpu.memory_space<vmem>>, %arg4: memref<1x16xf32, #tpu.memory_space<vmem>>, %arg5: memref<512x16xf32, #tpu.memory_space<vmem>>, %arg6: memref<1x16xf32, #tpu.memory_space<vmem>>, %arg7: memref<1x16xf32, #tpu.memory_space<vmem>>) attributes {dimension_semantics = [#tpu.dimension_semantics<arbitrary>, #tpu.dimension_semantics<arbitrary>], iteration_bounds = array<i64: 1, 1>, scalar_prefetch = 0 : i64, scratch_operands = 0 : i64, tpu.core_type = #tpu.core_type<tc>, window_params = [{transform_indices = @transform_0, window_bounds = array<i64: 512, 128>}, {transform_indices = @transform_1, window_bounds = array<i64: 128, 16>}, {pipeline_mode = #tpu.pipeline_mode<synchronous>, transform_indices = @transform_2, window_bounds = array<i64: 1, 16>}, {transform_indices = @transform_3, window_bounds = array<i64: 512, 16>}, {pipeline_mode = #tpu.pipeline_mode<synchronous>, transform_indices = @transform_4, window_bounds = array<i64: 1, 16>}, {pipeline_mode = #tpu.pipeline_mode<synchronous>, transform_indices = @transform_5, window_bounds = array<i64: 1, 16>}]} {
    %c0_i32 = arith.constant 0 : i32
    %0 = arith.cmpi eq, %arg0, %c0_i32 : i32
    %c0_i32_0 = arith.constant 0 : i32
    %1 = arith.cmpi eq, %arg1, %c0_i32_0 : i32
    %2 = arith.andi %0, %1 : i1
    %3 = arith.extui %2 : i1 to i32
    %c0_i32_1 = arith.constant 0 : i32
    %4 = arith.cmpi ne, %3, %c0_i32_1 : i32
    scf.if %4 {
      %cst_21 = arith.constant 0.000000e+00 : f32
      %33 = vector.broadcast %cst_21 : f32 to vector<1x16xf32>
      %c0_22 = arith.constant 0 : index
      %c0_23 = arith.constant 0 : index
      %34 = vector.load %arg6[%c0_22, %c0_23] : memref<1x16xf32, #tpu.memory_space<vmem>>, vector<1x16xf32>
      tpu.vector_store %arg6[%c0_22, %c0_23], %33 {strides = array<i32>} : memref<1x16xf32, #tpu.memory_space<vmem>>, vector<1x16xf32>,
      %cst_24 = arith.constant 0.000000e+00 : f32
      %35 = vector.broadcast %cst_24 : f32 to vector<1x16xf32>
      %c0_25 = arith.constant 0 : index
      %c0_26 = arith.constant 0 : index
      %36 = vector.load %arg7[%c0_25, %c0_26] : memref<1x16xf32, #tpu.memory_space<vmem>>, vector<1x16xf32>
      tpu.vector_store %arg7[%c0_25, %c0_26], %35 {strides = array<i32>} : memref<1x16xf32, #tpu.memory_space<vmem>>, vector<1x16xf32>,
    } else {
    }
    %c0 = arith.constant 0 : index
    %c0_2 = arith.constant 0 : index
    %5 = vector.load %arg2[%c0, %c0_2] : memref<512x128xbf16, #tpu.memory_space<vmem>>, vector<512x128xbf16>
    %c0_3 = arith.constant 0 : index
    %c0_4 = arith.constant 0 : index
    %6 = vector.load %arg3[%c0_3, %c0_4] : memref<128x16xbf16, #tpu.memory_space<vmem>>, vector<128x16xbf16>
    %cst = arith.constant dense<0.000000e+00> : vector<512x16xf32>
    %7 = tpu.matmul %5, %6, %cst {dimension_numbers = #tpu.dot_dimension_numbers<[1], [0], [0], [1], [0, 0, 1, 1], [], []>} : vector<512x128xbf16>, vector<128x16xbf16>, vector<512x16xf32> -> vector<512x16xf32>
    %c0_5 = arith.constant 0 : index
    %c0_6 = arith.constant 0 : index
    %8 = vector.load %arg4[%c0_5, %c0_6] : memref<1x16xf32, #tpu.memory_space<vmem>>, vector<1x16xf32>
    %9 = vector.broadcast %8 : vector<1x16xf32> to vector<512x16xf32>
    %10 = arith.addf %7, %9 : vector<512x16xf32>
    %c0_7 = arith.constant 0 : index
    %c0_8 = arith.constant 0 : index
    %11 = vector.load %arg5[%c0_7, %c0_8] : memref<512x16xf32, #tpu.memory_space<vmem>>, vector<512x16xf32>
    tpu.vector_store %arg5[%c0_7, %c0_8], %10 {strides = array<i32>} : memref<512x16xf32, #tpu.memory_space<vmem>>, vector<512x16xf32>,
    %c512_i32 = arith.constant 512 : i32
    %12 = arith.muli %arg0, %c512_i32 : i32
    %13 = tpu.iota {dimensions = array<i32: 0>} : vector<512x1xi32>
    %14 = vector.broadcast %12 : i32 to vector<512x1xi32>
    %15 = arith.addi %14, %13 : vector<512x1xi32>
    %c512_i32_9 = arith.constant 512 : i32
    %16 = vector.broadcast %c512_i32_9 : i32 to vector<512x1xi32>
    %17 = arith.cmpi slt, %15, %16 : vector<512x1xi32>
    %cst_10 = arith.constant 0.000000e+00 : f32
    %18 = vector.shape_cast %17 : vector<512x1xi1> to vector<512x1xi1>
    %19 = vector.broadcast %18 : vector<512x1xi1> to vector<512x16xi1>
    %20 = vector.broadcast %cst_10 : f32 to vector<512x16xf32>
    %21 = arith.select %19, %10, %20 : vector<512x16xi1>, vector<512x16xf32>
    %c0_11 = arith.constant 0 : index
    %c0_12 = arith.constant 0 : index
    %22 = vector.load %arg6[%c0_11, %c0_12] : memref<1x16xf32, #tpu.memory_space<vmem>>, vector<1x16xf32>
    %cst_13 = arith.constant dense<0.000000e+00> : vector<16xf32>
    %23 = vector.multi_reduction <add>, %21, %cst_13 [0] : vector<512x16xf32> to vector<16xf32>
    %24 = vector.shape_cast %23 : vector<16xf32> to vector<1x16xf32>
    %25 = arith.addf %22, %24 : vector<1x16xf32>
    %c0_14 = arith.constant 0 : index
    %c0_15 = arith.constant 0 : index
    %26 = vector.load %arg6[%c0_14, %c0_15] : memref<1x16xf32, #tpu.memory_space<vmem>>, vector<1x16xf32>
    tpu.vector_store %arg6[%c0_14, %c0_15], %25 {strides = array<i32>} : memref<1x16xf32, #tpu.memory_space<vmem>>, vector<1x16xf32>,
    %c0_16 = arith.constant 0 : index
    %c0_17 = arith.constant 0 : index
    %27 = vector.load %arg7[%c0_16, %c0_17] : memref<1x16xf32, #tpu.memory_space<vmem>>, vector<1x16xf32>
    %28 = arith.mulf %21, %21 : vector<512x16xf32>
    %cst_18 = arith.constant dense<0.000000e+00> : vector<16xf32>
    %29 = vector.multi_reduction <add>, %28, %cst_18 [0] : vector<512x16xf32> to vector<16xf32>
    %30 = vector.shape_cast %29 : vector<16xf32> to vector<1x16xf32>
    %31 = arith.addf %27, %30 : vector<1x16xf32>
    %c0_19 = arith.constant 0 : index
    %c0_20 = arith.constant 0 : index
    %32 = vector.load %arg7[%c0_19, %c0_20] : memref<1x16xf32, #tpu.memory_space<vmem>>, vector<1x16xf32>
    tpu.vector_store %arg7[%c0_19, %c0_20], %31 {strides = array<i32>} : memref<1x16xf32, #tpu.memory_space<vmem>>, vector<1x16xf32>,
    return
  }
  func.func @transform_0(%arg0: i32, %arg1: i32) -> (i32, i32) {
    %c0_i32 = arith.constant 0 : i32
    return %arg0, %arg1 : i32, i32
  }
  func.func @transform_1(%arg0: i32, %arg1: i32) -> (i32, i32) {
    %c0_i32 = arith.constant 0 : i32
    %c0_i32_0 = arith.constant 0 : i32
    return %arg1, %c0_i32 : i32, i32
  }
  func.func @transform_2(%arg0: i32, %arg1: i32) -> (i32, i32) {
    %c0_i32 = arith.constant 0 : i32
    %c0_i32_0 = arith.constant 0 : i32
    %c0_i32_1 = arith.constant 0 : i32
    return %c0_i32, %c0_i32_0 : i32, i32
  }
  func.func @transform_3(%arg0: i32, %arg1: i32) -> (i32, i32) {
    %c0_i32 = arith.constant 0 : i32
    %c0_i32_0 = arith.constant 0 : i32
    return %arg0, %c0_i32 : i32, i32
  }
  func.func @transform_4(%arg0: i32, %arg1: i32) -> (i32, i32) {
    %c0_i32 = arith.constant 0 : i32
    %c0_i32_0 = arith.constant 0 : i32
    %c0_i32_1 = arith.constant 0 : i32
    return %c0_i32, %c0_i32_0 : i32, i32
  }
  func.func @transform_5(%arg0: i32, %arg1: i32) -> (i32, i32) {
    %c0_i32 = arith.constant 0 : i32
    %c0_i32_0 = arith.constant 0 : i32
    %c0_i32_1 = arith.constant 0 : i32
    return %c0_i32, %c0_i32_0 : i32, i32
  }
}

module attributes {stable_mosaic.version = 11 : i64} {
  func.func @kernel(%arg0: i32, %arg1: i32, %arg2: memref<128x256xbf16, #tpu.memory_space<vmem>>, %arg3: memref<256x32xbf16, #tpu.memory_space<vmem>>, %arg4: memref<1x32xf32, #tpu.memory_space<vmem>>, %arg5: memref<128x32xf32, #tpu.memory_space<vmem>>, %arg6: memref<1x32xf32, #tpu.memory_space<vmem>>, %arg7: memref<1x32xf32, #tpu.memory_space<vmem>>) attributes {dimension_semantics = [#tpu.dimension_semantics<arbitrary>, #tpu.dimension_semantics<arbitrary>], iteration_bounds = array<i64: 1, 1>, scalar_prefetch = 0 : i64, scratch_operands = 0 : i64, tpu.core_type = #tpu.core_type<tc>, window_params = [{transform_indices = @transform_0, window_bounds = array<i64: 128, 256>}, {transform_indices = @transform_1, window_bounds = array<i64: 256, 32>}, {pipeline_mode = #tpu.pipeline_mode<synchronous>, transform_indices = @transform_2, window_bounds = array<i64: 1, 32>}, {transform_indices = @transform_3, window_bounds = array<i64: 128, 32>}, {pipeline_mode = #tpu.pipeline_mode<synchronous>, transform_indices = @transform_4, window_bounds = array<i64: 1, 32>}, {pipeline_mode = #tpu.pipeline_mode<synchronous>, transform_indices = @transform_5, window_bounds = array<i64: 1, 32>}]} {
    %c0_i32 = arith.constant 0 : i32
    %0 = arith.cmpi eq, %arg0, %c0_i32 : i32
    %c0_i32_0 = arith.constant 0 : i32
    %1 = arith.cmpi eq, %arg1, %c0_i32_0 : i32
    %2 = arith.andi %0, %1 : i1
    %3 = arith.extui %2 : i1 to i32
    %c0_i32_1 = arith.constant 0 : i32
    %4 = arith.cmpi ne, %3, %c0_i32_1 : i32
    scf.if %4 {
      %cst_21 = arith.constant 0.000000e+00 : f32
      %33 = vector.broadcast %cst_21 : f32 to vector<1x32xf32>
      %c0_22 = arith.constant 0 : index
      %c0_23 = arith.constant 0 : index
      %34 = vector.load %arg6[%c0_22, %c0_23] : memref<1x32xf32, #tpu.memory_space<vmem>>, vector<1x32xf32>
      tpu.vector_store %arg6[%c0_22, %c0_23], %33 {strides = array<i32>} : memref<1x32xf32, #tpu.memory_space<vmem>>, vector<1x32xf32>,
      %cst_24 = arith.constant 0.000000e+00 : f32
      %35 = vector.broadcast %cst_24 : f32 to vector<1x32xf32>
      %c0_25 = arith.constant 0 : index
      %c0_26 = arith.constant 0 : index
      %36 = vector.load %arg7[%c0_25, %c0_26] : memref<1x32xf32, #tpu.memory_space<vmem>>, vector<1x32xf32>
      tpu.vector_store %arg7[%c0_25, %c0_26], %35 {strides = array<i32>} : memref<1x32xf32, #tpu.memory_space<vmem>>, vector<1x32xf32>,
    } else {
    }
    %c0 = arith.constant 0 : index
    %c0_2 = arith.constant 0 : index
    %5 = vector.load %arg2[%c0, %c0_2] : memref<128x256xbf16, #tpu.memory_space<vmem>>, vector<128x256xbf16>
    %c0_3 = arith.constant 0 : index
    %c0_4 = arith.constant 0 : index
    %6 = vector.load %arg3[%c0_3, %c0_4] : memref<256x32xbf16, #tpu.memory_space<vmem>>, vector<256x32xbf16>
    %cst = arith.constant dense<0.000000e+00> : vector<128x32xf32>
    %7 = tpu.matmul %5, %6, %cst {dimension_numbers = #tpu.dot_dimension_numbers<[1], [0], [0], [1], [0, 0, 1, 1], [], []>} : vector<128x256xbf16>, vector<256x32xbf16>, vector<128x32xf32> -> vector<128x32xf32>
    %c0_5 = arith.constant 0 : index
    %c0_6 = arith.constant 0 : index
    %8 = vector.load %arg4[%c0_5, %c0_6] : memref<1x32xf32, #tpu.memory_space<vmem>>, vector<1x32xf32>
    %9 = vector.broadcast %8 : vector<1x32xf32> to vector<128x32xf32>
    %10 = arith.addf %7, %9 : vector<128x32xf32>
    %c0_7 = arith.constant 0 : index
    %c0_8 = arith.constant 0 : index
    %11 = vector.load %arg5[%c0_7, %c0_8] : memref<128x32xf32, #tpu.memory_space<vmem>>, vector<128x32xf32>
    tpu.vector_store %arg5[%c0_7, %c0_8], %10 {strides = array<i32>} : memref<128x32xf32, #tpu.memory_space<vmem>>, vector<128x32xf32>,
    %c128_i32 = arith.constant 128 : i32
    %12 = arith.muli %arg0, %c128_i32 : i32
    %13 = tpu.iota {dimensions = array<i32: 0>} : vector<128x1xi32>
    %14 = vector.broadcast %12 : i32 to vector<128x1xi32>
    %15 = arith.addi %14, %13 : vector<128x1xi32>
    %c128_i32_9 = arith.constant 128 : i32
    %16 = vector.broadcast %c128_i32_9 : i32 to vector<128x1xi32>
    %17 = arith.cmpi slt, %15, %16 : vector<128x1xi32>
    %cst_10 = arith.constant 0.000000e+00 : f32
    %18 = vector.shape_cast %17 : vector<128x1xi1> to vector<128x1xi1>
    %19 = vector.broadcast %18 : vector<128x1xi1> to vector<128x32xi1>
    %20 = vector.broadcast %cst_10 : f32 to vector<128x32xf32>
    %21 = arith.select %19, %10, %20 : vector<128x32xi1>, vector<128x32xf32>
    %c0_11 = arith.constant 0 : index
    %c0_12 = arith.constant 0 : index
    %22 = vector.load %arg6[%c0_11, %c0_12] : memref<1x32xf32, #tpu.memory_space<vmem>>, vector<1x32xf32>
    %cst_13 = arith.constant dense<0.000000e+00> : vector<32xf32>
    %23 = vector.multi_reduction <add>, %21, %cst_13 [0] : vector<128x32xf32> to vector<32xf32>
    %24 = vector.shape_cast %23 : vector<32xf32> to vector<1x32xf32>
    %25 = arith.addf %22, %24 : vector<1x32xf32>
    %c0_14 = arith.constant 0 : index
    %c0_15 = arith.constant 0 : index
    %26 = vector.load %arg6[%c0_14, %c0_15] : memref<1x32xf32, #tpu.memory_space<vmem>>, vector<1x32xf32>
    tpu.vector_store %arg6[%c0_14, %c0_15], %25 {strides = array<i32>} : memref<1x32xf32, #tpu.memory_space<vmem>>, vector<1x32xf32>,
    %c0_16 = arith.constant 0 : index
    %c0_17 = arith.constant 0 : index
    %27 = vector.load %arg7[%c0_16, %c0_17] : memref<1x32xf32, #tpu.memory_space<vmem>>, vector<1x32xf32>
    %28 = arith.mulf %21, %21 : vector<128x32xf32>
    %cst_18 = arith.constant dense<0.000000e+00> : vector<32xf32>
    %29 = vector.multi_reduction <add>, %28, %cst_18 [0] : vector<128x32xf32> to vector<32xf32>
    %30 = vector.shape_cast %29 : vector<32xf32> to vector<1x32xf32>
    %31 = arith.addf %27, %30 : vector<1x32xf32>
    %c0_19 = arith.constant 0 : index
    %c0_20 = arith.constant 0 : index
    %32 = vector.load %arg7[%c0_19, %c0_20] : memref<1x32xf32, #tpu.memory_space<vmem>>, vector<1x32xf32>
    tpu.vector_store %arg7[%c0_19, %c0_20], %31 {strides = array<i32>} : memref<1x32xf32, #tpu.memory_space<vmem>>, vector<1x32xf32>,
    return
  }
  func.func @transform_0(%arg0: i32, %arg1: i32) -> (i32, i32) {
    %c0_i32 = arith.constant 0 : i32
    return %arg0, %arg1 : i32, i32
  }
  func.func @transform_1(%arg0: i32, %arg1: i32) -> (i32, i32) {
    %c0_i32 = arith.constant 0 : i32
    %c0_i32_0 = arith.constant 0 : i32
    return %arg1, %c0_i32 : i32, i32
  }
  func.func @transform_2(%arg0: i32, %arg1: i32) -> (i32, i32) {
    %c0_i32 = arith.constant 0 : i32
    %c0_i32_0 = arith.constant 0 : i32
    %c0_i32_1 = arith.constant 0 : i32
    return %c0_i32, %c0_i32_0 : i32, i32
  }
  func.func @transform_3(%arg0: i32, %arg1: i32) -> (i32, i32) {
    %c0_i32 = arith.constant 0 : i32
    %c0_i32_0 = arith.constant 0 : i32
    return %arg0, %c0_i32 : i32, i32
  }
  func.func @transform_4(%arg0: i32, %arg1: i32) -> (i32, i32) {
    %c0_i32 = arith.constant 0 : i32
    %c0_i32_0 = arith.constant 0 : i32
    %c0_i32_1 = arith.constant 0 : i32
    return %c0_i32, %c0_i32_0 : i32, i32
  }
  func.func @transform_5(%arg0: i32, %arg1: i32) -> (i32, i32) {
    %c0_i32 = arith.constant 0 : i32
    %c0_i32_0 = arith.constant 0 : i32
    %c0_i32_1 = arith.constant 0 : i32
    return %c0_i32, %c0_i32_0 : i32, i32
  }
}

module attributes {stable_mosaic.version = 11 : i64} {
  func.func @kernel(%arg0: i32, %arg1: i32, %arg2: memref<32x512xbf16, #tpu.memory_space<vmem>>, %arg3: memref<512x64xbf16, #tpu.memory_space<vmem>>, %arg4: memref<1x64xf32, #tpu.memory_space<vmem>>, %arg5: memref<32x64xf32, #tpu.memory_space<vmem>>, %arg6: memref<1x64xf32, #tpu.memory_space<vmem>>, %arg7: memref<1x64xf32, #tpu.memory_space<vmem>>) attributes {dimension_semantics = [#tpu.dimension_semantics<arbitrary>, #tpu.dimension_semantics<arbitrary>], iteration_bounds = array<i64: 1, 1>, scalar_prefetch = 0 : i64, scratch_operands = 0 : i64, tpu.core_type = #tpu.core_type<tc>, window_params = [{transform_indices = @transform_0, window_bounds = array<i64: 32, 512>}, {transform_indices = @transform_1, window_bounds = array<i64: 512, 64>}, {pipeline_mode = #tpu.pipeline_mode<synchronous>, transform_indices = @transform_2, window_bounds = array<i64: 1, 64>}, {transform_indices = @transform_3, window_bounds = array<i64: 32, 64>}, {pipeline_mode = #tpu.pipeline_mode<synchronous>, transform_indices = @transform_4, window_bounds = array<i64: 1, 64>}, {pipeline_mode = #tpu.pipeline_mode<synchronous>, transform_indices = @transform_5, window_bounds = array<i64: 1, 64>}]} {
    %c0_i32 = arith.constant 0 : i32
    %0 = arith.cmpi eq, %arg0, %c0_i32 : i32
    %c0_i32_0 = arith.constant 0 : i32
    %1 = arith.cmpi eq, %arg1, %c0_i32_0 : i32
    %2 = arith.andi %0, %1 : i1
    %3 = arith.extui %2 : i1 to i32
    %c0_i32_1 = arith.constant 0 : i32
    %4 = arith.cmpi ne, %3, %c0_i32_1 : i32
    scf.if %4 {
      %cst_21 = arith.constant 0.000000e+00 : f32
      %33 = vector.broadcast %cst_21 : f32 to vector<1x64xf32>
      %c0_22 = arith.constant 0 : index
      %c0_23 = arith.constant 0 : index
      %34 = vector.load %arg6[%c0_22, %c0_23] : memref<1x64xf32, #tpu.memory_space<vmem>>, vector<1x64xf32>
      tpu.vector_store %arg6[%c0_22, %c0_23], %33 {strides = array<i32>} : memref<1x64xf32, #tpu.memory_space<vmem>>, vector<1x64xf32>,
      %cst_24 = arith.constant 0.000000e+00 : f32
      %35 = vector.broadcast %cst_24 : f32 to vector<1x64xf32>
      %c0_25 = arith.constant 0 : index
      %c0_26 = arith.constant 0 : index
      %36 = vector.load %arg7[%c0_25, %c0_26] : memref<1x64xf32, #tpu.memory_space<vmem>>, vector<1x64xf32>
      tpu.vector_store %arg7[%c0_25, %c0_26], %35 {strides = array<i32>} : memref<1x64xf32, #tpu.memory_space<vmem>>, vector<1x64xf32>,
    } else {
    }
    %c0 = arith.constant 0 : index
    %c0_2 = arith.constant 0 : index
    %5 = vector.load %arg2[%c0, %c0_2] : memref<32x512xbf16, #tpu.memory_space<vmem>>, vector<32x512xbf16>
    %c0_3 = arith.constant 0 : index
    %c0_4 = arith.constant 0 : index
    %6 = vector.load %arg3[%c0_3, %c0_4] : memref<512x64xbf16, #tpu.memory_space<vmem>>, vector<512x64xbf16>
    %cst = arith.constant dense<0.000000e+00> : vector<32x64xf32>
    %7 = tpu.matmul %5, %6, %cst {dimension_numbers = #tpu.dot_dimension_numbers<[1], [0], [0], [1], [0, 0, 1, 1], [], []>} : vector<32x512xbf16>, vector<512x64xbf16>, vector<32x64xf32> -> vector<32x64xf32>
    %c0_5 = arith.constant 0 : index
    %c0_6 = arith.constant 0 : index
    %8 = vector.load %arg4[%c0_5, %c0_6] : memref<1x64xf32, #tpu.memory_space<vmem>>, vector<1x64xf32>
    %9 = vector.broadcast %8 : vector<1x64xf32> to vector<32x64xf32>
    %10 = arith.addf %7, %9 : vector<32x64xf32>
    %c0_7 = arith.constant 0 : index
    %c0_8 = arith.constant 0 : index
    %11 = vector.load %arg5[%c0_7, %c0_8] : memref<32x64xf32, #tpu.memory_space<vmem>>, vector<32x64xf32>
    tpu.vector_store %arg5[%c0_7, %c0_8], %10 {strides = array<i32>} : memref<32x64xf32, #tpu.memory_space<vmem>>, vector<32x64xf32>,
    %c32_i32 = arith.constant 32 : i32
    %12 = arith.muli %arg0, %c32_i32 : i32
    %13 = tpu.iota {dimensions = array<i32: 0>} : vector<32x1xi32>
    %14 = vector.broadcast %12 : i32 to vector<32x1xi32>
    %15 = arith.addi %14, %13 : vector<32x1xi32>
    %c32_i32_9 = arith.constant 32 : i32
    %16 = vector.broadcast %c32_i32_9 : i32 to vector<32x1xi32>
    %17 = arith.cmpi slt, %15, %16 : vector<32x1xi32>
    %cst_10 = arith.constant 0.000000e+00 : f32
    %18 = vector.shape_cast %17 : vector<32x1xi1> to vector<32x1xi1>
    %19 = vector.broadcast %18 : vector<32x1xi1> to vector<32x64xi1>
    %20 = vector.broadcast %cst_10 : f32 to vector<32x64xf32>
    %21 = arith.select %19, %10, %20 : vector<32x64xi1>, vector<32x64xf32>
    %c0_11 = arith.constant 0 : index
    %c0_12 = arith.constant 0 : index
    %22 = vector.load %arg6[%c0_11, %c0_12] : memref<1x64xf32, #tpu.memory_space<vmem>>, vector<1x64xf32>
    %cst_13 = arith.constant dense<0.000000e+00> : vector<64xf32>
    %23 = vector.multi_reduction <add>, %21, %cst_13 [0] : vector<32x64xf32> to vector<64xf32>
    %24 = vector.shape_cast %23 : vector<64xf32> to vector<1x64xf32>
    %25 = arith.addf %22, %24 : vector<1x64xf32>
    %c0_14 = arith.constant 0 : index
    %c0_15 = arith.constant 0 : index
    %26 = vector.load %arg6[%c0_14, %c0_15] : memref<1x64xf32, #tpu.memory_space<vmem>>, vector<1x64xf32>
    tpu.vector_store %arg6[%c0_14, %c0_15], %25 {strides = array<i32>} : memref<1x64xf32, #tpu.memory_space<vmem>>, vector<1x64xf32>,
    %c0_16 = arith.constant 0 : index
    %c0_17 = arith.constant 0 : index
    %27 = vector.load %arg7[%c0_16, %c0_17] : memref<1x64xf32, #tpu.memory_space<vmem>>, vector<1x64xf32>
    %28 = arith.mulf %21, %21 : vector<32x64xf32>
    %cst_18 = arith.constant dense<0.000000e+00> : vector<64xf32>
    %29 = vector.multi_reduction <add>, %28, %cst_18 [0] : vector<32x64xf32> to vector<64xf32>
    %30 = vector.shape_cast %29 : vector<64xf32> to vector<1x64xf32>
    %31 = arith.addf %27, %30 : vector<1x64xf32>
    %c0_19 = arith.constant 0 : index
    %c0_20 = arith.constant 0 : index
    %32 = vector.load %arg7[%c0_19, %c0_20] : memref<1x64xf32, #tpu.memory_space<vmem>>, vector<1x64xf32>
    tpu.vector_store %arg7[%c0_19, %c0_20], %31 {strides = array<i32>} : memref<1x64xf32, #tpu.memory_space<vmem>>, vector<1x64xf32>,
    return
  }
  func.func @transform_0(%arg0: i32, %arg1: i32) -> (i32, i32) {
    %c0_i32 = arith.constant 0 : i32
    return %arg0, %arg1 : i32, i32
  }
  func.func @transform_1(%arg0: i32, %arg1: i32) -> (i32, i32) {
    %c0_i32 = arith.constant 0 : i32
    %c0_i32_0 = arith.constant 0 : i32
    return %arg1, %c0_i32 : i32, i32
  }
  func.func @transform_2(%arg0: i32, %arg1: i32) -> (i32, i32) {
    %c0_i32 = arith.constant 0 : i32
    %c0_i32_0 = arith.constant 0 : i32
    %c0_i32_1 = arith.constant 0 : i32
    return %c0_i32, %c0_i32_0 : i32, i32
  }
  func.func @transform_3(%arg0: i32, %arg1: i32) -> (i32, i32) {
    %c0_i32 = arith.constant 0 : i32
    %c0_i32_0 = arith.constant 0 : i32
    return %arg0, %c0_i32 : i32, i32
  }
  func.func @transform_4(%arg0: i32, %arg1: i32) -> (i32, i32) {
    %c0_i32 = arith.constant 0 : i32
    %c0_i32_0 = arith.constant 0 : i32
    %c0_i32_1 = arith.constant 0 : i32
    return %c0_i32, %c0_i32_0 : i32, i32
  }
  func.func @transform_5(%arg0: i32, %arg1: i32) -> (i32, i32) {
    %c0_i32 = arith.constant 0 : i32
    %c0_i32_0 = arith.constant 0 : i32
    %c0_i32_1 = arith.constant 0 : i32
    return %c0_i32, %c0_i32_0 : i32, i32
  }
}

module attributes {stable_mosaic.version = 11 : i64} {
  func.func @kernel(%arg0: i32, %arg1: i32, %arg2: memref<8x1024xbf16, #tpu.memory_space<vmem>>, %arg3: memref<1024x1xbf16, #tpu.memory_space<vmem>>, %arg4: memref<1x1xf32, #tpu.memory_space<vmem>>, %arg5: memref<8x1xf32, #tpu.memory_space<vmem>>) attributes {dimension_semantics = [#tpu.dimension_semantics<parallel>, #tpu.dimension_semantics<arbitrary>], iteration_bounds = array<i64: 1, 1>, scalar_prefetch = 0 : i64, scratch_operands = 0 : i64, tpu.core_type = #tpu.core_type<tc>, window_params = [{transform_indices = @transform_0, window_bounds = array<i64: 8, 1024>}, {transform_indices = @transform_1, window_bounds = array<i64: 1024, 1>}, {pipeline_mode = #tpu.pipeline_mode<synchronous>, transform_indices = @transform_2, window_bounds = array<i64: 1, 1>}, {transform_indices = @transform_3, window_bounds = array<i64: 8, 1>}]} {
    %c0 = arith.constant 0 : index
    %c0_0 = arith.constant 0 : index
    %0 = vector.load %arg2[%c0, %c0_0] : memref<8x1024xbf16, #tpu.memory_space<vmem>>, vector<8x1024xbf16>
    %c0_1 = arith.constant 0 : index
    %c0_2 = arith.constant 0 : index
    %1 = vector.load %arg3[%c0_1, %c0_2] : memref<1024x1xbf16, #tpu.memory_space<vmem>>, vector<1024x1xbf16>
    %cst = arith.constant dense<0.000000e+00> : vector<8x1xf32>
    %2 = tpu.matmul %0, %1, %cst {dimension_numbers = #tpu.dot_dimension_numbers<[1], [0], [0], [1], [0, 0, 1, 1], [], []>} : vector<8x1024xbf16>, vector<1024x1xbf16>, vector<8x1xf32> -> vector<8x1xf32>
    %c0_3 = arith.constant 0 : index
    %c0_4 = arith.constant 0 : index
    %3 = vector.load %arg4[%c0_3, %c0_4] : memref<1x1xf32, #tpu.memory_space<vmem>>, vector<1x1xf32>
    %4 = vector.broadcast %3 : vector<1x1xf32> to vector<8x1xf32>
    %5 = arith.addf %2, %4 : vector<8x1xf32>
    %6 = math.absf %5 : vector<8x1xf32>
    %cst_5 = arith.constant 0.000000e+00 : f32
    %7 = vector.broadcast %cst_5 : f32 to vector<8x1xf32>
    %8 = arith.subf %7, %6 : vector<8x1xf32>
    %9 = math.exp %8 : vector<8x1xf32>
    %cst_6 = arith.constant 0.000000e+00 : f32
    %10 = vector.broadcast %cst_6 : f32 to vector<8x1xf32>
    %11 = arith.cmpf oge, %5, %10 : vector<8x1xf32>
    %cst_7 = arith.constant 1.000000e+00 : f32
    %12 = vector.broadcast %cst_7 : f32 to vector<8x1xf32>
    %13 = arith.select %11, %12, %9 : vector<8x1xi1>, vector<8x1xf32>
    %cst_8 = arith.constant 1.000000e+00 : f32
    %14 = vector.broadcast %cst_8 : f32 to vector<8x1xf32>
    %15 = arith.addf %14, %9 : vector<8x1xf32>
    %16 = tpu.reciprocal %15 : vector<8x1xf32> -> vector<8x1xf32>
    %17 = arith.mulf %13, %16 : vector<8x1xf32>
    %c0_9 = arith.constant 0 : index
    %c0_10 = arith.constant 0 : index
    %18 = vector.load %arg5[%c0_9, %c0_10] : memref<8x1xf32, #tpu.memory_space<vmem>>, vector<8x1xf32>
    tpu.vector_store %arg5[%c0_9, %c0_10], %17 {strides = array<i32>} : memref<8x1xf32, #tpu.memory_space<vmem>>, vector<8x1xf32>,
    return
  }
  func.func @transform_0(%arg0: i32, %arg1: i32) -> (i32, i32) {
    %c0_i32 = arith.constant 0 : i32
    return %arg0, %arg1 : i32, i32
  }
  func.func @transform_1(%arg0: i32, %arg1: i32) -> (i32, i32) {
    %c0_i32 = arith.constant 0 : i32
    %c0_i32_0 = arith.constant 0 : i32
    return %arg1, %c0_i32 : i32, i32
  }
  func.func @transform_2(%arg0: i32, %arg1: i32) -> (i32, i32) {
    %c0_i32 = arith.constant 0 : i32
    %c0_i32_0 = arith.constant 0 : i32
    %c0_i32_1 = arith.constant 0 : i32
    return %c0_i32, %c0_i32_0 : i32, i32
  }
  func.func @transform_3(%arg0: i32, %arg1: i32) -> (i32, i32) {
    %c0_i32 = arith.constant 0 : i32
    %c0_i32_0 = arith.constant 0 : i32
    return %arg0, %c0_i32 : i32, i32
  }
}

</mosaic_0001>

<bundles_post_ra>
// kernel: conditional_discriminator_forward.5
= control target key start
LH: loop header
LB: loop body
LE: loop exit
PB: predicated region body
PF: predicated region fallthrough
CT: control target
= control target key end

     0   :  { %s3301_s12 = smov 0   ;;  %s3303_s13 = smov 0   ;;  %s4370_s0 = inlined_call_operand.vmem [shape: bf16[2048,144], index: 0, kind: input, shape index: {}]   ;;  %s4371_s1 = inlined_call_operand.vmem [shape: bf16[144,8], index: 1, kind: input, shape index: {}]   ;;  %s4372_s2 = inlined_call_operand.vmem [shape: f32[1,8], index: 2, kind: input, shape index: {}]   ;;  %s4373_s3 = inlined_call_operand.vmem [shape: f32[2048,8], index: 3, kind: output, shape index: {}]  }
   0x1   :  { %s3305_s14 = smov 0  }
   0x2 LB: > { %s25_s15 = sadd.s32 1, %s3275_s13  ;;  %p2463_p0 = scmp.ge.s32.totalorder %s3279_s14, 1  ;;  %s3279_s14 = sphi %s3305_s14, %s13_s14   ;;  %s3275_s13 = sphi %s3303_s13, %s4375_s13   ;;  %s3271_s12 = sphi %s3301_s12, %s4374_s12  }
   0x3   : > { %p27_p1 = scmp.ge.s32.totalorder %s25_s15, 2  ;;  %p169_p2 = scmp.lt.s32.totalorder %s3279_s14, 3 }
   0x5   : > { %s4377_s15 = smov (%p27_p1, %s25_s15), 0  ;;  %p170_p3 = pnand %p2463_p0, %p169_p2 }
   0x6   : > { %s2464_s20 = sshll.u32 (!%p170_p3), %s3271_s12, 7 }
   0x7   : > { %173 = sbr.rel (%p170_p3) target bundleno = 688 (0x2b0), region = 32  ;;  %p205_p4 = scmp.lt.s32.totalorder (!%p170_p3), %s2464_s20, 255 }
   0xc   : > { %v3219_v0 = vld [vmem:[%s4371_s1 + $0x38] sm:$0xff]  ;;  %v3220_v1 = vld [vmem:[%s4371_s1 + $0x40] sm:$0xff]  ;;  %v3218_v2 = vld [vmem:[%s4371_s1 + $0x30] sm:$0xff]  ;;  %s4379_s20 = smov (!%p205_p4, %s2464_s20), 255  ;;  %vm1008_vm0 = vcmask 130048   ;;  %vm2243_vm2 = vcmask 64512  }
   0xd   : > { %1201 = vmatpush.bf16.msra.mxu0 %v3219_v0  ;;  %3221 = vmatpush.bf16.msra.mxu2 %v3219_v0  ;;  %s3083_s23 = sshll.u32 %s4379_s20, 3  ;;  %v3217_v3 = vld [vmem:[%s4371_s1 + $0x28] sm:$0xff]  ;;  %v3216_v7 = vld [vmem:[%s4371_s1 + $0x20] sm:$0xff]  ;;  %v3215_v11 = vld [vmem:[%s4371_s1 + $0x18] sm:$0xff] }
   0xe   : > { %1537 = vmatpush.bf16.msra.mxu1 %v3220_v1  ;;  %3229 = vmatpush.bf16.msra.mxu3 %v3220_v1  ;;  %s3336_s26 = scalar_lea.vmem %s4370_s0, %s3083_s23  ;;  %v3214_v12 = vld [vmem:[%s4371_s1 + $0x10] sm:$0xff]  ;;  %v3213_v16 = vld [vmem:[%s4371_s1 + $0x8] sm:$0xff]  ;;  %v3212_v19 = vld [vmem:[%s4371_s1] sm:$0xff]  ;;  %s3470_s19 = scalar_lea.vmem %s4373_s3, %s3083_s23 }
   0xf   : > { %v3084_v4 = vld [vmem:[%s3336_s26 + $0x4] sm:$0xf]  ;;  %v2473_v5 = vld [vmem:[%s3336_s26 + $0x8] sm:$0xf0]  ;;  %v3150_v8 = vld [vmem:[%s3336_s26 + $0x214] sm:$0xf] }
  0x10   : > { %v2476_v6 = vor.u32 %v3084_v4, %v2473_v5  ;;  %v2737_v9 = vld [vmem:[%s3336_s26 + $0x218] sm:$0xf0]  ;;  %v3086_v13 = vld [vmem:[%s3336_s26 + $0x14] sm:$0xf]  ;;  %v3152_v17 = vld [vmem:[%s3336_s26 + $0x224] sm:$0xf] }
  0x11   : > { %1202 = vmatpush.bf16.msra.mxu0 %v3218_v2  ;;  %3222 = vmatpush.bf16.msra.mxu2 %v3218_v2  ;;  %v2740_v10 = vor.u32 %v3150_v8, %v2737_v9  ;;  %v2481_v14 = vld [vmem:[%s3336_s26 + $0x18] sm:$0xf0]  ;;  %v2745_v18 = vld [vmem:[%s3336_s26 + $0x228] sm:$0xf0]  ;;  %v2471_v20 = vld [vmem:[%s3336_s26] sm:$0xf] }
  0x12   : > { %3017 = vmatmul.msk.bf16.vlgmr.msra.gmra.mxu1 %vm1008_vm0, %v2476_v6  ;;  %v2484_v15 = vor.u32 %v3086_v13, %v2481_v14  ;;  %v3085_v21 = vld [vmem:[%s3336_s26 + $0x4] sm:$0xf0]  ;;  %v2748_v22 = vor.u32 %v3152_v17, %v2745_v18  ;;  %v2727_v23 = vld [vmem:[%s3336_s26 + $0x200] sm:$0xf]  ;;  %v3088_v27 = vld [vmem:[%s3336_s26 + $0x24] sm:$0xf] }
  0x13   : > { %3050 = vmatmul.msk.bf16.vlgmr.msra.gmra.mxu3 %vm1008_vm0, %v2740_v10  ;;  %v3149_v24 = vld [vmem:[%s3336_s26 + $0x204] sm:$0xf0]  ;;  %v2472_v25 = vor.u32 %v3085_v21, %v2471_v20  ;;  %v2489_v28 = vld [vmem:[%s3336_s26 + $0x28] sm:$0xf0]  ;;  %v3154_v30 = vld [vmem:[%s3336_s26 + $0x234] sm:$0xf] }
  0x14   : > { %v2728_v26 = vor.u32 %v3149_v24, %v2727_v23  ;;  %v2492_v29 = vor.u32 %v3088_v27, %v2489_v28  ;;  %v2753_v31 = vld [vmem:[%s3336_s26 + $0x238] sm:$0xf0]  ;;  %v2479_v32 = vld [vmem:[%s3336_s26 + $0x10] sm:$0xf]  ;;  %v3087_v33 = vld [vmem:[%s3336_s26 + $0x14] sm:$0xf0] }
  0x15   : > { %1203 = vmatpush.bf16.msra.mxu0 %v3217_v3  ;;  %3223 = vmatpush.bf16.msra.mxu2 %v3217_v3  ;;  %v2756_v34 = vor.u32 %v3154_v30, %v2753_v31  ;;  %v2735_v35 = vld [vmem:[%s3336_s26 + $0x210] sm:$0xf]  ;;  %v3151_v36 = vld [vmem:[%s3336_s26 + $0x214] sm:$0xf0]  ;;  %v2480_v37 = vor.u32 %v3087_v33, %v2479_v32  ;;  %v3090_v39 = vld [vmem:[%s3336_s26 + $0x34] sm:$0xf] }
  0x16   : > { %v2736_v38 = vor.u32 %v3151_v36, %v2735_v35  ;;  %v2497_v40 = vld [vmem:[%s3336_s26 + $0x38] sm:$0xf0]  ;;  %v3156_v42 = vld [vmem:[%s3336_s26 + $0x244] sm:$0xf]  ;;  %v2761_v43 = vld [vmem:[%s3336_s26 + $0x248] sm:$0xf0] }
  0x17   : > { %v2500_v41 = vor.u32 %v3090_v39, %v2497_v40  ;;  %v2487_v44 = vld [vmem:[%s3336_s26 + $0x20] sm:$0xf]  ;;  %v3089_v45 = vld [vmem:[%s3336_s26 + $0x24] sm:$0xf0]  ;;  %v2764_v46 = vor.u32 %v3156_v42, %v2761_v43  ;;  %v3092_v51 = vld [vmem:[%s3336_s26 + $0x44] sm:$0xf] }
  0x18   : > { %v2743_v47 = vld [vmem:[%s3336_s26 + $0x220] sm:$0xf]  ;;  %v3153_v48 = vld [vmem:[%s3336_s26 + $0x224] sm:$0xf0]  ;;  %v2488_v49 = vor.u32 %v3089_v45, %v2487_v44  ;;  %v2505_v52 = vld [vmem:[%s3336_s26 + $0x48] sm:$0xf0] }
  0x19   : > { %1204 = vmatpush.bf16.msra.mxu0 %v3216_v7  ;;  %3224 = vmatpush.bf16.msra.mxu2 %v3216_v7  ;;  %v2744_v50 = vor.u32 %v3153_v48, %v2743_v47  ;;  %v2508_v53 = vor.u32 %v3092_v51, %v2505_v52  ;;  %v3158_v54 = vld [vmem:[%s3336_s26 + $0x254] sm:$0xf]  ;;  %v2769_v55 = vld [vmem:[%s3336_s26 + $0x258] sm:$0xf0]  ;;  %v2495_v56 = vld [vmem:[%s3336_s26 + $0x30] sm:$0xf] }
  0x1a   : > { %v3091_v57 = vld [vmem:[%s3336_s26 + $0x34] sm:$0xf0]  ;;  %v2772_v58 = vor.u32 %v3158_v54, %v2769_v55  ;;  %v2751_v59 = vld [vmem:[%s3336_s26 + $0x230] sm:$0xf]  ;;  %v3094_v63 = vld [vmem:[%s3336_s26 + $0x54] sm:$0xf] }
  0x1b   : > { %v3155_v60 = vld [vmem:[%s3336_s26 + $0x234] sm:$0xf0]  ;;  %v2496_v61 = vor.u32 %v3091_v57, %v2495_v56  ;;  %v2513_v0 = vld [vmem:[%s3336_s26 + $0x58] sm:$0xf0]  ;;  %v3160_v2 = vld [vmem:[%s3336_s26 + $0x264] sm:$0xf] }
  0x1c   : > { %v2752_v62 = vor.u32 %v3155_v60, %v2751_v59  ;;  %v2516_v1 = vor.u32 %v3094_v63, %v2513_v0  ;;  %v2777_v3 = vld [vmem:[%s3336_s26 + $0x268] sm:$0xf0]  ;;  %v2503_v4 = vld [vmem:[%s3336_s26 + $0x40] sm:$0xf]  ;;  %v3093_v5 = vld [vmem:[%s3336_s26 + $0x44] sm:$0xf0] }
  0x1d   : > { %1205 = vmatpush.bf16.msra.mxu0 %v3215_v11  ;;  %3225 = vmatpush.bf16.msra.mxu2 %v3215_v11  ;;  %v2780_v6 = vor.u32 %v3160_v2, %v2777_v3  ;;  %v2759_v7 = vld [vmem:[%s3336_s26 + $0x240] sm:$0xf]  ;;  %v3157_v8 = vld [vmem:[%s3336_s26 + $0x244] sm:$0xf0]  ;;  %v2504_v9 = vor.u32 %v3093_v5, %v2503_v4  ;;  %v3096_v11 = vld [vmem:[%s3336_s26 + $0x64] sm:$0xf] }
  0x1e   : > { %v2760_v10 = vor.u32 %v3157_v8, %v2759_v7  ;;  %v3162_v14 = vld [vmem:[%s3336_s26 + $0x274] sm:$0xf]  ;;  %v3095_v17 = vld [vmem:[%s3336_s26 + $0x54] sm:$0xf0]  ;;  %v2529_v24 = vld [vmem:[%s3336_s26 + $0x78] sm:$0xf0] }
  0x1f   : > { %v3159_v20 = vld [vmem:[%s3336_s26 + $0x254] sm:$0xf0]  ;;  %v3098_v23 = vld [vmem:[%s3336_s26 + $0x74] sm:$0xf]  ;;  %v2793_v27 = vld [vmem:[%s3336_s26 + $0x288] sm:$0xf0] }
  0x20   : > { %v2519_v28 = vld [vmem:[%s3336_s26 + $0x60] sm:$0xf]  ;;  %v3161_v32 = vld [vmem:[%s3336_s26 + $0x264] sm:$0xf0]  ;;  %v3100_v35 = vld [vmem:[%s3336_s26 + $0x84] sm:$0xf] }
  0x21   : > { %1206 = vmatpush.bf16.msra.mxu0 %v3214_v12  ;;  %3226 = vmatpush.bf16.msra.mxu2 %v3214_v12  ;;  %v2521_v12 = vld [vmem:[%s3336_s26 + $0x68] sm:$0xf0]  ;;  %v2775_v31 = vld [vmem:[%s3336_s26 + $0x260] sm:$0xf]  ;;  %v3166_v39 = vld [vmem:[%s3336_s26 + $0x294] sm:$0xf] }
  0x22   : > { %3018 = vmatmul.msk.bf16.gmra.mxu1 %vm1008_vm0, %v2484_v15  ;;  %v2524_v13 = vor.u32 %v3096_v11, %v2521_v12  ;;  %v2785_v15 = vld [vmem:[%s3336_s26 + $0x278] sm:$0xf0]  ;;  %v2537_v36 = vld [vmem:[%s3336_s26 + $0x88] sm:$0xf0]  ;;  %v3099_v42 = vld [vmem:[%s3336_s26 + $0x74] sm:$0xf0] }
  0x23   : > { %3051 = vmatmul.msk.bf16.gmra.mxu3 %vm1008_vm0, %v2748_v22  ;;  %v2788_v18 = vor.u32 %v3162_v14, %v2785_v15  ;;  %v2801_v40 = vld [vmem:[%s3336_s26 + $0x298] sm:$0xf0]  ;;  %v2783_v44 = vld [vmem:[%s3336_s26 + $0x270] sm:$0xf]  ;;  %v3163_v45 = vld [vmem:[%s3336_s26 + $0x274] sm:$0xf0] }
  0x24   : > { %v2804_v43 = vor.u32 %v3166_v39, %v2801_v40  ;;  %v2784_v47 = vor.u32 %v3163_v45, %v2783_v44  ;;  %v2545_v51 = vld [vmem:[%s3336_s26 + $0x98] sm:$0xf0]  ;;  %v3168_v55 = vld [vmem:[%s3336_s26 + $0x2a4] sm:$0xf]  ;;  %v2809_v56 = vld [vmem:[%s3336_s26 + $0x2a8] sm:$0xf0] }
  0x25   : > { %1207 = vmatpush.bf16.msra.mxu0 %v3213_v16  ;;  %3227 = vmatpush.bf16.msra.mxu2 %v3213_v16  ;;  %v2511_v16 = vld [vmem:[%s3336_s26 + $0x50] sm:$0xf]  ;;  %v2535_v57 = vld [vmem:[%s3336_s26 + $0x80] sm:$0xf]  ;;  %v2812_v59 = vor.u32 %v3168_v55, %v2809_v56  ;;  %v2553_v8 = vld [vmem:[%s3336_s26 + $0xa8] sm:$0xf0] }
  0x26   : > { %v2512_v21 = vor.u32 %v3095_v17, %v2511_v16  ;;  %v3456_v60 = vld [vmem:[%s4372_s2] ss:$0 sm:$0xff]  ;;  %v3170_v17 = vld [vmem:[%s3336_s26 + $0x2b4] sm:$0xf] }
  0x27   : > { %v2551_v45 = vld [vmem:[%s3336_s26 + $0xa0] sm:$0xf] }
  0x29   : > { %1208 = vmatpush.bf16.msra.mxu0 %v3212_v19  ;;  %3228 = vmatpush.bf16.msra.mxu2 %v3212_v19  ;;  %v2767_v19 = vld [vmem:[%s3336_s26 + $0x250] sm:$0xf] }
  0x2a   : > { %v2768_v22 = vor.u32 %v3159_v20, %v2767_v19  ;;  %v2543_v19 = vld [vmem:[%s3336_s26 + $0x90] sm:$0xf]  ;;  %v3103_v20 = vld [vmem:[%s3336_s26 + $0x94] sm:$0xf0] }
  0x2c   : > { %1209 = vmatmul.bf16.vlgmr.msra.gmra.mxu0 %v2472_v25  ;;  %1369 = vmatmul.bf16.vlgmr.msra.gmra.mxu2 %v2728_v26  ;;  %v2532_v25 = vor.u32 %v3098_v23, %v2529_v24  ;;  %v3164_v26 = vld [vmem:[%s3336_s26 + $0x284] sm:$0xf]  ;;  %v3167_v24 = vld [vmem:[%s3336_s26 + $0x294] sm:$0xf0] }
  0x2d   : > { %v2796_v30 = vor.u32 %v3164_v26, %v2793_v27  ;;  %v2544_v27 = vor.u32 %v3103_v20, %v2543_v19 }
  0x32   : > { %3019 = vmatmul.msk.bf16.gmra.mxu1 %vm1008_vm0, %v2492_v29  ;;  %v3097_v29 = vld [vmem:[%s3336_s26 + $0x64] sm:$0xf0] }
  0x33   : > { %3052 = vmatmul.msk.bf16.gmra.mxu3 %vm1008_vm0, %v2756_v34  ;;  %v2520_v33 = vor.u32 %v3097_v29, %v2519_v28  ;;  %v2776_v34 = vor.u32 %v3161_v32, %v2775_v31 }
  0x3c   : > { %1214 = vmatmul.bf16.gmra.mxu0 %v2480_v37  ;;  %1374 = vmatmul.bf16.gmra.mxu2 %v2736_v38  ;;  %v2540_v37 = vor.u32 %v3100_v35, %v2537_v36  ;;  %v2561_v36 = vld [vmem:[%s3336_s26 + $0xb8] sm:$0xf0] }
  0x42   : > { %3020 = vmatmul.msk.bf16.gmra.mxu1 %vm1008_vm0, %v2500_v41  ;;  %v2527_v41 = vld [vmem:[%s3336_s26 + $0x70] sm:$0xf] }
  0x43   : > { %3053 = vmatmul.msk.bf16.gmra.mxu3 %vm1008_vm0, %v2764_v46  ;;  %v2528_v46 = vor.u32 %v3099_v42, %v2527_v41 }
  0x4c   : > { %1219 = vmatmul.bf16.gmra.mxu0 %v2488_v49  ;;  %1379 = vmatmul.bf16.gmra.mxu2 %v2744_v50  ;;  %v3102_v50 = vld [vmem:[%s3336_s26 + $0x94] sm:$0xf] }
  0x4d   : > { %v2548_v52 = vor.u32 %v3102_v50, %v2545_v51  ;;  %v3172_v50 = vld [vmem:[%s3336_s26 + $0x2c4] sm:$0xf]  ;;  %v2825_v51 = vld [vmem:[%s3336_s26 + $0x2c8] sm:$0xf0] }
  0x4e   : > { %v2828_v55 = vor.u32 %v3172_v50, %v2825_v51  ;;  %v2577_v51 = vld [vmem:[%s3336_s26 + $0xd8] sm:$0xf0] }
  0x52   : > { %3021 = vmatmul.msk.bf16.gmra.mxu1 %vm1008_vm0, %v2508_v53 }
  0x53   : > { %3054 = vmatmul.msk.bf16.gmra.mxu3 %vm1008_vm0, %v2772_v58  ;;  %v3101_v58 = vld [vmem:[%s3336_s26 + $0x84] sm:$0xf0] }
  0x54   : > { %v2536_v63 = vor.u32 %v3101_v58, %v2535_v57  ;;  %v3169_v57 = vld [vmem:[%s3336_s26 + $0x2a4] sm:$0xf0] }
  0x5c   : > { %1224 = vmatmul.bf16.gmra.mxu0 %v2496_v61  ;;  %1384 = vmatmul.bf16.gmra.mxu2 %v2752_v62  ;;  %v2791_v61 = vld [vmem:[%s3336_s26 + $0x280] sm:$0xf]  ;;  %v3165_v62 = vld [vmem:[%s3336_s26 + $0x284] sm:$0xf0] }
  0x62   : > { %3022 = vmatmul.msk.bf16.gmra.mxu1 %vm1008_vm0, %v2516_v1  ;;  %v2792_v1 = vor.u32 %v3165_v62, %v2791_v61 }
  0x63   : > { %3055 = vmatmul.msk.bf16.gmra.mxu3 %vm1008_vm0, %v2780_v6  ;;  %v3104_v6 = vld [vmem:[%s3336_s26 + $0xa4] sm:$0xf] }
  0x64   : > { %v2556_v12 = vor.u32 %v3104_v6, %v2553_v8  ;;  %v3108_v8 = vld [vmem:[%s3336_s26 + $0xc4] sm:$0xf] }
  0x6c   : > { %1229 = vmatmul.bf16.gmra.mxu0 %v2504_v9  ;;  %1389 = vmatmul.bf16.gmra.mxu2 %v2760_v10 }
  0x72   : > { %3023 = vmatmul.msk.bf16.gmra.mxu1 %vm1008_vm0, %v2524_v13 }
  0x73   : > { %3056 = vmatmul.msk.bf16.gmra.mxu3 %vm1008_vm0, %v2788_v18  ;;  %v2817_v18 = vld [vmem:[%s3336_s26 + $0x2b8] sm:$0xf0] }
  0x7c   : > { %1234 = vmatmul.bf16.gmra.mxu0 %v2512_v21  ;;  %1394 = vmatmul.bf16.gmra.mxu2 %v2768_v22  ;;  %v2799_v21 = vld [vmem:[%s3336_s26 + $0x290] sm:$0xf]  ;;  %v2820_v22 = vor.u32 %v3170_v17, %v2817_v18 }
  0x7d   : > { %v2800_v29 = vor.u32 %v3167_v24, %v2799_v21  ;;  %v2559_v21 = vld [vmem:[%s3336_s26 + $0xb0] sm:$0xf]  ;;  %v3107_v24 = vld [vmem:[%s3336_s26 + $0xb4] sm:$0xf0] }
  0x82   : > { %3024 = vmatmul.msk.bf16.gmra.mxu1 %vm1008_vm0, %v2532_v25 }
  0x83   : > { %3057 = vmatmul.msk.bf16.gmra.mxu3 %vm1008_vm0, %v2796_v30 }
  0x8c   : > { %1239 = vmatmul.bf16.gmra.mxu0 %v2520_v33  ;;  %1399 = vmatmul.bf16.gmra.mxu2 %v2776_v34  ;;  %v3106_v34 = vld [vmem:[%s3336_s26 + $0xb4] sm:$0xf] }
  0x8d   : > { %v2564_v41 = vor.u32 %v3106_v34, %v2561_v36  ;;  %v3171_v34 = vld [vmem:[%s3336_s26 + $0x2b4] sm:$0xf0] }
  0x8f   : > { %v1539_v38 = vpop.f32.mrf.mxu1 }
  0x92   : > { %3025 = vmatmul.msk.bf16.gmra.mxu1 %vm1008_vm0, %v2540_v37 }
  0x93   : > { %3058 = vmatmul.msk.bf16.gmra.mxu3 %vm1008_vm0, %v2804_v43 }
  0x96   : > { %v3442_v49 = vpop.f32.mrf.mxu3 }
  0x97   : > { %v1541_v48 = vpop.f32.mrf.mxu1 }
  0x9c   : > { %1244 = vmatmul.bf16.gmra.mxu0 %v2528_v46  ;;  %1404 = vmatmul.bf16.gmra.mxu2 %v2784_v47 }
  0x9e   : > { %v3446_v54 = vpop.f32.mrf.mxu3 }
  0x9f   : > { %v1544_v53 = vpop.f32.mrf.mxu1 }
  0xa2   : > { %3026 = vmatmul.msk.bf16.gmra.mxu1 %vm1008_vm0, %v2548_v52 }
  0xa3   : > { %3059 = vmatmul.msk.bf16.gmra.mxu3 %vm1008_vm0, %v2812_v59 }
  0xa6   : > { %v3462_v4 = vpop.f32.mrf.mxu3 }
  0xa7   : > { %v1546_v3 = vpop.f32.mrf.mxu1 }
  0xa9   : > { %v1210_v0 = vpop.f32.mrf.mxu0 }
  0xaa   : > { %v1211_v2 = vadd.f32 %v3456_v60, %v1210_v0 }
  0xac   : > { %v1540_v5 = vadd.f32 %v1539_v38, %v1211_v2  ;;  %1249 = vmatmul.bf16.gmra.mxu0 %v2536_v63  ;;  %1409 = vmatmul.bf16.gmra.mxu2 %v2792_v1 }
  0xae   : > { %vm1859_vm1 = vcmp.ge.f32.partialorder %v1540_v5, 0.0  ;;  %v1987_v7 = vmul.f32 0.2, %v1540_v5  ;;  %v3480_v15 = vpop.f32.mrf.mxu3 }
  0xaf   : > { %v3473_v10 = vpop.f32.mrf.mxu2  ;;  %v3478_v14 = vpop.f32.mrf.mxu1 }
  0xb0   : > { %v2115_v9 = vsel %vm1859_vm1, %v1540_v5, %v1987_v7 }
  0xb1   : > { %2244 = vst.msk [vmem:[%s3470_s19] sm:$0xff] %vm2243_vm2, %v2115_v9  ;;  %v1212_v11 = vpop.f32.mrf.mxu0 }
  0xb2   : > { %v1213_v13 = vadd.f32 %v3456_v60, %v1212_v11  ;;  %3027 = vmatmul.msk.bf16.gmra.mxu1 %vm1008_vm0, %v2556_v12  ;;  %v2569_v11 = vld [vmem:[%s3336_s26 + $0xc8] sm:$0xf0] }
  0xb3   : > { %3060 = vmatmul.msk.bf16.gmra.mxu3 %vm1008_vm0, %v2820_v22  ;;  %v2572_v17 = vor.u32 %v3108_v8, %v2569_v11 }
  0xb4   : > { %v1542_v16 = vadd.f32 %v1541_v48, %v1213_v13  ;;  %v3105_v48 = vld [vmem:[%s3336_s26 + $0xa4] sm:$0xf0] }
  0xb5   : > { %v2552_v61 = vor.u32 %v3105_v48, %v2551_v45  ;;  %v3110_v48 = vld [vmem:[%s3336_s26 + $0xd4] sm:$0xf] }
  0xb6   : > { %vm1860_vm3 = vcmp.ge.f32.partialorder %v1542_v16, 0.0  ;;  %v1988_v23 = vmul.f32 0.2, %v1542_v16  ;;  %v3497_v32 = vpop.f32.mrf.mxu3 }
  0xb7   : > { %v3489_v26 = vpop.f32.mrf.mxu2  ;;  %v3495_v31 = vpop.f32.mrf.mxu1 }
  0xb8   : > { %v2116_v25 = vsel %vm1860_vm3, %v1542_v16, %v1988_v23 }
  0xb9   : > { %2245 = vst.msk [vmem:[%s3470_s19 + $0x8] sm:$0xff] %vm2243_vm2, %v2116_v25  ;;  %v1215_v28 = vpop.f32.mrf.mxu0  ;;  %v3174_v25 = vld [vmem:[%s3336_s26 + $0x2d4] sm:$0xf] }
  0xba   : > { %v1216_v30 = vadd.f32 %v3456_v60, %v1215_v28 }
  0xbc   : > { %v1545_v33 = vadd.f32 %v1544_v53, %v1216_v30  ;;  %1254 = vmatmul.bf16.gmra.mxu0 %v2544_v27  ;;  %1414 = vmatmul.bf16.gmra.mxu2 %v2800_v29  ;;  %v2807_v53 = vld [vmem:[%s3336_s26 + $0x2a0] sm:$0xf]  ;;  %v2833_v27 = vld [vmem:[%s3336_s26 + $0x2d8] sm:$0xf0]  ;;  %v2815_v29 = vld [vmem:[%s3336_s26 + $0x2b0] sm:$0xf] }
  0xbd   : > { %v2808_v0 = vor.u32 %v3169_v57, %v2807_v53  ;;  %v2836_v30 = vor.u32 %v3174_v25, %v2833_v27  ;;  %v2585_v27 = vld [vmem:[%s3336_s26 + $0xe8] sm:$0xf0] }
  0xbe   : > { %vm1861_vm4 = vcmp.ge.f32.partialorder %v1545_v33, 0.0  ;;  %v1989_v35 = vmul.f32 0.2, %v1545_v33  ;;  %v3509_v46 = vpop.f32.mrf.mxu3 }
  0xbf   : > { %v1375_v38 = vpop.f32.mrf.mxu2  ;;  %v3505_v43 = vpop.f32.mrf.mxu1 }
  0xc0   : > { %v2117_v37 = vsel %vm1861_vm4, %v1545_v33, %v1989_v35  ;;  %v1376_v39 = vadd.f32 %v3456_v60, %v1375_v38 }
  0xc1   : > { %2246 = vst.msk [vmem:[%s3470_s19 + $0x10] sm:$0xff] %vm2243_vm2, %v2117_v37  ;;  %v1217_v40 = vpop.f32.mrf.mxu0 }
  0xc2   : > { %v1218_v42 = vadd.f32 %v3456_v60, %v1217_v40  ;;  %v1705_v44 = vadd.f32 %v3442_v49, %v1376_v39  ;;  %3028 = vmatmul.msk.bf16.gmra.mxu1 %vm1008_vm0, %v2564_v41  ;;  %v2816_v39 = vor.u32 %v3171_v34, %v2815_v29 }
  0xc3   : > { %3061 = vmatmul.msk.bf16.gmra.mxu3 %vm1008_vm0, %v2828_v55 }
  0xc4   : > { %v1547_v47 = vadd.f32 %v1546_v3, %v1218_v42  ;;  %vm1925_vm5 = vcmp.ge.f32.partialorder %v1705_v44, 0.0  ;;  %v2053_v52 = vmul.f32 0.2, %v1705_v44 }
  0xc6   : > { %vm1862_vm6 = vcmp.ge.f32.partialorder %v1547_v47, 0.0  ;;  %v1990_v56 = vmul.f32 0.2, %v1547_v47  ;;  %v2181_v58 = vsel %vm1925_vm5, %v1705_v44, %v2053_v52  ;;  %v3527_v5 = vpop.f32.mrf.mxu3 }
  0xc7   : > { %2310 = vst.msk [vmem:[%s3470_s19 + $0x210] sm:$0xff] %vm2243_vm2, %v2181_v58  ;;  %v1377_v59 = vpop.f32.mrf.mxu2  ;;  %v3524_v2 = vpop.f32.mrf.mxu1 }
  0xc8   : > { %v2118_v49 = vsel %vm1862_vm6, %v1547_v47, %v1990_v56  ;;  %v1378_v62 = vadd.f32 %v3456_v60, %v1377_v59  ;;  %v2580_v56 = vor.u32 %v3110_v48, %v2577_v51  ;;  %v2567_v59 = vld [vmem:[%s3336_s26 + $0xc0] sm:$0xf] }
  0xc9   : > { %2247 = vst.msk [vmem:[%s3470_s19 + $0x18] sm:$0xff] %vm2243_vm2, %v2118_v49  ;;  %v1220_v63 = vpop.f32.mrf.mxu0 }
  0xca   : > { %v1221_v1 = vadd.f32 %v3456_v60, %v1220_v63  ;;  %v1707_v3 = vadd.f32 %v3446_v54, %v1378_v62  ;;  %v3109_v63 = vld [vmem:[%s3336_s26 + $0xc4] sm:$0xf0] }
  0xcc   : > { %v1550_v6 = vadd.f32 %v3478_v14, %v1221_v1  ;;  %1259 = vmatmul.bf16.gmra.mxu0 %v2552_v61  ;;  %vm1926_vm7 = vcmp.ge.f32.partialorder %v1707_v3, 0.0  ;;  %v2054_v7 = vmul.f32 0.2, %v1707_v3  ;;  %1419 = vmatmul.bf16.gmra.mxu2 %v2808_v0  ;;  %v3176_v0 = vld [vmem:[%s3336_s26 + $0x2e4] sm:$0xf] }
  0xcd   : > { %v2841_v1 = vld [vmem:[%s3336_s26 + $0x2e8] sm:$0xf0] }
  0xce   : > { %vm1863_vm8 = vcmp.ge.f32.partialorder %v1550_v6, 0.0  ;;  %v1991_v9 = vmul.f32 0.2, %v1550_v6  ;;  %v2182_v12 = vsel %vm1926_vm7, %v1707_v3, %v2054_v7  ;;  %v3542_v22 = vpop.f32.mrf.mxu3  ;;  %v2844_v7 = vor.u32 %v3176_v0, %v2841_v1  ;;  %v2593_v1 = vld [vmem:[%s3336_s26 + $0xf8] sm:$0xf0] }
  0xcf   : > { %2311 = vst.msk [vmem:[%s3470_s19 + $0x218] sm:$0xff] %vm2243_vm2, %v2182_v12  ;;  %v1380_v13 = vpop.f32.mrf.mxu2  ;;  %v3538_v19 = vpop.f32.mrf.mxu1 }
  0xd0   : > { %v2119_v54 = vsel %vm1863_vm8, %v1550_v6, %v1991_v9  ;;  %v1381_v14 = vadd.f32 %v3456_v60, %v1380_v13  ;;  %v2823_v6 = vld [vmem:[%s3336_s26 + $0x2c0] sm:$0xf]  ;;  %v3173_v9 = vld [vmem:[%s3336_s26 + $0x2c4] sm:$0xf0] }
  0xd1   : > { %2248 = vst.msk [vmem:[%s3470_s19 + $0x20] sm:$0xff] %vm2243_vm2, %v2119_v54  ;;  %v1222_v16 = vpop.f32.mrf.mxu0 }
  0xd2   : > { %v1223_v18 = vadd.f32 %v3456_v60, %v1222_v16  ;;  %v1710_v20 = vadd.f32 %v3462_v4, %v1381_v14  ;;  %3029 = vmatmul.msk.bf16.gmra.mxu1 %vm1008_vm0, %v2572_v17  ;;  %v2824_v14 = vor.u32 %v3173_v9, %v2823_v6 }
  0xd3   : > { %3062 = vmatmul.msk.bf16.gmra.mxu3 %vm1008_vm0, %v2836_v30 }
  0xd4   : > { %v1552_v23 = vadd.f32 %v3495_v31, %v1223_v18  ;;  %vm1927_vm9 = vcmp.ge.f32.partialorder %v1710_v20, 0.0  ;;  %v2055_v28 = vmul.f32 0.2, %v1710_v20  ;;  %v2560_v31 = vor.u32 %v3107_v24, %v2559_v21  ;;  %v3112_v24 = vld [vmem:[%s3336_s26 + $0xe4] sm:$0xf] }
  0xd6   : > { %vm1864_vm10 = vcmp.ge.f32.partialorder %v1552_v23, 0.0  ;;  %v1992_v33 = vmul.f32 0.2, %v1552_v23  ;;  %v2183_v4 = vsel %vm1927_vm9, %v1710_v20, %v2055_v28  ;;  %v3561_v44 = vpop.f32.mrf.mxu3 }
  0xd7   : > { %2312 = vst.msk [vmem:[%s3470_s19 + $0x220] sm:$0xff] %vm2243_vm2, %v2183_v4  ;;  %v1382_v36 = vpop.f32.mrf.mxu2  ;;  %v3558_v41 = vpop.f32.mrf.mxu1 }
  0xd8   : > { %v2120_v35 = vsel %vm1864_vm10, %v1552_v23, %v1992_v33  ;;  %v1383_v37 = vadd.f32 %v3456_v60, %v1382_v36  ;;  %v2588_v33 = vor.u32 %v3112_v24, %v2585_v27  ;;  %v2575_v36 = vld [vmem:[%s3336_s26 + $0xd0] sm:$0xf] }
  0xd9   : > { %2249 = vst.msk [vmem:[%s3470_s19 + $0x28] sm:$0xff] %vm2243_vm2, %v2120_v35  ;;  %v1225_v38 = vpop.f32.mrf.mxu0 }
  0xda   : > { %v1226_v40 = vadd.f32 %v3456_v60, %v1225_v38  ;;  %v1712_v42 = vadd.f32 %v3480_v15, %v1383_v37  ;;  %v3111_v38 = vld [vmem:[%s3336_s26 + $0xd4] sm:$0xf0] }
  0xdc   : > { %v1555_v45 = vadd.f32 %v3505_v43, %v1226_v40  ;;  %1264 = vmatmul.bf16.gmra.mxu0 %v2560_v31  ;;  %vm1928_vm11 = vcmp.ge.f32.partialorder %v1712_v42, 0.0  ;;  %v2056_v47 = vmul.f32 0.2, %v1712_v42  ;;  %1424 = vmatmul.bf16.gmra.mxu2 %v2816_v39  ;;  %v3178_v39 = vld [vmem:[%s3336_s26 + $0x2f4] sm:$0xf] }
  0xdd   : > { %v2849_v40 = vld [vmem:[%s3336_s26 + $0x2f8] sm:$0xf0] }
  0xde   : > { %vm1865_vm12 = vcmp.ge.f32.partialorder %v1555_v45, 0.0  ;;  %v1993_v50 = vmul.f32 0.2, %v1555_v45  ;;  %v2184_v52 = vsel %vm1928_vm11, %v1712_v42, %v2056_v47  ;;  %v3576_v61 = vpop.f32.mrf.mxu3  ;;  %v2852_v47 = vor.u32 %v3178_v39, %v2849_v40  ;;  %v2601_v40 = vld [vmem:[%s3336_s26 + $0x108] sm:$0xf0] }
  0xdf   : > { %2313 = vst.msk [vmem:[%s3470_s19 + $0x228] sm:$0xff] %vm2243_vm2, %v2184_v52  ;;  %v1385_v53 = vpop.f32.mrf.mxu2  ;;  %v3572_v58 = vpop.f32.mrf.mxu1 }
  0xe0   : > { %v2121_v15 = vsel %vm1865_vm12, %v1555_v45, %v1993_v50  ;;  %v1386_v43 = vadd.f32 %v3456_v60, %v1385_v53  ;;  %v2831_v45 = vld [vmem:[%s3336_s26 + $0x2d0] sm:$0xf]  ;;  %v3175_v50 = vld [vmem:[%s3336_s26 + $0x2d4] sm:$0xf0] }
  0xe1   : > { %2250 = vst.msk [vmem:[%s3470_s19 + $0x30] sm:$0xff] %vm2243_vm2, %v2121_v15  ;;  %v1227_v55 = vpop.f32.mrf.mxu0 }
  0xe2   : > { %v1228_v57 = vadd.f32 %v3456_v60, %v1227_v55  ;;  %v1715_v49 = vadd.f32 %v3497_v32, %v1386_v43  ;;  %3030 = vmatmul.msk.bf16.gmra.mxu1 %vm1008_vm0, %v2580_v56  ;;  %v2832_v43 = vor.u32 %v3175_v50, %v2831_v45 }
  0xe3   : > { %3063 = vmatmul.msk.bf16.gmra.mxu3 %vm1008_vm0, %v2844_v7 }
  0xe4   : > { %v1557_v62 = vadd.f32 %v3524_v2, %v1228_v57  ;;  %vm1929_vm13 = vcmp.ge.f32.partialorder %v1715_v49, 0.0  ;;  %v2057_v3 = vmul.f32 0.2, %v1715_v49  ;;  %v2568_v2 = vor.u32 %v3109_v63, %v2567_v59  ;;  %v3114_v63 = vld [vmem:[%s3336_s26 + $0xf4] sm:$0xf] }
  0xe6   : > { %vm1866_vm14 = vcmp.ge.f32.partialorder %v1557_v62, 0.0  ;;  %v1994_v8 = vmul.f32 0.2, %v1557_v62  ;;  %v2185_v32 = vsel %vm1929_vm13, %v1715_v49, %v2057_v3  ;;  %v3595_v20 = vpop.f32.mrf.mxu3 }
  0xe7   : > { %2314 = vst.msk [vmem:[%s3470_s19 + $0x230] sm:$0xff] %vm2243_vm2, %v2185_v32  ;;  %v1387_v12 = vpop.f32.mrf.mxu2  ;;  %v3592_v17 = vpop.f32.mrf.mxu1 }
  0xe8   : > { %v2122_v11 = vsel %vm1866_vm14, %v1557_v62, %v1994_v8  ;;  %v1388_v54 = vadd.f32 %v3456_v60, %v1387_v12  ;;  %v2596_v8 = vor.u32 %v3114_v63, %v2593_v1  ;;  %v2583_v12 = vld [vmem:[%s3336_s26 + $0xe0] sm:$0xf] }
  0xe9   : > { %2251 = vst.msk [vmem:[%s3470_s19 + $0x38] sm:$0xff] %vm2243_vm2, %v2122_v11  ;;  %v1230_v13 = vpop.f32.mrf.mxu0 }
  0xea   : > { %v1231_v16 = vadd.f32 %v3456_v60, %v1230_v13  ;;  %v1717_v18 = vadd.f32 %v3509_v46, %v1388_v54  ;;  %v3113_v13 = vld [vmem:[%s3336_s26 + $0xe4] sm:$0xf0] }
  0xec   : > { %v1560_v21 = vadd.f32 %v3538_v19, %v1231_v16  ;;  %1269 = vmatmul.bf16.gmra.mxu0 %v2568_v2  ;;  %vm1930_vm15 = vcmp.ge.f32.partialorder %v1717_v18, 0.0  ;;  %v2058_v23 = vmul.f32 0.2, %v1717_v18  ;;  %1429 = vmatmul.bf16.gmra.mxu2 %v2824_v14  ;;  %v3180_v14 = vld [vmem:[%s3336_s26 + $0x304] sm:$0xf] }
  0xed   : > { %v2857_v16 = vld [vmem:[%s3336_s26 + $0x308] sm:$0xf0] }
  0xee   : > { %vm1867_vm1 = vcmp.ge.f32.partialorder %v1560_v21, 0.0  ;;  %v1995_v25 = vmul.f32 0.2, %v1560_v21  ;;  %v2186_v28 = vsel %vm1930_vm15, %v1717_v18, %v2058_v23  ;;  %v3610_v31 = vpop.f32.mrf.mxu3  ;;  %v2860_v23 = vor.u32 %v3180_v14, %v2857_v16  ;;  %v2609_v16 = vld [vmem:[%s3336_s26 + $0x118] sm:$0xf0] }
  0xef   : > { %2315 = vst.msk [vmem:[%s3470_s19 + $0x238] sm:$0xff] %vm2243_vm2, %v2186_v28  ;;  %v1390_v29 = vpop.f32.mrf.mxu2  ;;  %v3606_v4 = vpop.f32.mrf.mxu1 }
  0xf0   : > { %v2123_v46 = vsel %vm1867_vm1, %v1560_v21, %v1995_v25  ;;  %v1391_v19 = vadd.f32 %v3456_v60, %v1390_v29  ;;  %v2839_v21 = vld [vmem:[%s3336_s26 + $0x2e0] sm:$0xf]  ;;  %v3177_v25 = vld [vmem:[%s3336_s26 + $0x2e4] sm:$0xf0] }
  0xf1   : > { %2252 = vst.msk [vmem:[%s3470_s19 + $0x40] sm:$0xff] %vm2243_vm2, %v2123_v46  ;;  %v1232_v30 = vpop.f32.mrf.mxu0 }
  0xf2   : > { %v1233_v34 = vadd.f32 %v3456_v60, %v1232_v30  ;;  %v1720_v35 = vadd.f32 %v3527_v5, %v1391_v19  ;;  %3031 = vmatmul.msk.bf16.gmra.mxu1 %vm1008_vm0, %v2588_v33  ;;  %v2840_v19 = vor.u32 %v3177_v25, %v2839_v21 }
  0xf3   : > { %3064 = vmatmul.msk.bf16.gmra.mxu3 %vm1008_vm0, %v2852_v47 }
  0xf4   : > { %v1562_v37 = vadd.f32 %v3558_v41, %v1233_v34  ;;  %vm1931_vm3 = vcmp.ge.f32.partialorder %v1720_v35, 0.0  ;;  %v2059_v42 = vmul.f32 0.2, %v1720_v35  ;;  %v2576_v41 = vor.u32 %v3111_v38, %v2575_v36  ;;  %v3116_v38 = vld [vmem:[%s3336_s26 + $0x104] sm:$0xf] }
  0xf6   : > { %vm1868_vm4 = vcmp.ge.f32.partialorder %v1562_v37, 0.0  ;;  %v1996_v48 = vmul.f32 0.2, %v1562_v37  ;;  %v2187_v5 = vsel %vm1931_vm3, %v1720_v35, %v2059_v42  ;;  %v3629_v49 = vpop.f32.mrf.mxu3 }
  0xf7   : > { %2316 = vst.msk [vmem:[%s3470_s19 + $0x240] sm:$0xff] %vm2243_vm2, %v2187_v5  ;;  %v1392_v52 = vpop.f32.mrf.mxu2  ;;  %v3626_v56 = vpop.f32.mrf.mxu1 }
  0xf8   : > { %v2124_v51 = vsel %vm1868_vm4, %v1562_v37, %v1996_v48  ;;  %v1393_v15 = vadd.f32 %v3456_v60, %v1392_v52  ;;  %v2604_v48 = vor.u32 %v3116_v38, %v2601_v40  ;;  %v2591_v52 = vld [vmem:[%s3336_s26 + $0xf0] sm:$0xf] }
  0xf9   : > { %2253 = vst.msk [vmem:[%s3470_s19 + $0x48] sm:$0xff] %vm2243_vm2, %v2124_v51  ;;  %v1235_v53 = vpop.f32.mrf.mxu0 }
  0xfa   : > { %v1236_v55 = vadd.f32 %v3456_v60, %v1235_v53  ;;  %v1722_v57 = vadd.f32 %v3542_v22, %v1393_v15  ;;  %v3115_v53 = vld [vmem:[%s3336_s26 + $0xf4] sm:$0xf0] }
  0xfc   : > { %v1565_v59 = vadd.f32 %v3572_v58, %v1236_v55  ;;  %1274 = vmatmul.bf16.gmra.mxu0 %v2576_v41  ;;  %vm1932_vm5 = vcmp.ge.f32.partialorder %v1722_v57, 0.0  ;;  %v2060_v62 = vmul.f32 0.2, %v1722_v57  ;;  %1434 = vmatmul.bf16.gmra.mxu2 %v2832_v43  ;;  %v3182_v43 = vld [vmem:[%s3336_s26 + $0x314] sm:$0xf] }
  0xfd   : > { %v2865_v55 = vld [vmem:[%s3336_s26 + $0x318] sm:$0xf0] }
  0xfe   : > { %vm1869_vm6 = vcmp.ge.f32.partialorder %v1565_v59, 0.0  ;;  %v1997_v0 = vmul.f32 0.2, %v1565_v59  ;;  %v2188_v3 = vsel %vm1932_vm5, %v1722_v57, %v2060_v62  ;;  %v3644_v2 = vpop.f32.mrf.mxu3  ;;  %v2868_v62 = vor.u32 %v3182_v43, %v2865_v55  ;;  %v2617_v55 = vld [vmem:[%s3336_s26 + $0x128] sm:$0xf0] }
  0xff   : > { %2317 = vst.msk [vmem:[%s3470_s19 + $0x248] sm:$0xff] %vm2243_vm2, %v2188_v3  ;;  %v1395_v6 = vpop.f32.mrf.mxu2  ;;  %v3640_v32 = vpop.f32.mrf.mxu1 }
 0x100   : > { %v2125_v22 = vsel %vm1869_vm6, %v1565_v59, %v1997_v0  ;;  %v1396_v58 = vadd.f32 %v3456_v60, %v1395_v6  ;;  %v2847_v59 = vld [vmem:[%s3336_s26 + $0x2f0] sm:$0xf]  ;;  %v3179_v0 = vld [vmem:[%s3336_s26 + $0x2f4] sm:$0xf0] }
 0x101   : > { %2254 = vst.msk [vmem:[%s3470_s19 + $0x50] sm:$0xff] %vm2243_vm2, %v2125_v22  ;;  %v1237_v7 = vpop.f32.mrf.mxu0 }
 0x102   : > { %v1238_v9 = vadd.f32 %v3456_v60, %v1237_v7  ;;  %v1725_v11 = vadd.f32 %v3561_v44, %v1396_v58  ;;  %3032 = vmatmul.msk.bf16.gmra.mxu1 %vm1008_vm0, %v2596_v8  ;;  %v2848_v58 = vor.u32 %v3179_v0, %v2847_v59 }
 0x103   : > { %3065 = vmatmul.msk.bf16.gmra.mxu3 %vm1008_vm0, %v2860_v23 }
 0x104   : > { %v1567_v54 = vadd.f32 %v3592_v17, %v1238_v9  ;;  %vm1933_vm7 = vcmp.ge.f32.partialorder %v1725_v11, 0.0  ;;  %v2061_v18 = vmul.f32 0.2, %v1725_v11  ;;  %v2584_v17 = vor.u32 %v3113_v13, %v2583_v12  ;;  %v3118_v13 = vld [vmem:[%s3336_s26 + $0x114] sm:$0xf] }
 0x106   : > { %vm1870_vm8 = vcmp.ge.f32.partialorder %v1567_v54, 0.0  ;;  %v1998_v24 = vmul.f32 0.2, %v1567_v54  ;;  %v2189_v44 = vsel %vm1933_vm7, %v1725_v11, %v2061_v18  ;;  %v3663_v35 = vpop.f32.mrf.mxu3 }
 0x107   : > { %2318 = vst.msk [vmem:[%s3470_s19 + $0x250] sm:$0xff] %vm2243_vm2, %v2189_v44  ;;  %v1397_v28 = vpop.f32.mrf.mxu2  ;;  %v3660_v33 = vpop.f32.mrf.mxu1 }
 0x108   : > { %v2126_v27 = vsel %vm1870_vm8, %v1567_v54, %v1998_v24  ;;  %v1398_v46 = vadd.f32 %v3456_v60, %v1397_v28  ;;  %v2612_v24 = vor.u32 %v3118_v13, %v2609_v16  ;;  %v2599_v28 = vld [vmem:[%s3336_s26 + $0x100] sm:$0xf] }
 0x109   : > { %2255 = vst.msk [vmem:[%s3470_s19 + $0x58] sm:$0xff] %vm2243_vm2, %v2126_v27  ;;  %v1240_v29 = vpop.f32.mrf.mxu0 }
 0x10a   : > { %v1241_v30 = vadd.f32 %v3456_v60, %v1240_v29  ;;  %v1727_v34 = vadd.f32 %v3576_v61, %v1398_v46  ;;  %v3117_v29 = vld [vmem:[%s3336_s26 + $0x104] sm:$0xf0] }
 0x10c   : > { %v1570_v36 = vadd.f32 %v3606_v4, %v1241_v30  ;;  %1279 = vmatmul.bf16.gmra.mxu0 %v2584_v17  ;;  %vm1934_vm9 = vcmp.ge.f32.partialorder %v1727_v34, 0.0  ;;  %v2062_v37 = vmul.f32 0.2, %v1727_v34  ;;  %1439 = vmatmul.bf16.gmra.mxu2 %v2840_v19  ;;  %v3184_v19 = vld [vmem:[%s3336_s26 + $0x324] sm:$0xf] }
 0x10d   : > { %v2873_v30 = vld [vmem:[%s3336_s26 + $0x328] sm:$0xf0] }
 0x10e   : > { %vm1871_vm10 = vcmp.ge.f32.partialorder %v1570_v36, 0.0  ;;  %v1999_v39 = vmul.f32 0.2, %v1570_v36  ;;  %v2190_v42 = vsel %vm1934_vm9, %v1727_v34, %v2062_v37  ;;  %v3678_v41 = vpop.f32.mrf.mxu3  ;;  %v2876_v37 = vor.u32 %v3184_v19, %v2873_v30  ;;  %v2625_v30 = vld [vmem:[%s3336_s26 + $0x138] sm:$0xf0] }
 0x10f   : > { %2319 = vst.msk [vmem:[%s3470_s19 + $0x258] sm:$0xff] %vm2243_vm2, %v2190_v42  ;;  %v1400_v45 = vpop.f32.mrf.mxu2  ;;  %v3674_v5 = vpop.f32.mrf.mxu1 }
 0x110   : > { %v2127_v61 = vsel %vm1871_vm10, %v1570_v36, %v1999_v39  ;;  %v1401_v4 = vadd.f32 %v3456_v60, %v1400_v45  ;;  %v2855_v36 = vld [vmem:[%s3336_s26 + $0x300] sm:$0xf]  ;;  %v3181_v39 = vld [vmem:[%s3336_s26 + $0x304] sm:$0xf0] }
 0x111   : > { %2256 = vst.msk [vmem:[%s3470_s19 + $0x60] sm:$0xff] %vm2243_vm2, %v2127_v61  ;;  %v1242_v47 = vpop.f32.mrf.mxu0 }
 0x112   : > { %v1243_v50 = vadd.f32 %v3456_v60, %v1242_v47  ;;  %v1730_v51 = vadd.f32 %v3595_v20, %v1401_v4  ;;  %3033 = vmatmul.msk.bf16.gmra.mxu1 %vm1008_vm0, %v2604_v48  ;;  %v2856_v4 = vor.u32 %v3181_v39, %v2855_v36 }
 0x113   : > { %3066 = vmatmul.msk.bf16.gmra.mxu3 %vm1008_vm0, %v2868_v62 }
 0x114   : > { %v1572_v15 = vadd.f32 %v3626_v56, %v1243_v50  ;;  %vm1935_vm11 = vcmp.ge.f32.partialorder %v1730_v51, 0.0  ;;  %v2063_v57 = vmul.f32 0.2, %v1730_v51  ;;  %v2592_v56 = vor.u32 %v3115_v53, %v2591_v52  ;;  %v3120_v53 = vld [vmem:[%s3336_s26 + $0x124] sm:$0xf] }
 0x116   : > { %vm1872_vm12 = vcmp.ge.f32.partialorder %v1572_v15, 0.0  ;;  %v2000_v63 = vmul.f32 0.2, %v1572_v15  ;;  %v2191_v20 = vsel %vm1935_vm11, %v1730_v51, %v2063_v57  ;;  %v3697_v11 = vpop.f32.mrf.mxu3 }
 0x117   : > { %2320 = vst.msk [vmem:[%s3470_s19 + $0x260] sm:$0xff] %vm2243_vm2, %v2191_v20  ;;  %v1402_v3 = vpop.f32.mrf.mxu2  ;;  %v3694_v8 = vpop.f32.mrf.mxu1 }
 0x118   : > { %v2128_v1 = vsel %vm1872_vm12, %v1572_v15, %v2000_v63  ;;  %v1403_v22 = vadd.f32 %v3456_v60, %v1402_v3  ;;  %v2620_v63 = vor.u32 %v3120_v53, %v2617_v55  ;;  %v2607_v3 = vld [vmem:[%s3336_s26 + $0x110] sm:$0xf] }
 0x119   : > { %2257 = vst.msk [vmem:[%s3470_s19 + $0x68] sm:$0xff] %vm2243_vm2, %v2128_v1  ;;  %v1245_v6 = vpop.f32.mrf.mxu0 }
 0x11a   : > { %v1246_v7 = vadd.f32 %v3456_v60, %v1245_v6  ;;  %v1732_v9 = vadd.f32 %v3610_v31, %v1403_v22  ;;  %v3119_v6 = vld [vmem:[%s3336_s26 + $0x114] sm:$0xf0] }
 0x11c   : > { %v1575_v12 = vadd.f32 %v3640_v32, %v1246_v7  ;;  %1284 = vmatmul.bf16.gmra.mxu0 %v2592_v56  ;;  %vm1936_vm13 = vcmp.ge.f32.partialorder %v1732_v9, 0.0  ;;  %v2064_v54 = vmul.f32 0.2, %v1732_v9  ;;  %1444 = vmatmul.bf16.gmra.mxu2 %v2848_v58  ;;  %v3186_v58 = vld [vmem:[%s3336_s26 + $0x334] sm:$0xf] }
 0x11d   : > { %v2881_v7 = vld [vmem:[%s3336_s26 + $0x338] sm:$0xf0] }
 0x11e   : > { %vm1873_vm14 = vcmp.ge.f32.partialorder %v1575_v12, 0.0  ;;  %v2001_v14 = vmul.f32 0.2, %v1575_v12  ;;  %v2192_v18 = vsel %vm1936_vm13, %v1732_v9, %v2064_v54  ;;  %v3712_v17 = vpop.f32.mrf.mxu3  ;;  %v2884_v54 = vor.u32 %v3186_v58, %v2881_v7  ;;  %v2633_v7 = vld [vmem:[%s3336_s26 + $0x148] sm:$0xf0] }
 0x11f   : > { %2321 = vst.msk [vmem:[%s3470_s19 + $0x268] sm:$0xff] %vm2243_vm2, %v2192_v18  ;;  %v1405_v21 = vpop.f32.mrf.mxu2  ;;  %v3708_v44 = vpop.f32.mrf.mxu1 }
 0x120   : > { %v2129_v31 = vsel %vm1873_vm14, %v1575_v12, %v2001_v14  ;;  %v1406_v32 = vadd.f32 %v3456_v60, %v1405_v21  ;;  %v2863_v12 = vld [vmem:[%s3336_s26 + $0x310] sm:$0xf]  ;;  %v3183_v14 = vld [vmem:[%s3336_s26 + $0x314] sm:$0xf0] }
 0x121   : > { %2258 = vst.msk [vmem:[%s3470_s19 + $0x70] sm:$0xff] %vm2243_vm2, %v2129_v31  ;;  %v1247_v23 = vpop.f32.mrf.mxu0 }
 0x122   : > { %v1248_v25 = vadd.f32 %v3456_v60, %v1247_v23  ;;  %v1735_v27 = vadd.f32 %v3629_v49, %v1406_v32  ;;  %3034 = vmatmul.msk.bf16.gmra.mxu1 %vm1008_vm0, %v2612_v24  ;;  %v2864_v32 = vor.u32 %v3183_v14, %v2863_v12 }
 0x123   : > { %3067 = vmatmul.msk.bf16.gmra.mxu3 %vm1008_vm0, %v2876_v37 }
 0x124   : > { %v1577_v46 = vadd.f32 %v3660_v33, %v1248_v25  ;;  %vm1937_vm15 = vcmp.ge.f32.partialorder %v1735_v27, 0.0  ;;  %v2065_v34 = vmul.f32 0.2, %v1735_v27  ;;  %v2600_v33 = vor.u32 %v3117_v29, %v2599_v28  ;;  %v3122_v29 = vld [vmem:[%s3336_s26 + $0x134] sm:$0xf] }
 0x126   : > { %vm1874_vm1 = vcmp.ge.f32.partialorder %v1577_v46, 0.0  ;;  %v2002_v38 = vmul.f32 0.2, %v1577_v46  ;;  %v2193_v49 = vsel %vm1937_vm15, %v1735_v27, %v2065_v34  ;;  %v3731_v51 = vpop.f32.mrf.mxu3 }
 0x127   : > { %2322 = vst.msk [vmem:[%s3470_s19 + $0x270] sm:$0xff] %vm2243_vm2, %v2193_v49  ;;  %v1407_v42 = vpop.f32.mrf.mxu2  ;;  %v3728_v48 = vpop.f32.mrf.mxu1 }
 0x128   : > { %v2130_v40 = vsel %vm1874_vm1, %v1577_v46, %v2002_v38  ;;  %v1408_v61 = vadd.f32 %v3456_v60, %v1407_v42  ;;  %v2628_v38 = vor.u32 %v3122_v29, %v2625_v30  ;;  %v2615_v42 = vld [vmem:[%s3336_s26 + $0x120] sm:$0xf]  ;;  %v3187_v29 = vld [vmem:[%s3336_s26 + $0x334] sm:$0xf0] }
 0x129   : > { %2259 = vst.msk [vmem:[%s3470_s19 + $0x78] sm:$0xff] %vm2243_vm2, %v2130_v40  ;;  %v1250_v45 = vpop.f32.mrf.mxu0 }
 0x12a   : > { %v1251_v47 = vadd.f32 %v3456_v60, %v1250_v45  ;;  %v1737_v50 = vadd.f32 %v3644_v2, %v1408_v61  ;;  %v3121_v45 = vld [vmem:[%s3336_s26 + $0x124] sm:$0xf0] }
 0x12c   : > { %v1580_v52 = vadd.f32 %v3674_v5, %v1251_v47  ;;  %1289 = vmatmul.bf16.gmra.mxu0 %v2600_v33  ;;  %vm1938_vm3 = vcmp.ge.f32.partialorder %v1737_v50, 0.0  ;;  %v2066_v15 = vmul.f32 0.2, %v1737_v50  ;;  %1449 = vmatmul.bf16.gmra.mxu2 %v2856_v4  ;;  %v3188_v4 = vld [vmem:[%s3336_s26 + $0x344] sm:$0xf] }
 0x12d   : > { %v2889_v47 = vld [vmem:[%s3336_s26 + $0x348] sm:$0xf0] }
 0x12e   : > { %vm1875_vm4 = vcmp.ge.f32.partialorder %v1580_v52, 0.0  ;;  %v2003_v43 = vmul.f32 0.2, %v1580_v52  ;;  %v2194_v57 = vsel %vm1938_vm3, %v1737_v50, %v2066_v15  ;;  %v3746_v56 = vpop.f32.mrf.mxu3  ;;  %v2892_v15 = vor.u32 %v3188_v4, %v2889_v47  ;;  %v2641_v47 = vld [vmem:[%s3336_s26 + $0x158] sm:$0xf0] }
 0x12f   : > { %2323 = vst.msk [vmem:[%s3470_s19 + $0x278] sm:$0xff] %vm2243_vm2, %v2194_v57  ;;  %v1410_v59 = vpop.f32.mrf.mxu2  ;;  %v3742_v20 = vpop.f32.mrf.mxu1 }
 0x130   : > { %v2131_v2 = vsel %vm1875_vm4, %v1580_v52, %v2003_v43  ;;  %v1411_v5 = vadd.f32 %v3456_v60, %v1410_v59  ;;  %v2871_v52 = vld [vmem:[%s3336_s26 + $0x320] sm:$0xf]  ;;  %v3185_v43 = vld [vmem:[%s3336_s26 + $0x324] sm:$0xf0] }
 0x131   : > { %2260 = vst.msk [vmem:[%s3470_s19 + $0x80] sm:$0xff] %vm2243_vm2, %v2131_v2  ;;  %v1252_v62 = vpop.f32.mrf.mxu0 }
 0x132   : > { %v1253_v0 = vadd.f32 %v3456_v60, %v1252_v62  ;;  %v1740_v1 = vadd.f32 %v3663_v35, %v1411_v5  ;;  %3035 = vmatmul.msk.bf16.gmra.mxu1 %vm1008_vm0, %v2620_v63  ;;  %v2872_v5 = vor.u32 %v3185_v43, %v2871_v52 }
 0x133   : > { %3068 = vmatmul.msk.bf16.gmra.mxu3 %vm1008_vm0, %v2884_v54 }
 0x134   : > { %v1582_v22 = vadd.f32 %v3694_v8, %v1253_v0  ;;  %vm1939_vm5 = vcmp.ge.f32.partialorder %v1740_v1, 0.0  ;;  %v2067_v9 = vmul.f32 0.2, %v1740_v1  ;;  %v2608_v8 = vor.u32 %v3119_v6, %v2607_v3  ;;  %v3124_v6 = vld [vmem:[%s3336_s26 + $0x144] sm:$0xf] }
 0x136   : > { %vm1876_vm6 = vcmp.ge.f32.partialorder %v1582_v22, 0.0  ;;  %v2004_v13 = vmul.f32 0.2, %v1582_v22  ;;  %v2195_v35 = vsel %vm1939_vm5, %v1740_v1, %v2067_v9  ;;  %v3765_v27 = vpop.f32.mrf.mxu3 }
 0x137   : > { %2324 = vst.msk [vmem:[%s3470_s19 + $0x280] sm:$0xff] %vm2243_vm2, %v2195_v35  ;;  %v1412_v18 = vpop.f32.mrf.mxu2  ;;  %v3762_v24 = vpop.f32.mrf.mxu1 }
 0x138   : > { %v2132_v16 = vsel %vm1876_vm6, %v1582_v22, %v2004_v13  ;;  %v1413_v31 = vadd.f32 %v3456_v60, %v1412_v18  ;;  %v2636_v13 = vor.u32 %v3124_v6, %v2633_v7  ;;  %v2623_v18 = vld [vmem:[%s3336_s26 + $0x130] sm:$0xf] }
 0x139   : > { %2261 = vst.msk [vmem:[%s3470_s19 + $0x88] sm:$0xff] %vm2243_vm2, %v2132_v16  ;;  %v1255_v21 = vpop.f32.mrf.mxu0 }
 0x13a   : > { %v1256_v23 = vadd.f32 %v3456_v60, %v1255_v21  ;;  %v1742_v25 = vadd.f32 %v3678_v41, %v1413_v31  ;;  %v3123_v21 = vld [vmem:[%s3336_s26 + $0x134] sm:$0xf0] }
 0x13c   : > { %v1585_v28 = vadd.f32 %v3708_v44, %v1256_v23  ;;  %1294 = vmatmul.bf16.gmra.mxu0 %v2608_v8  ;;  %vm1940_vm7 = vcmp.ge.f32.partialorder %v1742_v25, 0.0  ;;  %v2068_v46 = vmul.f32 0.2, %v1742_v25  ;;  %1454 = vmatmul.bf16.gmra.mxu2 %v2864_v32  ;;  %v3190_v32 = vld [vmem:[%s3336_s26 + $0x354] sm:$0xf] }
 0x13d   : > { %v2897_v23 = vld [vmem:[%s3336_s26 + $0x358] sm:$0xf0] }
 0x13e   : > { %vm1877_vm8 = vcmp.ge.f32.partialorder %v1585_v28, 0.0  ;;  %v2005_v19 = vmul.f32 0.2, %v1585_v28  ;;  %v2196_v34 = vsel %vm1940_vm7, %v1742_v25, %v2068_v46  ;;  %v3780_v33 = vpop.f32.mrf.mxu3 }
 0x13f   : > { %2325 = vst.msk [vmem:[%s3470_s19 + $0x288] sm:$0xff] %vm2243_vm2, %v2196_v34  ;;  %v1415_v36 = vpop.f32.mrf.mxu2  ;;  %v3776_v49 = vpop.f32.mrf.mxu1  ;;  %v2624_v34 = vor.u32 %v3123_v21, %v2623_v18  ;;  %v3128_v21 = vld [vmem:[%s3336_s26 + $0x164] sm:$0xf] }
 0x140   : > { %v2133_v41 = vsel %vm1877_vm8, %v1585_v28, %v2005_v19  ;;  %v1416_v44 = vadd.f32 %v3456_v60, %v1415_v36  ;;  %v2900_v28 = vor.u32 %v3190_v32, %v2897_v23  ;;  %v2649_v23 = vld [vmem:[%s3336_s26 + $0x168] sm:$0xf0] }
 0x141   : > { %2262 = vst.msk [vmem:[%s3470_s19 + $0x90] sm:$0xff] %vm2243_vm2, %v2133_v41  ;;  %v1257_v37 = vpop.f32.mrf.mxu0 }
 0x142   : > { %v1258_v39 = vadd.f32 %v3456_v60, %v1257_v37  ;;  %v1745_v40 = vadd.f32 %v3697_v11, %v1416_v44  ;;  %3036 = vmatmul.msk.bf16.gmra.mxu1 %vm1008_vm0, %v2628_v38 }
 0x143   : > { %3069 = vmatmul.msk.bf16.gmra.mxu3 %vm1008_vm0, %v2892_v15 }
 0x144   : > { %v1587_v61 = vadd.f32 %v3728_v48, %v1258_v39  ;;  %vm1941_vm9 = vcmp.ge.f32.partialorder %v1745_v40, 0.0  ;;  %v2069_v50 = vmul.f32 0.2, %v1745_v40  ;;  %v2616_v48 = vor.u32 %v3121_v45, %v2615_v42  ;;  %v3126_v45 = vld [vmem:[%s3336_s26 + $0x154] sm:$0xf] }
 0x146   : > { %vm1878_vm10 = vcmp.ge.f32.partialorder %v1587_v61, 0.0  ;;  %v2006_v53 = vmul.f32 0.2, %v1587_v61  ;;  %v2197_v11 = vsel %vm1941_vm9, %v1745_v40, %v2069_v50  ;;  %v3799_v1 = vpop.f32.mrf.mxu3 }
 0x147   : > { %2326 = vst.msk [vmem:[%s3470_s19 + $0x290] sm:$0xff] %vm2243_vm2, %v2197_v11  ;;  %v1417_v57 = vpop.f32.mrf.mxu2  ;;  %v3796_v63 = vpop.f32.mrf.mxu1 }
 0x148   : > { %v2134_v55 = vsel %vm1878_vm10, %v1587_v61, %v2006_v53  ;;  %v1418_v2 = vadd.f32 %v3456_v60, %v1417_v57  ;;  %v2644_v53 = vor.u32 %v3126_v45, %v2641_v47  ;;  %v2631_v57 = vld [vmem:[%s3336_s26 + $0x140] sm:$0xf] }
 0x149   : > { %2263 = vst.msk [vmem:[%s3470_s19 + $0x98] sm:$0xff] %vm2243_vm2, %v2134_v55  ;;  %v1260_v59 = vpop.f32.mrf.mxu0 }
 0x14a   : > { %v1261_v62 = vadd.f32 %v3456_v60, %v1260_v59  ;;  %v1747_v0 = vadd.f32 %v3712_v17, %v1418_v2  ;;  %v3125_v59 = vld [vmem:[%s3336_s26 + $0x144] sm:$0xf0] }
 0x14c   : > { %v1590_v3 = vadd.f32 %v3742_v20, %v1261_v62  ;;  %1299 = vmatmul.bf16.gmra.mxu0 %v2616_v48  ;;  %vm1942_vm11 = vcmp.ge.f32.partialorder %v1747_v0, 0.0  ;;  %v2070_v22 = vmul.f32 0.2, %v1747_v0  ;;  %1459 = vmatmul.bf16.gmra.mxu2 %v2872_v5  ;;  %v3192_v5 = vld [vmem:[%s3336_s26 + $0x364] sm:$0xf] }
 0x14d   : > { %v2905_v62 = vld [vmem:[%s3336_s26 + $0x368] sm:$0xf0] }
 0x14e   : > { %vm1879_vm12 = vcmp.ge.f32.partialorder %v1590_v3, 0.0  ;;  %v2007_v58 = vmul.f32 0.2, %v1590_v3  ;;  %v2198_v9 = vsel %vm1942_vm11, %v1747_v0, %v2070_v22  ;;  %v3814_v8 = vpop.f32.mrf.mxu3  ;;  %v2908_v22 = vor.u32 %v3192_v5, %v2905_v62  ;;  %v2657_v62 = vld [vmem:[%s3336_s26 + $0x178] sm:$0xf0] }
 0x14f   : > { %2327 = vst.msk [vmem:[%s3470_s19 + $0x298] sm:$0xff] %vm2243_vm2, %v2198_v9  ;;  %v1420_v12 = vpop.f32.mrf.mxu2  ;;  %v3810_v35 = vpop.f32.mrf.mxu1 }
 0x150   : > { %v2135_v17 = vsel %vm1879_vm12, %v1590_v3, %v2007_v58  ;;  %v1421_v20 = vadd.f32 %v3456_v60, %v1420_v12  ;;  %v2887_v3 = vld [vmem:[%s3336_s26 + $0x340] sm:$0xf]  ;;  %v3189_v58 = vld [vmem:[%s3336_s26 + $0x344] sm:$0xf0] }
 0x151   : > { %2264 = vst.msk [vmem:[%s3470_s19 + $0xa0] sm:$0xff] %vm2243_vm2, %v2135_v17  ;;  %v1262_v54 = vpop.f32.mrf.mxu0 }
 0x152   : > { %v1263_v14 = vadd.f32 %v3456_v60, %v1262_v54  ;;  %v1750_v16 = vadd.f32 %v3731_v51, %v1421_v20  ;;  %3037 = vmatmul.msk.bf16.gmra.mxu1 %vm1008_vm0, %v2636_v13  ;;  %v2879_v60 = vld [vmem:[%s3336_s26 + $0x330] sm:$0xf]  ;;  %v2888_v20 = vor.u32 %v3189_v58, %v2887_v3 }
 0x153   : > { %3070 = vmatmul.msk.bf16.gmra.mxu3 %vm1008_vm0, %v2900_v28  ;;  %v2880_v44 = vor.u32 %v3187_v29, %v2879_v60 }
 0x154   : > { %v1592_v31 = vadd.f32 %v3762_v24, %v1263_v14  ;;  %vm1943_vm13 = vcmp.ge.f32.partialorder %v1750_v16, 0.0  ;;  %v2071_v25 = vmul.f32 0.2, %v1750_v16  ;;  %v3831_v24 = vld [vmem:[%s4372_s2] ss:$0 sm:$0xff] }
 0x156   : > { %vm1880_vm14 = vcmp.ge.f32.partialorder %v1592_v31, 0.0  ;;  %v2008_v46 = vmul.f32 0.2, %v1592_v31  ;;  %v2199_v51 = vsel %vm1943_vm13, %v1750_v16, %v2071_v25  ;;  %v3838_v40 = vpop.f32.mrf.mxu3 }
 0x157   : > { %2328 = vst.msk [vmem:[%s3470_s19 + $0x2a0] sm:$0xff] %vm2243_vm2, %v2199_v51  ;;  %v1422_v30 = vpop.f32.mrf.mxu2  ;;  %v3835_v38 = vpop.f32.mrf.mxu1 }
 0x158   : > { %v2136_v19 = vsel %vm1880_vm14, %v1592_v31, %v2008_v46  ;;  %v1423_v41 = vadd.f32 %v3831_v24, %v1422_v30  ;;  %v2652_v46 = vor.u32 %v3128_v21, %v2649_v23  ;;  %v2639_v30 = vld [vmem:[%s3336_s26 + $0x150] sm:$0xf] }
 0x159   : > { %2265 = vst.msk [vmem:[%s3470_s19 + $0xa8] sm:$0xff] %vm2243_vm2, %v2136_v19  ;;  %v1265_v36 = vpop.f32.mrf.mxu0 }
 0x15a   : > { %v1266_v37 = vadd.f32 %v3831_v24, %v1265_v36  ;;  %v1752_v39 = vadd.f32 %v3746_v56, %v1423_v41  ;;  %v3127_v36 = vld [vmem:[%s3336_s26 + $0x154] sm:$0xf0] }
 0x15c   : > { %v1595_v42 = vadd.f32 %v3776_v49, %v1266_v37  ;;  %1304 = vmatmul.bf16.gmra.mxu0 %v2624_v34  ;;  %vm1944_vm15 = vcmp.ge.f32.partialorder %v1752_v39, 0.0  ;;  %v2072_v61 = vmul.f32 0.2, %v1752_v39  ;;  %1464 = vmatmul.bf16.gmra.mxu2 %v2880_v44  ;;  %v3194_v44 = vld [vmem:[%s3336_s26 + $0x374] sm:$0xf] }
 0x15d   : > { %v2913_v37 = vld [vmem:[%s3336_s26 + $0x378] sm:$0xf0] }
 0x15e   : > { %vm1881_vm1 = vcmp.ge.f32.partialorder %v1595_v42, 0.0  ;;  %v2009_v4 = vmul.f32 0.2, %v1595_v42  ;;  %v2200_v50 = vsel %vm1944_vm15, %v1752_v39, %v2072_v61  ;;  %v3853_v48 = vpop.f32.mrf.mxu3  ;;  %v2916_v61 = vor.u32 %v3194_v44, %v2913_v37  ;;  %v2665_v37 = vld [vmem:[%s3336_s26 + $0x188] sm:$0xf0] }
 0x15f   : > { %2329 = vst.msk [vmem:[%s3470_s19 + $0x2a8] sm:$0xff] %vm2243_vm2, %v2200_v50  ;;  %v1425_v52 = vpop.f32.mrf.mxu2  ;;  %v3849_v11 = vpop.f32.mrf.mxu1 }
 0x160   : > { %v2137_v56 = vsel %vm1881_vm1, %v1595_v42, %v2009_v4  ;;  %v1426_v49 = vadd.f32 %v3831_v24, %v1425_v52  ;;  %v2895_v42 = vld [vmem:[%s3336_s26 + $0x350] sm:$0xf]  ;;  %v3191_v4 = vld [vmem:[%s3336_s26 + $0x354] sm:$0xf0] }
 0x161   : > { %2266 = vst.msk [vmem:[%s3470_s19 + $0xb0] sm:$0xff] %vm2243_vm2, %v2137_v56  ;;  %v1267_v15 = vpop.f32.mrf.mxu0 }
 0x162   : > { %v1268_v43 = vadd.f32 %v3831_v24, %v1267_v15  ;;  %v1755_v55 = vadd.f32 %v3765_v27, %v1426_v49  ;;  %3038 = vmatmul.msk.bf16.gmra.mxu1 %vm1008_vm0, %v2644_v53  ;;  %v2896_v49 = vor.u32 %v3191_v4, %v2895_v42 }
 0x163   : > { %3071 = vmatmul.msk.bf16.gmra.mxu3 %vm1008_vm0, %v2908_v22 }
 0x164   : > { %v1597_v2 = vadd.f32 %v3796_v63, %v1268_v43  ;;  %vm1945_vm3 = vcmp.ge.f32.partialorder %v1755_v55, 0.0  ;;  %v2073_v0 = vmul.f32 0.2, %v1755_v55  ;;  %v2632_v63 = vor.u32 %v3125_v59, %v2631_v57  ;;  %v3130_v59 = vld [vmem:[%s3336_s26 + $0x174] sm:$0xf] }
 0x166   : > { %vm1882_vm4 = vcmp.ge.f32.partialorder %v1597_v2, 0.0  ;;  %v2010_v6 = vmul.f32 0.2, %v1597_v2  ;;  %v2201_v27 = vsel %vm1945_vm3, %v1755_v55, %v2073_v0  ;;  %v3872_v16 = vpop.f32.mrf.mxu3 }
 0x167   : > { %2330 = vst.msk [vmem:[%s3470_s19 + $0x2b0] sm:$0xff] %vm2243_vm2, %v2201_v27  ;;  %v1427_v9 = vpop.f32.mrf.mxu2  ;;  %v3869_v13 = vpop.f32.mrf.mxu1 }
 0x168   : > { %v2138_v7 = vsel %vm1882_vm4, %v1597_v2, %v2010_v6  ;;  %v1428_v17 = vadd.f32 %v3831_v24, %v1427_v9  ;;  %v2660_v6 = vor.u32 %v3130_v59, %v2657_v62  ;;  %v2647_v9 = vld [vmem:[%s3336_s26 + $0x160] sm:$0xf] }
 0x169   : > { %2267 = vst.msk [vmem:[%s3470_s19 + $0xb8] sm:$0xff] %vm2243_vm2, %v2138_v7  ;;  %v1270_v12 = vpop.f32.mrf.mxu0 }
 0x16a   : > { %v1271_v54 = vadd.f32 %v3831_v24, %v1270_v12  ;;  %v1757_v14 = vadd.f32 %v3780_v33, %v1428_v17  ;;  %v3129_v12 = vld [vmem:[%s3336_s26 + $0x164] sm:$0xf0] }
 0x16c   : > { %v1600_v18 = vadd.f32 %v3810_v35, %v1271_v54  ;;  %1309 = vmatmul.bf16.gmra.mxu0 %v2632_v63  ;;  %vm1946_vm5 = vcmp.ge.f32.partialorder %v1757_v14, 0.0  ;;  %v2074_v31 = vmul.f32 0.2, %v1757_v14  ;;  %1469 = vmatmul.bf16.gmra.mxu2 %v2888_v20  ;;  %v3196_v20 = vld [vmem:[%s3336_s26 + $0x384] sm:$0xf] }
 0x16d   : > { %v2921_v54 = vld [vmem:[%s3336_s26 + $0x388] sm:$0xf0] }
 0x16e   : > { %vm1883_vm6 = vcmp.ge.f32.partialorder %v1600_v18, 0.0  ;;  %v2011_v32 = vmul.f32 0.2, %v1600_v18  ;;  %v2202_v25 = vsel %vm1946_vm5, %v1757_v14, %v2074_v31  ;;  %v3887_v34 = vpop.f32.mrf.mxu3  ;;  %v2924_v31 = vor.u32 %v3196_v20, %v2921_v54  ;;  %v2673_v54 = vld [vmem:[%s3336_s26 + $0x198] sm:$0xf0] }
 0x16f   : > { %2331 = vst.msk [vmem:[%s3470_s19 + $0x2b8] sm:$0xff] %vm2243_vm2, %v2202_v25  ;;  %v1430_v60 = vpop.f32.mrf.mxu2  ;;  %v3883_v51 = vpop.f32.mrf.mxu1 }
 0x170   : > { %v2139_v33 = vsel %vm1883_vm6, %v1600_v18, %v2011_v32  ;;  %v1431_v35 = vadd.f32 %v3831_v24, %v1430_v60  ;;  %v2903_v18 = vld [vmem:[%s3336_s26 + $0x360] sm:$0xf]  ;;  %v3193_v32 = vld [vmem:[%s3336_s26 + $0x364] sm:$0xf0] }
 0x171   : > { %2268 = vst.msk [vmem:[%s3470_s19 + $0xc0] sm:$0xff] %vm2243_vm2, %v2139_v33  ;;  %v1272_v28 = vpop.f32.mrf.mxu0 }
 0x172   : > { %v1273_v29 = vadd.f32 %v3831_v24, %v1272_v28  ;;  %v1760_v19 = vadd.f32 %v3799_v1, %v1431_v35  ;;  %3039 = vmatmul.msk.bf16.gmra.mxu1 %vm1008_vm0, %v2652_v46  ;;  %v2904_v35 = vor.u32 %v3193_v32, %v2903_v18 }
 0x173   : > { %3072 = vmatmul.msk.bf16.gmra.mxu3 %vm1008_vm0, %v2916_v61 }
 0x174   : > { %v1602_v41 = vadd.f32 %v3835_v38, %v1273_v29  ;;  %vm1947_vm7 = vcmp.ge.f32.partialorder %v1760_v19, 0.0  ;;  %v2075_v39 = vmul.f32 0.2, %v1760_v19  ;;  %v2640_v38 = vor.u32 %v3127_v36, %v2639_v30  ;;  %v3132_v36 = vld [vmem:[%s3336_s26 + $0x184] sm:$0xf] }
 0x176   : > { %vm1884_vm8 = vcmp.ge.f32.partialorder %v1602_v41, 0.0  ;;  %v2012_v45 = vmul.f32 0.2, %v1602_v41  ;;  %v2203_v1 = vsel %vm1947_vm7, %v1760_v19, %v2075_v39  ;;  %v3906_v55 = vpop.f32.mrf.mxu3 }
 0x177   : > { %2332 = vst.msk [vmem:[%s3470_s19 + $0x2c0] sm:$0xff] %vm2243_vm2, %v2203_v1  ;;  %v1432_v50 = vpop.f32.mrf.mxu2  ;;  %v3903_v53 = vpop.f32.mrf.mxu1 }
 0x178   : > { %v2140_v47 = vsel %vm1884_vm8, %v1602_v41, %v2012_v45  ;;  %v1433_v56 = vadd.f32 %v3831_v24, %v1432_v50  ;;  %v2668_v45 = vor.u32 %v3132_v36, %v2665_v37  ;;  %v2655_v50 = vld [vmem:[%s3336_s26 + $0x170] sm:$0xf] }
 0x179   : > { %2269 = vst.msk [vmem:[%s3470_s19 + $0xc8] sm:$0xff] %vm2243_vm2, %v2140_v47  ;;  %v1275_v52 = vpop.f32.mrf.mxu0 }
 0x17a   : > { %v1276_v15 = vadd.f32 %v3831_v24, %v1275_v52  ;;  %v1762_v43 = vadd.f32 %v3814_v8, %v1433_v56  ;;  %v3131_v52 = vld [vmem:[%s3336_s26 + $0x174] sm:$0xf0] }
 0x17c   : > { %v1605_v57 = vadd.f32 %v3849_v11, %v1276_v15  ;;  %1314 = vmatmul.bf16.gmra.mxu0 %v2640_v38  ;;  %vm1948_vm9 = vcmp.ge.f32.partialorder %v1762_v43, 0.0  ;;  %v2076_v2 = vmul.f32 0.2, %v1762_v43  ;;  %1474 = vmatmul.bf16.gmra.mxu2 %v2896_v49  ;;  %v3198_v49 = vld [vmem:[%s3336_s26 + $0x394] sm:$0xf] }
 0x17d   : > { %v2929_v15 = vld [vmem:[%s3336_s26 + $0x398] sm:$0xf0] }
 0x17e   : > { %vm1885_vm10 = vcmp.ge.f32.partialorder %v1605_v57, 0.0  ;;  %v2013_v5 = vmul.f32 0.2, %v1605_v57  ;;  %v2204_v0 = vsel %vm1948_vm9, %v1762_v43, %v2076_v2  ;;  %v3921_v63 = vpop.f32.mrf.mxu3  ;;  %v2932_v2 = vor.u32 %v3198_v49, %v2929_v15  ;;  %v2681_v15 = vld [vmem:[%s3336_s26 + $0x1a8] sm:$0xf0] }
 0x17f   : > { %2333 = vst.msk [vmem:[%s3470_s19 + $0x2c8] sm:$0xff] %vm2243_vm2, %v2204_v0  ;;  %v1435_v3 = vpop.f32.mrf.mxu2  ;;  %v3917_v27 = vpop.f32.mrf.mxu1 }
 0x180   : > { %v2141_v8 = vsel %vm1885_vm10, %v1605_v57, %v2013_v5  ;;  %v1436_v11 = vadd.f32 %v3831_v24, %v1435_v3  ;;  %v2911_v57 = vld [vmem:[%s3336_s26 + $0x370] sm:$0xf]  ;;  %v3195_v5 = vld [vmem:[%s3336_s26 + $0x374] sm:$0xf0] }
 0x181   : > { %2270 = vst.msk [vmem:[%s3470_s19 + $0xd0] sm:$0xff] %vm2243_vm2, %v2141_v8  ;;  %v1277_v22 = vpop.f32.mrf.mxu0 }
 0x182   : > { %v1278_v58 = vadd.f32 %v3831_v24, %v1277_v22  ;;  %v1765_v7 = vadd.f32 %v3838_v40, %v1436_v11  ;;  %3040 = vmatmul.msk.bf16.gmra.mxu1 %vm1008_vm0, %v2660_v6  ;;  %v2912_v11 = vor.u32 %v3195_v5, %v2911_v57 }
 0x183   : > { %3073 = vmatmul.msk.bf16.gmra.mxu3 %vm1008_vm0, %v2924_v31 }
 0x184   : > { %v1607_v17 = vadd.f32 %v3869_v13, %v1278_v58  ;;  %vm1949_vm11 = vcmp.ge.f32.partialorder %v1765_v7, 0.0  ;;  %v2077_v14 = vmul.f32 0.2, %v1765_v7  ;;  %v2648_v13 = vor.u32 %v3129_v12, %v2647_v9  ;;  %v3134_v12 = vld [vmem:[%s3336_s26 + $0x194] sm:$0xf] }
 0x186   : > { %vm1886_vm12 = vcmp.ge.f32.partialorder %v1607_v17, 0.0  ;;  %v2014_v21 = vmul.f32 0.2, %v1607_v17  ;;  %v2205_v40 = vsel %vm1949_vm11, %v1765_v7, %v2077_v14  ;;  %v3940_v19 = vpop.f32.mrf.mxu3 }
 0x187   : > { %2334 = vst.msk [vmem:[%s3470_s19 + $0x2d0] sm:$0xff] %vm2243_vm2, %v2205_v40  ;;  %v1437_v25 = vpop.f32.mrf.mxu2  ;;  %v3937_v46 = vpop.f32.mrf.mxu1 }
 0x188   : > { %v2142_v23 = vsel %vm1886_vm12, %v1607_v17, %v2014_v21  ;;  %v1438_v33 = vadd.f32 %v3831_v24, %v1437_v25  ;;  %v2676_v21 = vor.u32 %v3134_v12, %v2673_v54  ;;  %v2663_v25 = vld [vmem:[%s3336_s26 + $0x180] sm:$0xf] }
 0x189   : > { %2271 = vst.msk [vmem:[%s3470_s19 + $0xd8] sm:$0xff] %vm2243_vm2, %v2142_v23  ;;  %v1280_v60 = vpop.f32.mrf.mxu0 }
 0x18a   : > { %v1281_v28 = vadd.f32 %v3831_v24, %v1280_v60  ;;  %v1767_v29 = vadd.f32 %v3853_v48, %v1438_v33  ;;  %v3133_v60 = vld [vmem:[%s3336_s26 + $0x184] sm:$0xf0] }
 0x18c   : > { %v1610_v30 = vadd.f32 %v3883_v51, %v1281_v28  ;;  %1319 = vmatmul.bf16.gmra.mxu0 %v2648_v13  ;;  %vm1950_vm13 = vcmp.ge.f32.partialorder %v1767_v29, 0.0  ;;  %v2078_v41 = vmul.f32 0.2, %v1767_v29  ;;  %1479 = vmatmul.bf16.gmra.mxu2 %v2904_v35  ;;  %v3200_v35 = vld [vmem:[%s3336_s26 + $0x3a4] sm:$0xf] }
 0x18d   : > { %v2937_v28 = vld [vmem:[%s3336_s26 + $0x3a8] sm:$0xf0] }
 0x18e   : > { %vm1887_vm14 = vcmp.ge.f32.partialorder %v1610_v30, 0.0  ;;  %v2015_v44 = vmul.f32 0.2, %v1610_v30  ;;  %v2206_v39 = vsel %vm1950_vm13, %v1767_v29, %v2078_v41  ;;  %v3955_v38 = vpop.f32.mrf.mxu3  ;;  %v2940_v41 = vor.u32 %v3200_v35, %v2937_v28  ;;  %v2689_v28 = vld [vmem:[%s3336_s26 + $0x1b8] sm:$0xf0] }
 0x18f   : > { %2335 = vst.msk [vmem:[%s3470_s19 + $0x2d8] sm:$0xff] %vm2243_vm2, %v2206_v39  ;;  %v1440_v42 = vpop.f32.mrf.mxu2  ;;  %v3951_v1 = vpop.f32.mrf.mxu1 }
 0x190   : > { %v2143_v48 = vsel %vm1887_vm14, %v1610_v30, %v2015_v44  ;;  %v1441_v51 = vadd.f32 %v3831_v24, %v1440_v42  ;;  %v2919_v30 = vld [vmem:[%s3336_s26 + $0x380] sm:$0xf]  ;;  %v3197_v44 = vld [vmem:[%s3336_s26 + $0x384] sm:$0xf0] }
 0x191   : > { %2272 = vst.msk [vmem:[%s3470_s19 + $0xe0] sm:$0xff] %vm2243_vm2, %v2143_v48  ;;  %v1282_v61 = vpop.f32.mrf.mxu0 }
 0x192   : > { %v1283_v4 = vadd.f32 %v3831_v24, %v1282_v61  ;;  %v1770_v47 = vadd.f32 %v3872_v16, %v1441_v51  ;;  %3041 = vmatmul.msk.bf16.gmra.mxu1 %vm1008_vm0, %v2668_v45  ;;  %v2920_v51 = vor.u32 %v3197_v44, %v2919_v30 }
 0x193   : > { %3074 = vmatmul.msk.bf16.gmra.mxu3 %vm1008_vm0, %v2932_v2 }
 0x194   : > { %v1612_v56 = vadd.f32 %v3903_v53, %v1283_v4  ;;  %vm1951_vm15 = vcmp.ge.f32.partialorder %v1770_v47, 0.0  ;;  %v2079_v43 = vmul.f32 0.2, %v1770_v47  ;;  %v2656_v53 = vor.u32 %v3131_v52, %v2655_v50  ;;  %v3136_v52 = vld [vmem:[%s3336_s26 + $0x1a4] sm:$0xf] }
 0x196   : > { %vm1888_vm1 = vcmp.ge.f32.partialorder %v1612_v56, 0.0  ;;  %v2016_v59 = vmul.f32 0.2, %v1612_v56  ;;  %v2207_v16 = vsel %vm1951_vm15, %v1770_v47, %v2079_v43  ;;  %v3974_v7 = vpop.f32.mrf.mxu3 }
 0x197   : > { %2336 = vst.msk [vmem:[%s3470_s19 + $0x2e0] sm:$0xff] %vm2243_vm2, %v2207_v16  ;;  %v1442_v0 = vpop.f32.mrf.mxu2  ;;  %v3971_v6 = vpop.f32.mrf.mxu1 }
 0x198   : > { %v2144_v62 = vsel %vm1888_vm1, %v1612_v56, %v2016_v59  ;;  %v1443_v8 = vadd.f32 %v3831_v24, %v1442_v0  ;;  %v2684_v59 = vor.u32 %v3136_v52, %v2681_v15  ;;  %v2671_v0 = vld [vmem:[%s3336_s26 + $0x190] sm:$0xf] }
 0x199   : > { %2273 = vst.msk [vmem:[%s3470_s19 + $0xe8] sm:$0xff] %vm2243_vm2, %v2144_v62  ;;  %v1285_v3 = vpop.f32.mrf.mxu0 }
 0x19a   : > { %v1286_v22 = vadd.f32 %v3831_v24, %v1285_v3  ;;  %v1772_v58 = vadd.f32 %v3887_v34, %v1443_v8  ;;  %v3135_v3 = vld [vmem:[%s3336_s26 + $0x194] sm:$0xf0] }
 0x19c   : > { %v1615_v9 = vadd.f32 %v3917_v27, %v1286_v22  ;;  %1324 = vmatmul.bf16.gmra.mxu0 %v2656_v53  ;;  %vm1952_vm3 = vcmp.ge.f32.partialorder %v1772_v58, 0.0  ;;  %v2080_v17 = vmul.f32 0.2, %v1772_v58  ;;  %1484 = vmatmul.bf16.gmra.mxu2 %v2912_v11  ;;  %v3202_v11 = vld [vmem:[%s3336_s26 + $0x3b4] sm:$0xf] }
 0x19d   : > { %v2945_v22 = vld [vmem:[%s3336_s26 + $0x3b8] sm:$0xf0] }
 0x19e   : > { %vm1889_vm4 = vcmp.ge.f32.partialorder %v1615_v9, 0.0  ;;  %v2017_v20 = vmul.f32 0.2, %v1615_v9  ;;  %v2208_v14 = vsel %vm1952_vm3, %v1772_v58, %v2080_v17  ;;  %v3989_v13 = vpop.f32.mrf.mxu3  ;;  %v2948_v17 = vor.u32 %v3202_v11, %v2945_v22  ;;  %v2697_v22 = vld [vmem:[%s3336_s26 + $0x1c8] sm:$0xf0] }
 0x19f   : > { %2337 = vst.msk [vmem:[%s3470_s19 + $0x2e8] sm:$0xff] %vm2243_vm2, %v2208_v14  ;;  %v1445_v18 = vpop.f32.mrf.mxu2  ;;  %v3985_v40 = vpop.f32.mrf.mxu1 }
 0x1a0   : > { %v2145_v34 = vsel %vm1889_vm4, %v1615_v9, %v2017_v20  ;;  %v1446_v27 = vadd.f32 %v3831_v24, %v1445_v18  ;;  %v2927_v9 = vld [vmem:[%s3336_s26 + $0x390] sm:$0xf]  ;;  %v3199_v20 = vld [vmem:[%s3336_s26 + $0x394] sm:$0xf0] }
 0x1a1   : > { %2274 = vst.msk [vmem:[%s3470_s19 + $0xf0] sm:$0xff] %vm2243_vm2, %v2145_v34  ;;  %v1287_v31 = vpop.f32.mrf.mxu0 }
 0x1a2   : > { %v1288_v32 = vadd.f32 %v3831_v24, %v1287_v31  ;;  %v1775_v23 = vadd.f32 %v3906_v55, %v1446_v27  ;;  %3042 = vmatmul.msk.bf16.gmra.mxu1 %vm1008_vm0, %v2676_v21  ;;  %v2928_v27 = vor.u32 %v3199_v20, %v2927_v9 }
 0x1a3   : > { %3075 = vmatmul.msk.bf16.gmra.mxu3 %vm1008_vm0, %v2940_v41 }
 0x1a4   : > { %v1617_v33 = vadd.f32 %v3937_v46, %v1288_v32  ;;  %vm1953_vm5 = vcmp.ge.f32.partialorder %v1775_v23, 0.0  ;;  %v2081_v29 = vmul.f32 0.2, %v1775_v23  ;;  %v2664_v46 = vor.u32 %v3133_v60, %v2663_v25  ;;  %v3138_v60 = vld [vmem:[%s3336_s26 + $0x1b4] sm:$0xf] }
 0x1a6   : > { %vm1890_vm6 = vcmp.ge.f32.partialorder %v1617_v33, 0.0  ;;  %v2018_v36 = vmul.f32 0.2, %v1617_v33  ;;  %v2209_v55 = vsel %vm1953_vm5, %v1775_v23, %v2081_v29  ;;  %v4008_v47 = vpop.f32.mrf.mxu3 }
 0x1a7   : > { %2338 = vst.msk [vmem:[%s3470_s19 + $0x2f0] sm:$0xff] %vm2243_vm2, %v2209_v55  ;;  %v1447_v39 = vpop.f32.mrf.mxu2  ;;  %v4005_v45 = vpop.f32.mrf.mxu1 }
 0x1a8   : > { %v2146_v37 = vsel %vm1890_vm6, %v1617_v33, %v2018_v36  ;;  %v1448_v48 = vadd.f32 %v3831_v24, %v1447_v39  ;;  %v2692_v36 = vor.u32 %v3138_v60, %v2689_v28  ;;  %v2679_v39 = vld [vmem:[%s3336_s26 + $0x1a0] sm:$0xf] }
 0x1a9   : > { %2275 = vst.msk [vmem:[%s3470_s19 + $0xf8] sm:$0xff] %vm2243_vm2, %v2146_v37  ;;  %v1290_v42 = vpop.f32.mrf.mxu0 }
 0x1aa   : > { %v1291_v61 = vadd.f32 %v3831_v24, %v1290_v42  ;;  %v1777_v4 = vadd.f32 %v3921_v63, %v1448_v48  ;;  %v3137_v42 = vld [vmem:[%s3336_s26 + $0x1a4] sm:$0xf0] }
 0x1ac   : > { %v1620_v50 = vadd.f32 %v3951_v1, %v1291_v61  ;;  %1329 = vmatmul.bf16.gmra.mxu0 %v2664_v46  ;;  %vm1954_vm7 = vcmp.ge.f32.partialorder %v1777_v4, 0.0  ;;  %v2082_v56 = vmul.f32 0.2, %v1777_v4  ;;  %1489 = vmatmul.bf16.gmra.mxu2 %v2920_v51  ;;  %v3204_v51 = vld [vmem:[%s3336_s26 + $0x3c4] sm:$0xf] }
 0x1ad   : > { %v2953_v61 = vld [vmem:[%s3336_s26 + $0x3c8] sm:$0xf0] }
 0x1ae   : > { %vm1891_vm8 = vcmp.ge.f32.partialorder %v1620_v50, 0.0  ;;  %v2019_v49 = vmul.f32 0.2, %v1620_v50  ;;  %v2210_v43 = vsel %vm1954_vm7, %v1777_v4, %v2082_v56  ;;  %v4023_v53 = vpop.f32.mrf.mxu3  ;;  %v2956_v56 = vor.u32 %v3204_v51, %v2953_v61  ;;  %v2705_v61 = vld [vmem:[%s3336_s26 + $0x1d8] sm:$0xf0] }
 0x1af   : > { %2339 = vst.msk [vmem:[%s3470_s19 + $0x2f8] sm:$0xff] %vm2243_vm2, %v2210_v43  ;;  %v1450_v57 = vpop.f32.mrf.mxu2  ;;  %v4019_v16 = vpop.f32.mrf.mxu1 }
 0x1b0   : > { %v2147_v63 = vsel %vm1891_vm8, %v1620_v50, %v2019_v49  ;;  %v1451_v1 = vadd.f32 %v3831_v24, %v1450_v57  ;;  %v2935_v50 = vld [vmem:[%s3336_s26 + $0x3a0] sm:$0xf]  ;;  %v3201_v49 = vld [vmem:[%s3336_s26 + $0x3a4] sm:$0xf0] }
 0x1b1   : > { %2276 = vst.msk [vmem:[%s3470_s19 + $0x100] sm:$0xff] %vm2243_vm2, %v2147_v63  ;;  %v1292_v2 = vpop.f32.mrf.mxu0 }
 0x1b2   : > { %v1293_v5 = vadd.f32 %v3831_v24, %v1292_v2  ;;  %v1780_v62 = vadd.f32 %v3940_v19, %v1451_v1  ;;  %3043 = vmatmul.msk.bf16.gmra.mxu1 %vm1008_vm0, %v2684_v59  ;;  %v2936_v1 = vor.u32 %v3201_v49, %v2935_v50 }
 0x1b3   : > { %3076 = vmatmul.msk.bf16.gmra.mxu3 %vm1008_vm0, %v2948_v17 }
 0x1b4   : > { %v1622_v8 = vadd.f32 %v3971_v6, %v1293_v5  ;;  %vm1955_vm9 = vcmp.ge.f32.partialorder %v1780_v62, 0.0  ;;  %v2083_v58 = vmul.f32 0.2, %v1780_v62  ;;  %v2672_v6 = vor.u32 %v3135_v3, %v2671_v0  ;;  %v3140_v3 = vld [vmem:[%s3336_s26 + $0x1c4] sm:$0xf] }
 0x1b6   : > { %vm1892_vm10 = vcmp.ge.f32.partialorder %v1622_v8, 0.0  ;;  %v2020_v12 = vmul.f32 0.2, %v1622_v8  ;;  %v2211_v19 = vsel %vm1955_vm9, %v1780_v62, %v2083_v58  ;;  %v4042_v23 = vpop.f32.mrf.mxu3 }
 0x1b7   : > { %2340 = vst.msk [vmem:[%s3470_s19 + $0x300] sm:$0xff] %vm2243_vm2, %v2211_v19  ;;  %v1452_v14 = vpop.f32.mrf.mxu2  ;;  %v4039_v21 = vpop.f32.mrf.mxu1 }
 0x1b8   : > { %v2148_v54 = vsel %vm1892_vm10, %v1622_v8, %v2020_v12  ;;  %v1453_v34 = vadd.f32 %v3831_v24, %v1452_v14  ;;  %v2700_v12 = vor.u32 %v3140_v3, %v2697_v22  ;;  %v2687_v14 = vld [vmem:[%s3336_s26 + $0x1b0] sm:$0xf] }
 0x1b9   : > { %2277 = vst.msk [vmem:[%s3470_s19 + $0x108] sm:$0xff] %vm2243_vm2, %v2148_v54  ;;  %v1295_v18 = vpop.f32.mrf.mxu0 }
 0x1ba   : > { %v1296_v31 = vadd.f32 %v3831_v24, %v1295_v18  ;;  %v1782_v32 = vadd.f32 %v3955_v38, %v1453_v34  ;;  %v3139_v18 = vld [vmem:[%s3336_s26 + $0x1b4] sm:$0xf0] }
 0x1bc   : > { %v1625_v25 = vadd.f32 %v3985_v40, %v1296_v31  ;;  %1334 = vmatmul.bf16.gmra.mxu0 %v2672_v6  ;;  %vm1956_vm11 = vcmp.ge.f32.partialorder %v1782_v32, 0.0  ;;  %v2084_v33 = vmul.f32 0.2, %v1782_v32  ;;  %1494 = vmatmul.bf16.gmra.mxu2 %v2928_v27  ;;  %v3206_v27 = vld [vmem:[%s3336_s26 + $0x3d4] sm:$0xf] }
 0x1bd   : > { %v2961_v31 = vld [vmem:[%s3336_s26 + $0x3d8] sm:$0xf0] }
 0x1be   : > { %vm1893_vm12 = vcmp.ge.f32.partialorder %v1625_v25, 0.0  ;;  %v2021_v35 = vmul.f32 0.2, %v1625_v25  ;;  %v2212_v29 = vsel %vm1956_vm11, %v1782_v32, %v2084_v33  ;;  %v4057_v46 = vpop.f32.mrf.mxu3  ;;  %v2964_v33 = vor.u32 %v3206_v27, %v2961_v31  ;;  %v2713_v31 = vld [vmem:[%s3336_s26 + $0x1e8] sm:$0xf0] }
 0x1bf   : > { %2341 = vst.msk [vmem:[%s3470_s19 + $0x308] sm:$0xff] %vm2243_vm2, %v2212_v29  ;;  %v1455_v30 = vpop.f32.mrf.mxu2  ;;  %v4053_v55 = vpop.f32.mrf.mxu1 }
 0x1c0   : > { %v2149_v38 = vsel %vm1893_vm12, %v1625_v25, %v2021_v35  ;;  %v1456_v40 = vadd.f32 %v3831_v24, %v1455_v30  ;;  %v2943_v25 = vld [vmem:[%s3336_s26 + $0x3b0] sm:$0xf]  ;;  %v3203_v35 = vld [vmem:[%s3336_s26 + $0x3b4] sm:$0xf0] }
 0x1c1   : > { %2278 = vst.msk [vmem:[%s3470_s19 + $0x110] sm:$0xff] %vm2243_vm2, %v2149_v38  ;;  %v1297_v41 = vpop.f32.mrf.mxu0 }
 0x1c2   : > { %v1298_v44 = vadd.f32 %v3831_v24, %v1297_v41  ;;  %v1785_v37 = vadd.f32 %v3974_v7, %v1456_v40  ;;  %3044 = vmatmul.msk.bf16.gmra.mxu1 %vm1008_vm0, %v2692_v36  ;;  %v2944_v40 = vor.u32 %v3203_v35, %v2943_v25 }
 0x1c3   : > { %3077 = vmatmul.msk.bf16.gmra.mxu3 %vm1008_vm0, %v2956_v56 }
 0x1c4   : > { %v1627_v48 = vadd.f32 %v4005_v45, %v1298_v44  ;;  %vm1957_vm13 = vcmp.ge.f32.partialorder %v1785_v37, 0.0  ;;  %v2085_v4 = vmul.f32 0.2, %v1785_v37  ;;  %v2680_v45 = vor.u32 %v3137_v42, %v2679_v39  ;;  %v3142_v42 = vld [vmem:[%s3336_s26 + $0x1d4] sm:$0xf] }
 0x1c6   : > { %vm1894_vm14 = vcmp.ge.f32.partialorder %v1627_v48, 0.0  ;;  %v2022_v52 = vmul.f32 0.2, %v1627_v48  ;;  %v2213_v7 = vsel %vm1957_vm13, %v1785_v37, %v2085_v4  ;;  %v4076_v62 = vpop.f32.mrf.mxu3 }
 0x1c7   : > { %2342 = vst.msk [vmem:[%s3470_s19 + $0x310] sm:$0xff] %vm2243_vm2, %v2213_v7  ;;  %v1457_v43 = vpop.f32.mrf.mxu2  ;;  %v4073_v59 = vpop.f32.mrf.mxu1 }
 0x1c8   : > { %v2150_v15 = vsel %vm1894_vm14, %v1627_v48, %v2022_v52  ;;  %v1458_v63 = vadd.f32 %v3831_v24, %v1457_v43  ;;  %v2708_v52 = vor.u32 %v3142_v42, %v2705_v61  ;;  %v2695_v43 = vld [vmem:[%s3336_s26 + $0x1c0] sm:$0xf]  ;;  %v3207_v42 = vld [vmem:[%s3336_s26 + $0x3d4] sm:$0xf0] }
 0x1c9   : > { %2279 = vst.msk [vmem:[%s3470_s19 + $0x118] sm:$0xff] %vm2243_vm2, %v2150_v15  ;;  %v1300_v57 = vpop.f32.mrf.mxu0 }
 0x1ca   : > { %v1301_v2 = vadd.f32 %v3831_v24, %v1300_v57  ;;  %v1787_v5 = vadd.f32 %v3989_v13, %v1458_v63  ;;  %v3141_v57 = vld [vmem:[%s3336_s26 + $0x1c4] sm:$0xf0] }
 0x1cc   : > { %v1630_v0 = vadd.f32 %v4019_v16, %v1301_v2  ;;  %1339 = vmatmul.bf16.gmra.mxu0 %v2680_v45  ;;  %vm1958_vm15 = vcmp.ge.f32.partialorder %v1787_v5, 0.0  ;;  %v2086_v8 = vmul.f32 0.2, %v1787_v5  ;;  %1499 = vmatmul.bf16.gmra.mxu2 %v2936_v1  ;;  %v3208_v1 = vld [vmem:[%s3336_s26 + $0x3e4] sm:$0xf] }
 0x1cd   : > { %v2969_v2 = vld [vmem:[%s3336_s26 + $0x3e8] sm:$0xf0] }
 0x1ce   : > { %vm1895_vm1 = vcmp.ge.f32.partialorder %v1630_v0, 0.0  ;;  %v2023_v11 = vmul.f32 0.2, %v1630_v0  ;;  %v2214_v58 = vsel %vm1958_vm15, %v1787_v5, %v2086_v8  ;;  %v4091_v6 = vpop.f32.mrf.mxu3  ;;  %v2972_v8 = vor.u32 %v3208_v1, %v2969_v2  ;;  %v2721_v1 = vld [vmem:[%s3336_s26 + $0x1f8] sm:$0xf0] }
 0x1cf   : > { %2343 = vst.msk [vmem:[%s3470_s19 + $0x318] sm:$0xff] %vm2243_vm2, %v2214_v58  ;;  %v1460_v9 = vpop.f32.mrf.mxu2  ;;  %v4087_v19 = vpop.f32.mrf.mxu1 }
 0x1d0   : > { %v2151_v13 = vsel %vm1895_vm1, %v1630_v0, %v2023_v11  ;;  %v1461_v16 = vadd.f32 %v3831_v24, %v1460_v9  ;;  %v2951_v0 = vld [vmem:[%s3336_s26 + $0x3c0] sm:$0xf]  ;;  %v3205_v11 = vld [vmem:[%s3336_s26 + $0x3c4] sm:$0xf0] }
 0x1d1   : > { %2280 = vst.msk [vmem:[%s3470_s19 + $0x120] sm:$0xff] %vm2243_vm2, %v2151_v13  ;;  %v1302_v17 = vpop.f32.mrf.mxu0 }
 0x1d2   : > { %v1303_v20 = vadd.f32 %v3831_v24, %v1302_v17  ;;  %v1790_v54 = vadd.f32 %v4008_v47, %v1461_v16  ;;  %3045 = vmatmul.msk.bf16.gmra.mxu1 %vm1008_vm0, %v2700_v12  ;;  %v2952_v16 = vor.u32 %v3205_v11, %v2951_v0 }
 0x1d3   : > { %3078 = vmatmul.msk.bf16.gmra.mxu3 %vm1008_vm0, %v2964_v33 }
 0x1d4   : > { %v1632_v34 = vadd.f32 %v4039_v21, %v1303_v20  ;;  %vm1959_vm3 = vcmp.ge.f32.partialorder %v1790_v54, 0.0  ;;  %v2087_v32 = vmul.f32 0.2, %v1790_v54  ;;  %v2688_v21 = vor.u32 %v3139_v18, %v2687_v14  ;;  %v3144_v18 = vld [vmem:[%s3336_s26 + $0x1e4] sm:$0xf] }
 0x1d6   : > { %vm1896_vm4 = vcmp.ge.f32.partialorder %v1632_v34, 0.0  ;;  %v2024_v60 = vmul.f32 0.2, %v1632_v34  ;;  %v2215_v47 = vsel %vm1959_vm3, %v1790_v54, %v2087_v32  ;;  %v4110_v37 = vpop.f32.mrf.mxu3 }
 0x1d7   : > { %2344 = vst.msk [vmem:[%s3470_s19 + $0x320] sm:$0xff] %vm2243_vm2, %v2215_v47  ;;  %v1462_v29 = vpop.f32.mrf.mxu2  ;;  %v4107_v36 = vpop.f32.mrf.mxu1 }
 0x1d8   : > { %v2152_v28 = vsel %vm1896_vm4, %v1632_v34, %v2024_v60  ;;  %v1463_v38 = vadd.f32 %v3831_v24, %v1462_v29  ;;  %v2716_v60 = vor.u32 %v3144_v18, %v2713_v31  ;;  %v2703_v29 = vld [vmem:[%s3336_s26 + $0x1d0] sm:$0xf] }
 0x1d9   : > { %2281 = vst.msk [vmem:[%s3470_s19 + $0x128] sm:$0xff] %vm2243_vm2, %v2152_v28  ;;  %v1305_v30 = vpop.f32.mrf.mxu0 }
 0x1da   : > { %v1306_v41 = vadd.f32 %v3831_v24, %v1305_v30  ;;  %v1792_v44 = vadd.f32 %v4023_v53, %v1463_v38  ;;  %v3143_v38 = vld [vmem:[%s3336_s26 + $0x1d4] sm:$0xf0]  ;;  %v3210_v30 = vld [vmem:[%s3336_s26 + $0x3f4] sm:$0xf] }
 0x1dc   : > { %v1635_v39 = vadd.f32 %v4053_v55, %v1306_v41  ;;  %1344 = vmatmul.bf16.gmra.mxu0 %v2688_v21  ;;  %vm1960_vm5 = vcmp.ge.f32.partialorder %v1792_v44, 0.0  ;;  %v2088_v48 = vmul.f32 0.2, %v1792_v44  ;;  %1504 = vmatmul.bf16.gmra.mxu2 %v2944_v40  ;;  %v2977_v40 = vld [vmem:[%s3336_s26 + $0x3f8] sm:$0xf0] }
 0x1de   : > { %vm1897_vm6 = vcmp.ge.f32.partialorder %v1635_v39, 0.0  ;;  %v2025_v51 = vmul.f32 0.2, %v1635_v39  ;;  %v2216_v4 = vsel %vm1960_vm5, %v1792_v44, %v2088_v48  ;;  %v4125_v45 = vpop.f32.mrf.mxu3  ;;  %v2959_v44 = vld [vmem:[%s3336_s26 + $0x3d0] sm:$0xf] }
 0x1df   : > { %2345 = vst.msk [vmem:[%s3470_s19 + $0x328] sm:$0xff] %vm2243_vm2, %v2216_v4  ;;  %v1465_v50 = vpop.f32.mrf.mxu2  ;;  %v4121_v7 = vpop.f32.mrf.mxu1  ;;  %v2704_v4 = vor.u32 %v3143_v38, %v2703_v29  ;;  %v2729_v29 = vld [vmem:[%s3336_s26 + $0x208] sm:$0xf0] }
 0x1e0   : > { %v2153_v53 = vsel %vm1897_vm6, %v1635_v39, %v2025_v51  ;;  %v1466_v55 = vadd.f32 %v3831_v24, %v1465_v50  ;;  %v2980_v39 = vor.u32 %v3210_v30, %v2977_v40 }
 0x1e1   : > { %2282 = vst.msk [vmem:[%s3470_s19 + $0x130] sm:$0xff] %vm2243_vm2, %v2153_v53  ;;  %v1307_v56 = vpop.f32.mrf.mxu0 }
 0x1e2   : > { %v1308_v49 = vadd.f32 %v3831_v24, %v1307_v56  ;;  %v1795_v15 = vadd.f32 %v4042_v23, %v1466_v55  ;;  %3046 = vmatmul.msk.bf16.gmra.mxu1 %vm1008_vm0, %v2708_v52  ;;  %v2960_v55 = vor.u32 %v3207_v42, %v2959_v44  ;;  %v2719_v42 = vld [vmem:[%s3336_s26 + $0x1f0] sm:$0xf] }
 0x1e3   : > { %3079 = vmatmul.msk.bf16.gmra.mxu3 %vm1008_vm0, %v2972_v8 }
 0x1e4   : > { %v1637_v63 = vadd.f32 %v4073_v59, %v1308_v49  ;;  %vm1961_vm7 = vcmp.ge.f32.partialorder %v1795_v15, 0.0  ;;  %v2089_v5 = vmul.f32 0.2, %v1795_v15  ;;  %v2696_v59 = vor.u32 %v3141_v57, %v2695_v43 }
 0x1e6   : > { %vm1898_vm8 = vcmp.ge.f32.partialorder %v1637_v63, 0.0  ;;  %v2026_v3 = vmul.f32 0.2, %v1637_v63  ;;  %v2217_v23 = vsel %vm1961_vm7, %v1795_v15, %v2089_v5  ;;  %v4145_v14 = vpop.f32.mrf.mxu3 }
 0x1e7   : > { %2346 = vst.msk [vmem:[%s3470_s19 + $0x330] sm:$0xff] %vm2243_vm2, %v2217_v23  ;;  %v1467_v58 = vpop.f32.mrf.mxu2  ;;  %v4141_v12 = vpop.f32.mrf.mxu1 }
 0x1e8   : > { %v2154_v22 = vsel %vm1898_vm8, %v1637_v63, %v2026_v3  ;;  %v1468_v13 = vadd.f32 %v3831_v24, %v1467_v58  ;;  %v3146_v63 = vld [vmem:[%s3336_s26 + $0x1f4] sm:$0xf] }
 0x1e9   : > { %2283 = vst.msk [vmem:[%s3470_s19 + $0x138] sm:$0xff] %vm2243_vm2, %v2154_v22  ;;  %v1310_v9 = vpop.f32.mrf.mxu0  ;;  %v2724_v3 = vor.u32 %v3146_v63, %v2721_v1 }
 0x1ea   : > { %v1311_v17 = vadd.f32 %v3831_v24, %v1310_v9  ;;  %v1797_v20 = vadd.f32 %v4057_v46, %v1468_v13  ;;  %v3145_v13 = vld [vmem:[%s3336_s26 + $0x1e4] sm:$0xf0] }
 0x1ec   : > { %v1640_v54 = vadd.f32 %v4087_v19, %v1311_v17  ;;  %1349 = vmatmul.bf16.gmra.mxu0 %v2696_v59  ;;  %vm1962_vm9 = vcmp.ge.f32.partialorder %v1797_v20, 0.0  ;;  %v2090_v34 = vmul.f32 0.2, %v1797_v20  ;;  %1509 = vmatmul.bf16.gmra.mxu2 %v2952_v16  ;;  %v2711_v59 = vld [vmem:[%s3336_s26 + $0x1e0] sm:$0xf] }
 0x1ed   : > { %v2967_v16 = vld [vmem:[%s3336_s26 + $0x3e0] sm:$0xf] }
 0x1ee   : > { %vm1899_vm10 = vcmp.ge.f32.partialorder %v1640_v54, 0.0  ;;  %v2027_v27 = vmul.f32 0.2, %v1640_v54  ;;  %v2218_v32 = vsel %vm1962_vm9, %v1797_v20, %v2090_v34  ;;  %v4166_v51 = vpop.f32.mrf.mxu3  ;;  %v3209_v20 = vld [vmem:[%s3336_s26 + $0x3e4] sm:$0xf0] }
 0x1ef   : > { %2347 = vst.msk [vmem:[%s3470_s19 + $0x338] sm:$0xff] %vm2243_vm2, %v2218_v32  ;;  %v1470_v25 = vpop.f32.mrf.mxu2  ;;  %v4155_v47 = vpop.f32.mrf.mxu1  ;;  %v2968_v31 = vor.u32 %v3209_v20, %v2967_v16 }
 0x1f0   : > { %v2155_v46 = vsel %vm1899_vm10, %v1640_v54, %v2027_v27  ;;  %v1471_v19 = vadd.f32 %v3831_v24, %v1470_v25 }
 0x1f1   : > { %2284 = vst.msk [vmem:[%s3470_s19 + $0x140] sm:$0xff] %vm2243_vm2, %v2155_v46  ;;  %v1312_v33 = vpop.f32.mrf.mxu0 }
 0x1f2   : > { %v1313_v35 = vadd.f32 %v3831_v24, %v1312_v33  ;;  %v1800_v28 = vadd.f32 %v4076_v62, %v1471_v19  ;;  %3047 = vmatmul.msk.bf16.gmra.mxu1 %vm1008_vm0, %v2716_v60 }
 0x1f3   : > { %3080 = vmatmul.msk.bf16.gmra.mxu3 %vm1008_vm0, %v2980_v39 }
 0x1f4   : > { %v1642_v21 = vadd.f32 %v4107_v36, %v1313_v35  ;;  %vm1963_vm11 = vcmp.ge.f32.partialorder %v1800_v28, 0.0  ;;  %v2091_v41 = vmul.f32 0.2, %v1800_v28  ;;  %v3148_v35 = vld [vmem:[%s3336_s26 + $0x204] sm:$0xf] }
 0x1f5   : > { %v2732_v40 = vor.u32 %v3148_v35, %v2729_v29 }
 0x1f6   : > { %vm1900_vm12 = vcmp.ge.f32.partialorder %v1642_v21, 0.0  ;;  %v2028_v48 = vmul.f32 0.2, %v1642_v21  ;;  %v2219_v62 = vsel %vm1963_vm11, %v1800_v28, %v2091_v41  ;;  %v4183_v8 = vpop.f32.mrf.mxu3 }
 0x1f7   : > { %2348 = vst.msk [vmem:[%s3470_s19 + $0x340] sm:$0xff] %vm2243_vm2, %v2219_v62  ;;  %v1472_v36 = vpop.f32.mrf.mxu2  ;;  %v4175_v52 = vpop.f32.mrf.mxu1  ;;  %v3147_v62 = vld [vmem:[%s3336_s26 + $0x1f4] sm:$0xf0] }
 0x1f8   : > { %v2156_v61 = vsel %vm1900_vm12, %v1642_v21, %v2028_v48  ;;  %v1473_v53 = vadd.f32 %v3831_v24, %v1472_v36 }
 0x1f9   : > { %2285 = vst.msk [vmem:[%s3470_s19 + $0x148] sm:$0xff] %vm2243_vm2, %v2156_v61  ;;  %v1315_v50 = vpop.f32.mrf.mxu0 }
 0x1fa   : > { %v1316_v56 = vadd.f32 %v3831_v24, %v1315_v50  ;;  %v1802_v49 = vadd.f32 %v4091_v6, %v1473_v53  ;;  %v3211_v50 = vld [vmem:[%s3336_s26 + $0x3f4] sm:$0xf0] }
 0x1fc   : > { %v1645_v15 = vadd.f32 %v4121_v7, %v1316_v56  ;;  %1354 = vmatmul.bf16.gmra.mxu0 %v2704_v4  ;;  %vm1964_vm13 = vcmp.ge.f32.partialorder %v1802_v49, 0.0  ;;  %v2092_v43 = vmul.f32 0.2, %v1802_v49  ;;  %1514 = vmatmul.bf16.gmra.mxu2 %v2960_v55  ;;  %v2975_v4 = vld [vmem:[%s3336_s26 + $0x3f0] sm:$0xf] }
 0x1fe   : > { %vm1901_vm14 = vcmp.ge.f32.partialorder %v1645_v15, 0.0  ;;  %v2029_v57 = vmul.f32 0.2, %v1645_v15  ;;  %v2220_v2 = vsel %vm1964_vm13, %v1802_v49, %v2092_v43  ;;  %v4211_v25 = vpop.f32.mrf.mxu3  ;;  %v2720_v49 = vor.u32 %v3147_v62, %v2719_v42 }
 0x1ff   : > { %2349 = vst.msk [vmem:[%s3470_s19 + $0x348] sm:$0xff] %vm2243_vm2, %v2220_v2  ;;  %v1475_v0 = vpop.f32.mrf.mxu2  ;;  %v4189_v23 = vpop.f32.mrf.mxu1  ;;  %v2976_v43 = vor.u32 %v3211_v50, %v2975_v4 }
 0x200   : > { %v2157_v5 = vsel %vm1901_vm14, %v1645_v15, %v2029_v57  ;;  %v1476_v6 = vadd.f32 %v3831_v24, %v1475_v0 }
 0x201   : > { %2286 = vst.msk [vmem:[%s3470_s19 + $0x150] sm:$0xff] %vm2243_vm2, %v2157_v5  ;;  %v1317_v7 = vpop.f32.mrf.mxu0 }
 0x202   : > { %v1318_v11 = vadd.f32 %v3831_v24, %v1317_v7  ;;  %v1805_v22 = vadd.f32 %v4110_v37, %v1476_v6  ;;  %3048 = vmatmul.msk.bf16.gmra.mxu1 %vm1008_vm0, %v2724_v3  ;;  %v2712_v37 = vor.u32 %v3145_v13, %v2711_v59 }
 0x204   : > { %v1647_v58 = vadd.f32 %v4141_v12, %v1318_v11  ;;  %vm1965_vm15 = vcmp.ge.f32.partialorder %v1805_v22, 0.0  ;;  %v2093_v9 = vmul.f32 0.2, %v1805_v22  ;;  %v4205_v12 = vld [vmem:[%s4372_s2] ss:$0 sm:$0xff] }
 0x206   : > { %vm1902_vm1 = vcmp.ge.f32.partialorder %v1647_v58, 0.0  ;;  %v2030_v17 = vmul.f32 0.2, %v1647_v58  ;;  %v2221_v54 = vsel %vm1965_vm15, %v1805_v22, %v2093_v9  ;;  %v4227_v61 = vpop.f32.mrf.mxu3 }
 0x207   : > { %2350 = vst.msk [vmem:[%s3470_s19 + $0x350] sm:$0xff] %vm2243_vm2, %v2221_v54  ;;  %v1477_v34 = vpop.f32.mrf.mxu2  ;;  %v4209_v46 = vpop.f32.mrf.mxu1 }
 0x208   : > { %v2158_v24 = vsel %vm1902_vm1, %v1647_v58, %v2030_v17  ;;  %v1478_v18 = vadd.f32 %v4205_v12, %v1477_v34 }
 0x209   : > { %2287 = vst.msk [vmem:[%s3470_s19 + $0x158] sm:$0xff] %vm2243_vm2, %v2158_v24  ;;  %v1320_v27 = vpop.f32.mrf.mxu0 }
 0x20a   : > { %v1321_v32 = vadd.f32 %v4205_v12, %v1320_v27  ;;  %v1807_v19 = vadd.f32 %v4125_v45, %v1478_v18 }
 0x20c   : > { %v1650_v33 = vadd.f32 %v4155_v47, %v1321_v32  ;;  %1359 = vmatmul.bf16.gmra.mxu0 %v2712_v37  ;;  %vm1966_vm3 = vcmp.ge.f32.partialorder %v1807_v19, 0.0  ;;  %v2094_v60 = vmul.f32 0.2, %v1807_v19  ;;  %1519 = vmatmul.bf16.gmra.mxu2 %v2968_v31 }
 0x20e   : > { %vm1903_vm4 = vcmp.ge.f32.partialorder %v1650_v33, 0.0  ;;  %v2031_v28 = vmul.f32 0.2, %v1650_v33  ;;  %v2222_v21 = vsel %vm1966_vm3, %v1807_v19, %v2094_v60  ;;  %v1821_v6 = vpop.f32.mrf.mxu3 }
 0x20f   : > { %2351 = vst.msk [vmem:[%s3470_s19 + $0x358] sm:$0xff] %vm2243_vm2, %v2222_v21  ;;  %v1480_v30 = vpop.f32.mrf.mxu2  ;;  %v1659_v44 = vpop.f32.mrf.mxu1 }
 0x210   : > { %v2159_v38 = vsel %vm1903_vm4, %v1650_v33, %v2031_v28  ;;  %v1481_v45 = vadd.f32 %v4205_v12, %v1480_v30 }
 0x211   : > { %2288 = vst.msk [vmem:[%s3470_s19 + $0x160] sm:$0xff] %vm2243_vm2, %v2159_v38  ;;  %v1322_v47 = vpop.f32.mrf.mxu0 }
 0x212   : > { %v1323_v41 = vadd.f32 %v4205_v12, %v1322_v47  ;;  %v1810_v39 = vadd.f32 %v4145_v14, %v1481_v45  ;;  %3049 = vmatmul.msk.bf16.gmra.mxu1 %vm1008_vm0, %v2732_v40 }
 0x214   : > { %v1652_v48 = vadd.f32 %v4175_v52, %v1323_v41  ;;  %vm1967_vm5 = vcmp.ge.f32.partialorder %v1810_v39, 0.0  ;;  %v2095_v36 = vmul.f32 0.2, %v1810_v39 }
 0x216   : > { %vm1904_vm6 = vcmp.ge.f32.partialorder %v1652_v48, 0.0  ;;  %v2032_v53 = vmul.f32 0.2, %v1652_v48  ;;  %v2223_v55 = vsel %vm1967_vm5, %v1810_v39, %v2095_v36  ;;  %v1824_v24 = vpop.f32.mrf.mxu3 }
 0x217   : > { %2352 = vst.msk [vmem:[%s3470_s19 + $0x360] sm:$0xff] %vm2243_vm2, %v2223_v55  ;;  %v1482_v14 = vpop.f32.mrf.mxu2  ;;  %v1661_v57 = vpop.f32.mrf.mxu1 }
 0x218   : > { %v2160_v56 = vsel %vm1904_vm6, %v1652_v48, %v2032_v53  ;;  %v1483_v52 = vadd.f32 %v4205_v12, %v1482_v14 }
 0x219   : > { %2289 = vst.msk [vmem:[%s3470_s19 + $0x168] sm:$0xff] %vm2243_vm2, %v2160_v56  ;;  %v1325_v15 = vpop.f32.mrf.mxu0 }
 0x21a   : > { %v1326_v63 = vadd.f32 %v4205_v12, %v1325_v15  ;;  %v1812_v1 = vadd.f32 %v4166_v51, %v1483_v52 }
 0x21c   : > { %v1655_v2 = vadd.f32 %v4189_v23, %v1326_v63  ;;  %1364 = vmatmul.bf16.gmra.mxu0 %v2720_v49  ;;  %vm1968_vm0 = vcmp.ge.f32.partialorder %v1812_v1, 0.0  ;;  %v2096_v5 = vmul.f32 0.2, %v1812_v1  ;;  %1524 = vmatmul.bf16.gmra.mxu2 %v2976_v43 }
 0x21e   : > { %vm1905_vm7 = vcmp.ge.f32.partialorder %v1655_v2, 0.0  ;;  %v2033_v0 = vmul.f32 0.2, %v1655_v2  ;;  %v2224_v7 = vsel %vm1968_vm0, %v1812_v1, %v2096_v5  ;;  %v1826_v21 = vpop.f32.mrf.mxu3 }
 0x21f   : > { %2353 = vst.msk [vmem:[%s3470_s19 + $0x368] sm:$0xff] %vm2243_vm2, %v2224_v7  ;;  %v1485_v11 = vpop.f32.mrf.mxu2  ;;  %v1664_v58 = vpop.f32.mrf.mxu1 }
 0x220   : > { %v2161_v3 = vsel %vm1905_vm7, %v1655_v2, %v2033_v0  ;;  %v1486_v51 = vadd.f32 %v4205_v12, %v1485_v11 }
 0x221   : > { %2290 = vst.msk [vmem:[%s3470_s19 + $0x170] sm:$0xff] %vm2243_vm2, %v2161_v3  ;;  %v1327_v22 = vpop.f32.mrf.mxu0 }
 0x222   : > { %v1328_v23 = vadd.f32 %v4205_v12, %v1327_v22  ;;  %v1815_v59 = vadd.f32 %v4183_v8, %v1486_v51 }
 0x224   : > { %v1657_v13 = vadd.f32 %v4209_v46, %v1328_v23  ;;  %vm1969_vm8 = vcmp.ge.f32.partialorder %v1815_v59, 0.0  ;;  %v2097_v9 = vmul.f32 0.2, %v1815_v59 }
 0x226   : > { %vm1906_vm9 = vcmp.ge.f32.partialorder %v1657_v13, 0.0  ;;  %v2034_v16 = vmul.f32 0.2, %v1657_v13  ;;  %v2225_v17 = vsel %vm1969_vm8, %v1815_v59, %v2097_v9  ;;  %v1829_v4 = vpop.f32.mrf.mxu3 }
 0x227   : > { %2354 = vst.msk [vmem:[%s3470_s19 + $0x370] sm:$0xff] %vm2243_vm2, %v2225_v17  ;;  %v1487_v54 = vpop.f32.mrf.mxu2  ;;  %v1666_v18 = vpop.f32.mrf.mxu1 }
 0x228   : > { %v2162_v20 = vsel %vm1906_vm9, %v1657_v13, %v2034_v16  ;;  %v1488_v34 = vadd.f32 %v4205_v12, %v1487_v54 }
 0x229   : > { %2291 = vst.msk [vmem:[%s3470_s19 + $0x178] sm:$0xff] %vm2243_vm2, %v2162_v20  ;;  %v1330_v37 = vpop.f32.mrf.mxu0 }
 0x22a   : > { %v1331_v8 = vadd.f32 %v4205_v12, %v1330_v37  ;;  %v1817_v27 = vadd.f32 %v4211_v25, %v1488_v34 }
 0x22c   : > { %v1660_v31 = vadd.f32 %v1659_v44, %v1331_v8  ;;  %vm1970_vm10 = vcmp.ge.f32.partialorder %v1817_v27, 0.0  ;;  %v2098_v32 = vmul.f32 0.2, %v1817_v27 }
 0x22e   : > { %vm1907_vm11 = vcmp.ge.f32.partialorder %v1660_v31, 0.0  ;;  %v2035_v46 = vmul.f32 0.2, %v1660_v31  ;;  %v2226_v19 = vsel %vm1970_vm10, %v1817_v27, %v2098_v32  ;;  %v1831_v5 = vpop.f32.mrf.mxu3 }
 0x22f   : > { %2355 = vst.msk [vmem:[%s3470_s19 + $0x378] sm:$0xff] %vm2243_vm2, %v2226_v19  ;;  %v1490_v60 = vpop.f32.mrf.mxu2  ;;  %v1669_v25 = vpop.f32.mrf.mxu1 }
 0x230   : > { %v2163_v33 = vsel %vm1907_vm11, %v1660_v31, %v2035_v46  ;;  %v1491_v35 = vadd.f32 %v4205_v12, %v1490_v60 }
 0x231   : > { %2292 = vst.msk [vmem:[%s3470_s19 + $0x180] sm:$0xff] %vm2243_vm2, %v2163_v33  ;;  %v1332_v28 = vpop.f32.mrf.mxu0 }
 0x232   : > { %v1333_v29 = vadd.f32 %v4205_v12, %v1332_v28  ;;  %v1820_v38 = vadd.f32 %v4227_v61, %v1491_v35 }
 0x234   : > { %v1662_v30 = vadd.f32 %v1661_v57, %v1333_v29  ;;  %vm1971_vm12 = vcmp.ge.f32.partialorder %v1820_v38, 0.0  ;;  %v2099_v45 = vmul.f32 0.2, %v1820_v38 }
 0x236   : > { %vm1908_vm13 = vcmp.ge.f32.partialorder %v1662_v30, 0.0  ;;  %v2036_v47 = vmul.f32 0.2, %v1662_v30  ;;  %v2227_v40 = vsel %vm1971_vm12, %v1820_v38, %v2099_v45  ;;  %v1834_v20 = vpop.f32.mrf.mxu3 }
 0x237   : > { %2356 = vst.msk [vmem:[%s3470_s19 + $0x380] sm:$0xff] %vm2243_vm2, %v2227_v40  ;;  %v1492_v44 = vpop.f32.mrf.mxu2  ;;  %v1671_v62 = vpop.f32.mrf.mxu1 }
 0x238   : > { %v2164_v41 = vsel %vm1908_vm13, %v1662_v30, %v2036_v47  ;;  %v1493_v39 = vadd.f32 %v4205_v12, %v1492_v44 }
 0x239   : > { %2293 = vst.msk [vmem:[%s3470_s19 + $0x188] sm:$0xff] %vm2243_vm2, %v2164_v41  ;;  %v1335_v48 = vpop.f32.mrf.mxu0 }
 0x23a   : > { %v1336_v42 = vadd.f32 %v4205_v12, %v1335_v48  ;;  %v1822_v61 = vadd.f32 %v1821_v6, %v1493_v39 }
 0x23c   : > { %v1665_v36 = vadd.f32 %v1664_v58, %v1336_v42  ;;  %vm1972_vm14 = vcmp.ge.f32.partialorder %v1822_v61, 0.0  ;;  %v2100_v53 = vmul.f32 0.2, %v1822_v61 }
 0x23e   : > { %vm1909_vm15 = vcmp.ge.f32.partialorder %v1665_v36, 0.0  ;;  %v2037_v50 = vmul.f32 0.2, %v1665_v36  ;;  %v2228_v55 = vsel %vm1972_vm14, %v1822_v61, %v2100_v53  ;;  %v1836_v29 = vpop.f32.mrf.mxu3 }
 0x23f   : > { %2357 = vst.msk [vmem:[%s3470_s19 + $0x388] sm:$0xff] %vm2243_vm2, %v2228_v55  ;;  %v1495_v14 = vpop.f32.mrf.mxu2  ;;  %v1674_v43 = vpop.f32.mrf.mxu1 }
 0x240   : > { %v2165_v56 = vsel %vm1909_vm15, %v1665_v36, %v2037_v50  ;;  %v1496_v49 = vadd.f32 %v4205_v12, %v1495_v14 }
 0x241   : > { %2294 = vst.msk [vmem:[%s3470_s19 + $0x190] sm:$0xff] %vm2243_vm2, %v2165_v56  ;;  %v1337_v52 = vpop.f32.mrf.mxu0 }
 0x242   : > { %v1338_v15 = vadd.f32 %v4205_v12, %v1337_v52  ;;  %v1825_v63 = vadd.f32 %v1824_v24, %v1496_v49 }
 0x244   : > { %v1667_v57 = vadd.f32 %v1666_v18, %v1338_v15  ;;  %vm1973_vm1 = vcmp.ge.f32.partialorder %v1825_v63, 0.0  ;;  %v2101_v1 = vmul.f32 0.2, %v1825_v63 }
 0x246   : > { %vm1910_vm3 = vcmp.ge.f32.partialorder %v1667_v57, 0.0  ;;  %v2038_v2 = vmul.f32 0.2, %v1667_v57  ;;  %v2229_v0 = vsel %vm1973_vm1, %v1825_v63, %v2101_v1  ;;  %v1839_v61 = vpop.f32.mrf.mxu3 }
 0x247   : > { %2358 = vst.msk [vmem:[%s3470_s19 + $0x390] sm:$0xff] %vm2243_vm2, %v2229_v0  ;;  %v1497_v7 = vpop.f32.mrf.mxu2  ;;  %v1676_v22 = vpop.f32.mrf.mxu1 }
 0x248   : > { %v2166_v6 = vsel %vm1910_vm3, %v1667_v57, %v2038_v2  ;;  %v1498_v3 = vadd.f32 %v4205_v12, %v1497_v7 }
 0x249   : > { %2295 = vst.msk [vmem:[%s3470_s19 + $0x198] sm:$0xff] %vm2243_vm2, %v2166_v6  ;;  %v1340_v11 = vpop.f32.mrf.mxu0 }
 0x24a   : > { %v1341_v51 = vadd.f32 %v4205_v12, %v1340_v11  ;;  %v1827_v23 = vadd.f32 %v1826_v21, %v1498_v3 }
 0x24c   : > { %v1670_v58 = vadd.f32 %v1669_v25, %v1341_v51  ;;  %vm1974_vm4 = vcmp.ge.f32.partialorder %v1827_v23, 0.0  ;;  %v2102_v59 = vmul.f32 0.2, %v1827_v23 }
 0x24e   : > { %vm1911_vm5 = vcmp.ge.f32.partialorder %v1670_v58, 0.0  ;;  %v2039_v13 = vmul.f32 0.2, %v1670_v58  ;;  %v2230_v9 = vsel %vm1974_vm4, %v1827_v23, %v2102_v59  ;;  %v1841_v1 = vpop.f32.mrf.mxu3 }
 0x24f   : > { %2359 = vst.msk [vmem:[%s3470_s19 + $0x398] sm:$0xff] %vm2243_vm2, %v2230_v9  ;;  %v1500_v17 = vpop.f32.mrf.mxu2  ;;  %v1679_v37 = vpop.f32.mrf.mxu1 }
 0x250   : > { %v2167_v16 = vsel %vm1911_vm5, %v1670_v58, %v2039_v13  ;;  %v1501_v54 = vadd.f32 %v4205_v12, %v1500_v17 }
 0x251   : > { %2296 = vst.msk [vmem:[%s3470_s19 + $0x1a0] sm:$0xff] %vm2243_vm2, %v2167_v16  ;;  %v1342_v24 = vpop.f32.mrf.mxu0 }
 0x252   : > { %v1343_v34 = vadd.f32 %v4205_v12, %v1342_v24  ;;  %v1830_v8 = vadd.f32 %v1829_v4, %v1501_v54 }
 0x254   : > { %v1672_v18 = vadd.f32 %v1671_v62, %v1343_v34  ;;  %vm1975_vm6 = vcmp.ge.f32.partialorder %v1830_v8, 0.0  ;;  %v2103_v27 = vmul.f32 0.2, %v1830_v8 }
 0x256   : > { %vm1912_vm0 = vcmp.ge.f32.partialorder %v1672_v18, 0.0  ;;  %v2040_v31 = vmul.f32 0.2, %v1672_v18  ;;  %v2231_v32 = vsel %vm1975_vm6, %v1830_v8, %v2103_v27  ;;  %v1844_v16 = vpop.f32.mrf.mxu3 }
 0x257   : > { %2360 = vst.msk [vmem:[%s3470_s19 + $0x3a0] sm:$0xff] %vm2243_vm2, %v2231_v32  ;;  %v1502_v19 = vpop.f32.mrf.mxu2  ;;  %v1681_v28 = vpop.f32.mrf.mxu1 }
 0x258   : > { %v2168_v46 = vsel %vm1912_vm0, %v1672_v18, %v2040_v31  ;;  %v1503_v33 = vadd.f32 %v4205_v12, %v1502_v19 }
 0x259   : > { %2297 = vst.msk [vmem:[%s3470_s19 + $0x1a8] sm:$0xff] %vm2243_vm2, %v2168_v46  ;;  %v1345_v60 = vpop.f32.mrf.mxu0 }
 0x25a   : > { %v1346_v35 = vadd.f32 %v4205_v12, %v1345_v60  ;;  %v1832_v25 = vadd.f32 %v1831_v5, %v1503_v33 }
 0x25c   : > { %v1675_v21 = vadd.f32 %v1674_v43, %v1346_v35  ;;  %vm1976_vm7 = vcmp.ge.f32.partialorder %v1832_v25, 0.0  ;;  %v2104_v38 = vmul.f32 0.2, %v1832_v25 }
 0x25e   : > { %vm1913_vm8 = vcmp.ge.f32.partialorder %v1675_v21, 0.0  ;;  %v2041_v30 = vmul.f32 0.2, %v1675_v21  ;;  %v2232_v45 = vsel %vm1976_vm7, %v1832_v25, %v2104_v38  ;;  %v1846_v35 = vpop.f32.mrf.mxu3 }
 0x25f   : > { %2361 = vst.msk [vmem:[%s3470_s19 + $0x3a8] sm:$0xff] %vm2243_vm2, %v2232_v45  ;;  %v1505_v40 = vpop.f32.mrf.mxu2  ;;  %v1684_v48 = vpop.f32.mrf.mxu1 }
 0x260   : > { %v2169_v47 = vsel %vm1913_vm8, %v1675_v21, %v2041_v30  ;;  %v1506_v41 = vadd.f32 %v4205_v12, %v1505_v40 }
 0x261   : > { %2298 = vst.msk [vmem:[%s3470_s19 + $0x1b0] sm:$0xff] %vm2243_vm2, %v2169_v47  ;;  %v1347_v44 = vpop.f32.mrf.mxu0 }
 0x262   : > { %v1348_v39 = vadd.f32 %v4205_v12, %v1347_v44  ;;  %v1835_v42 = vadd.f32 %v1834_v20, %v1506_v41 }
 0x264   : > { %v1677_v62 = vadd.f32 %v1676_v22, %v1348_v39  ;;  %vm1977_vm9 = vcmp.ge.f32.partialorder %v1835_v42, 0.0  ;;  %v2105_v36 = vmul.f32 0.2, %v1835_v42 }
 0x266   : > { %vm1914_vm10 = vcmp.ge.f32.partialorder %v1677_v62, 0.0  ;;  %v2042_v4 = vmul.f32 0.2, %v1677_v62  ;;  %v2233_v53 = vsel %vm1977_vm9, %v1835_v42, %v2105_v36  ;;  %v1849_v42 = vpop.f32.mrf.mxu3 }
 0x267   : > { %2362 = vst.msk [vmem:[%s3470_s19 + $0x3b0] sm:$0xff] %vm2243_vm2, %v2233_v53  ;;  %v1507_v55 = vpop.f32.mrf.mxu2  ;;  %v1686_v52 = vpop.f32.mrf.mxu1 }
 0x268   : > { %v2170_v50 = vsel %vm1914_vm10, %v1677_v62, %v2042_v4  ;;  %v1508_v56 = vadd.f32 %v4205_v12, %v1507_v55 }
 0x269   : > { %2299 = vst.msk [vmem:[%s3470_s19 + $0x1b8] sm:$0xff] %vm2243_vm2, %v2170_v50  ;;  %v1350_v14 = vpop.f32.mrf.mxu0  ;;  %v1371_v50 = vadd.f32 %v4205_v12, %v3473_v10 }
 0x26a   : > { %v1351_v49 = vadd.f32 %v4205_v12, %v1350_v14  ;;  %v1837_v15 = vadd.f32 %v1836_v29, %v1508_v56 }
 0x26c   : > { %v1680_v43 = vadd.f32 %v1679_v37, %v1351_v49  ;;  %vm1978_vm11 = vcmp.ge.f32.partialorder %v1837_v15, 0.0  ;;  %v2106_v63 = vmul.f32 0.2, %v1837_v15 }
 0x26e   : > { %vm1915_vm12 = vcmp.ge.f32.partialorder %v1680_v43, 0.0  ;;  %v2043_v57 = vmul.f32 0.2, %v1680_v43  ;;  %v2234_v2 = vsel %vm1978_vm11, %v1837_v15, %v2106_v63 }
 0x26f   : > { %2363 = vst.msk [vmem:[%s3470_s19 + $0x3b8] sm:$0xff] %vm2243_vm2, %v2234_v2  ;;  %v1510_v0 = vpop.f32.mrf.mxu2  ;;  %v1689_v11 = vpop.f32.mrf.mxu1 }
 0x270   : > { %v2171_v5 = vsel %vm1915_vm12, %v1680_v43, %v2043_v57  ;;  %v1511_v6 = vadd.f32 %v4205_v12, %v1510_v0 }
 0x271   : > { %2300 = vst.msk [vmem:[%s3470_s19 + $0x1c0] sm:$0xff] %vm2243_vm2, %v2171_v5  ;;  %v1352_v7 = vpop.f32.mrf.mxu0 }
 0x272   : > { %v1353_v3 = vadd.f32 %v4205_v12, %v1352_v7  ;;  %v1840_v51 = vadd.f32 %v1839_v61, %v1511_v6  ;;  %v1373_v7 = vadd.f32 %v4205_v12, %v3489_v26 }
 0x274   : > { %v1682_v22 = vadd.f32 %v1681_v28, %v1353_v3  ;;  %vm1979_vm13 = vcmp.ge.f32.partialorder %v1840_v51, 0.0  ;;  %v2107_v23 = vmul.f32 0.2, %v1840_v51 }
 0x276   : > { %vm1916_vm14 = vcmp.ge.f32.partialorder %v1682_v22, 0.0  ;;  %v2044_v58 = vmul.f32 0.2, %v1682_v22  ;;  %v2235_v59 = vsel %vm1979_vm13, %v1840_v51, %v2107_v23 }
 0x277   : > { %2364 = vst.msk [vmem:[%s3470_s19 + $0x3c0] sm:$0xff] %vm2243_vm2, %v2235_v59  ;;  %v1512_v9 = vpop.f32.mrf.mxu2  ;;  %v1691_v24 = vpop.f32.mrf.mxu1 }
 0x278   : > { %v2172_v13 = vsel %vm1916_vm14, %v1682_v22, %v2044_v58  ;;  %v1513_v17 = vadd.f32 %v4205_v12, %v1512_v9 }
 0x279   : > { %2301 = vst.msk [vmem:[%s3470_s19 + $0x1c8] sm:$0xff] %vm2243_vm2, %v2172_v13  ;;  %v1355_v20 = vpop.f32.mrf.mxu0 }
 0x27a   : > { %v1356_v54 = vadd.f32 %v4205_v12, %v1355_v20  ;;  %v1842_v34 = vadd.f32 %v1841_v1, %v1513_v17  ;;  %v1851_v1 = vpop.f32.mrf.mxu3 }
 0x27c   : > { %v1685_v37 = vadd.f32 %v1684_v48, %v1356_v54  ;;  %vm1980_vm15 = vcmp.ge.f32.partialorder %v1842_v34, 0.0  ;;  %v2108_v8 = vmul.f32 0.2, %v1842_v34 }
 0x27e   : > { %vm1917_vm1 = vcmp.ge.f32.partialorder %v1685_v37, 0.0  ;;  %v2045_v18 = vmul.f32 0.2, %v1685_v37  ;;  %v2236_v27 = vsel %vm1980_vm15, %v1842_v34, %v2108_v8 }
 0x27f   : > { %2365 = vst.msk [vmem:[%s3470_s19 + $0x3c8] sm:$0xff] %vm2243_vm2, %v2236_v27  ;;  %v1515_v32 = vpop.f32.mrf.mxu2  ;;  %v1694_v60 = vpop.f32.mrf.mxu1 }
 0x280   : > { %v2173_v31 = vsel %vm1917_vm1, %v1685_v37, %v2045_v18  ;;  %v1516_v46 = vadd.f32 %v4205_v12, %v1515_v32 }
 0x281   : > { %2302 = vst.msk [vmem:[%s3470_s19 + $0x1d0] sm:$0xff] %vm2243_vm2, %v2173_v31  ;;  %v1357_v19 = vpop.f32.mrf.mxu0 }
 0x282   : > { %v1358_v33 = vadd.f32 %v4205_v12, %v1357_v19  ;;  %v1845_v28 = vadd.f32 %v1844_v16, %v1516_v46  ;;  %v1854_v54 = vpop.f32.mrf.mxu3 }
 0x284   : > { %v1687_v29 = vadd.f32 %v1686_v52, %v1358_v33  ;;  %vm1981_vm3 = vcmp.ge.f32.partialorder %v1845_v28, 0.0  ;;  %v2109_v25 = vmul.f32 0.2, %v1845_v28 }
 0x286   : > { %vm1918_vm4 = vcmp.ge.f32.partialorder %v1687_v29, 0.0  ;;  %v2046_v21 = vmul.f32 0.2, %v1687_v29  ;;  %v2237_v38 = vsel %vm1981_vm3, %v1845_v28, %v2109_v25 }
 0x287   : > { %2366 = vst.msk [vmem:[%s3470_s19 + $0x3d0] sm:$0xff] %vm2243_vm2, %v2237_v38  ;;  %v1517_v45 = vpop.f32.mrf.mxu2  ;;  %v1696_v44 = vpop.f32.mrf.mxu1 }
 0x288   : > { %v2174_v30 = vsel %vm1918_vm4, %v1687_v29, %v2046_v21  ;;  %v1518_v47 = vadd.f32 %v4205_v12, %v1517_v45 }
 0x289   : > { %2303 = vst.msk [vmem:[%s3470_s19 + $0x1d8] sm:$0xff] %vm2243_vm2, %v2174_v30  ;;  %v1360_v40 = vpop.f32.mrf.mxu0 }
 0x28a   : > { %v1361_v41 = vadd.f32 %v4205_v12, %v1360_v40  ;;  %v1847_v39 = vadd.f32 %v1846_v35, %v1518_v47  ;;  %v1856_v35 = vpop.f32.mrf.mxu3 }
 0x28c   : > { %v1690_v48 = vadd.f32 %v1689_v11, %v1361_v41  ;;  %vm1982_vm5 = vcmp.ge.f32.partialorder %v1847_v39, 0.0  ;;  %v2110_v62 = vmul.f32 0.2, %v1847_v39 }
 0x28e   : > { %vm1919_vm6 = vcmp.ge.f32.partialorder %v1690_v48, 0.0  ;;  %v2047_v61 = vmul.f32 0.2, %v1690_v48  ;;  %v2238_v36 = vsel %vm1982_vm5, %v1847_v39, %v2110_v62 }
 0x28f   : > { %2367 = vst.msk [vmem:[%s3470_s19 + $0x3d8] sm:$0xff] %vm2243_vm2, %v2238_v36  ;;  %v1520_v53 = vpop.f32.mrf.mxu2  ;;  %v1699_v49 = vpop.f32.mrf.mxu1 }
 0x290   : > { %v2175_v4 = vsel %vm1919_vm6, %v1690_v48, %v2047_v61  ;;  %v1521_v55 = vadd.f32 %v4205_v12, %v1520_v53  ;;  %v1700_v15 = vadd.f32 %v1699_v49, %v1371_v50 }
 0x291   : > { %2304 = vst.msk [vmem:[%s3470_s19 + $0x1e0] sm:$0xff] %vm2243_vm2, %v2175_v4  ;;  %v1362_v56 = vpop.f32.mrf.mxu0 }
 0x292   : > { %v1363_v14 = vadd.f32 %v4205_v12, %v1362_v56  ;;  %v1850_v52 = vadd.f32 %v1849_v42, %v1521_v55  ;;  %vm1923_vm7 = vcmp.ge.f32.partialorder %v1700_v15, 0.0  ;;  %v2051_v57 = vmul.f32 0.2, %v1700_v15 }
 0x294   : > { %v1692_v43 = vadd.f32 %v1691_v24, %v1363_v14  ;;  %vm1983_vm0 = vcmp.ge.f32.partialorder %v1850_v52, 0.0  ;;  %v2111_v63 = vmul.f32 0.2, %v1850_v52  ;;  %v2179_v5 = vsel %vm1923_vm7, %v1700_v15, %v2051_v57 }
 0x295   : > { %2308 = vst.msk [vmem:[%s3470_s19 + $0x200] sm:$0xff] %vm2243_vm2, %v2179_v5 }
 0x296   : > { %vm1920_vm8 = vcmp.ge.f32.partialorder %v1692_v43, 0.0  ;;  %v2048_v10 = vmul.f32 0.2, %v1692_v43  ;;  %v2239_v2 = vsel %vm1983_vm0, %v1850_v52, %v2111_v63 }
 0x297   : > { %2368 = vst.msk [vmem:[%s3470_s19 + $0x3e0] sm:$0xff] %vm2243_vm2, %v2239_v2  ;;  %v1522_v6 = vpop.f32.mrf.mxu2  ;;  %v1701_v22 = vpop.f32.mrf.mxu1 }
 0x298   : > { %v2176_v0 = vsel %vm1920_vm8, %v1692_v43, %v2048_v10  ;;  %v1523_v3 = vadd.f32 %v4205_v12, %v1522_v6  ;;  %v1702_v58 = vadd.f32 %v1701_v22, %v1373_v7 }
 0x299   : > { %2305 = vst.msk [vmem:[%s3470_s19 + $0x1e8] sm:$0xff] %vm2243_vm2, %v2176_v0  ;;  %v1365_v11 = vpop.f32.mrf.mxu0 }
 0x29a   : > { %v1366_v51 = vadd.f32 %v4205_v12, %v1365_v11  ;;  %v1852_v23 = vadd.f32 %v1851_v1, %v1523_v3  ;;  %vm1924_vm10 = vcmp.ge.f32.partialorder %v1702_v58, 0.0  ;;  %v2052_v26 = vmul.f32 0.2, %v1702_v58 }
 0x29c   : > { %v1695_v59 = vadd.f32 %v1694_v60, %v1366_v51  ;;  %vm1984_vm9 = vcmp.ge.f32.partialorder %v1852_v23, 0.0  ;;  %v2112_v13 = vmul.f32 0.2, %v1852_v23  ;;  %v2180_v17 = vsel %vm1924_vm10, %v1702_v58, %v2052_v26 }
 0x29d   : > { %2309 = vst.msk [vmem:[%s3470_s19 + $0x208] sm:$0xff] %vm2243_vm2, %v2180_v17 }
 0x29e   : > { %vm1921_vm11 = vcmp.ge.f32.partialorder %v1695_v59, 0.0  ;;  %v2049_v9 = vmul.f32 0.2, %v1695_v59  ;;  %v2240_v16 = vsel %vm1984_vm9, %v1852_v23, %v2112_v13 }
 0x29f   : > { %2369 = vst.msk [vmem:[%s3470_s19 + $0x3e8] sm:$0xff] %vm2243_vm2, %v2240_v16  ;;  %v1525_v24 = vpop.f32.mrf.mxu2 }
 0x2a0   : > { %v2177_v20 = vsel %vm1921_vm11, %v1695_v59, %v2049_v9  ;;  %v1526_v34 = vadd.f32 %v4205_v12, %v1525_v24 }
 0x2a1   : > { %2306 = vst.msk [vmem:[%s3470_s19 + $0x1f0] sm:$0xff] %vm2243_vm2, %v2177_v20  ;;  %v1367_v37 = vpop.f32.mrf.mxu0 }
 0x2a2   : > { %v1368_v8 = vadd.f32 %v4205_v12, %v1367_v37  ;;  %v1855_v18 = vadd.f32 %v1854_v54, %v1526_v34 }
 0x2a4   : > { %v1697_v27 = vadd.f32 %v1696_v44, %v1368_v8  ;;  %vm1985_vm12 = vcmp.ge.f32.partialorder %v1855_v18, 0.0  ;;  %v2113_v31 = vmul.f32 0.2, %v1855_v18 }
 0x2a6   : > { %vm1922_vm13 = vcmp.ge.f32.partialorder %v1697_v27, 0.0  ;;  %v2050_v32 = vmul.f32 0.2, %v1697_v27  ;;  %v2241_v46 = vsel %vm1985_vm12, %v1855_v18, %v2113_v31 }
 0x2a7   : > { %2370 = vst.msk [vmem:[%s3470_s19 + $0x3f0] sm:$0xff] %vm2243_vm2, %v2241_v46  ;;  %v1527_v33 = vpop.f32.mrf.mxu2 }
 0x2a8   : > { %v2178_v19 = vsel %vm1922_vm13, %v1697_v27, %v2050_v32  ;;  %v1528_v60 = vadd.f32 %v4205_v12, %v1527_v33 }
 0x2a9   : > { %2307 = vst.msk [vmem:[%s3470_s19 + $0x1f8] sm:$0xff] %vm2243_vm2, %v2178_v19 }
 0x2aa   : > { %v1857_v28 = vadd.f32 %v1856_v35, %v1528_v60 }
 0x2ac   : > { %vm1986_vm14 = vcmp.ge.f32.partialorder %v1857_v28, 0.0  ;;  %v2114_v29 = vmul.f32 0.2, %v1857_v28 }
 0x2ae   : > { %v2242_v25 = vsel %vm1986_vm14, %v1857_v28, %v2114_v29 }
 0x2af   : > { %2371 = vst.msk [vmem:[%s3470_s19 + $0x3f8] sm:$0xff] %vm2243_vm2, %v2242_v25 }
 0x2b0 PF: > { %s13_s14 = sadd.s32 1, %s3279_s14   ;;  %s4374_s12 = smov %s3275_s13 }
 0x2b1   : > { %p10_p5 = scmp.ge.s32.totalorder %s13_s14, 4   ;;  %s4375_s13 = smov %s4377_s15 }
 0x2b3   :  { %12 = sbr.rel (!%p10_p5) target bundleno = 2 (0x2), region = 65 }

// kernel: conditional_discriminator_forward.6
= control target key start
LH: loop header
LB: loop body
LE: loop exit
PB: predicated region body
PF: predicated region fallthrough
CT: control target
= control target key end

     0   :  { %vm519_vm0 = vcmask 130048   ;;  %vm23_vm1 = vcmask 122880   ;;  %s2508_s1 = inlined_call_operand.vmem [shape: bf16[128,16], index: 1, kind: input, shape index: {}]   ;;  %s2509_s2 = inlined_call_operand.vmem [shape: f32[1,16], index: 2, kind: input, shape index: {}]   ;;  %s2510_s0 = inlined_call_operand.vmem [shape: bf16[512,128], index: 0, kind: input, shape index: {}]   ;;  %s2511_s3 = inlined_call_operand.vmem [shape: f32[512,16], index: 3, kind: output, shape index: {0}]   ;;  %s2512_s4 = inlined_call_operand.vmem [shape: f32[1,16], index: 4, kind: output, shape index: {1}]   ;;  %s2513_s5 = inlined_call_operand.vmem [shape: f32[1,16], index: 5, kind: output, shape index: {2}]  }
   0x1   :  { %v1519_v0 = vld [vmem:[%s2508_s1 + $0x38] sm:$0xff]  ;;  %v1518_v1 = vld [vmem:[%s2508_s1 + $0x30] sm:$0xff]  ;;  %v1517_v2 = vld [vmem:[%s2508_s1 + $0x28] sm:$0xff] }
   0x2   :  { %350 = vmatpush.bf16.msra.mxu0 %v1519_v0  ;;  %1520 = vmatpush.bf16.msra.mxu1 %v1519_v0  ;;  %v1516_v3 = vld [vmem:[%s2508_s1 + $0x20] sm:$0xff]  ;;  %v1515_v4 = vld [vmem:[%s2508_s1 + $0x18] sm:$0xff]  ;;  %v1514_v5 = vld [vmem:[%s2508_s1 + $0x10] sm:$0xff] }
   0x3   :  { %1521 = vmatpush.bf16.msra.mxu2 %v1519_v0  ;;  %1522 = vmatpush.bf16.msra.mxu3 %v1519_v0  ;;  %v1513_v6 = vld [vmem:[%s2508_s1 + $0x8] sm:$0xff]  ;;  %v1512_v7 = vld [vmem:[%s2508_s1] sm:$0xff]  ;;  %v1482_v13 = vld [vmem:[%s2510_s0 + $0x10] sm:$0xff] }
   0x4   :  { %v1480_v8 = vld [vmem:[%s2510_s0] sm:$0xff]  ;;  %v1481_v10 = vld [vmem:[%s2510_s0 + $0x8] sm:$0xff]  ;;  %v1490_v14 = vld [vmem:[%s2510_s0 + $0x50] sm:$0xff] }
   0x5   :  { %v1488_v9 = vld [vmem:[%s2510_s0 + $0x40] sm:$0xff]  ;;  %v1489_v11 = vld [vmem:[%s2510_s0 + $0x48] sm:$0xff]  ;;  %v1483_v16 = vld [vmem:[%s2510_s0 + $0x18] sm:$0xff] }
   0x6   :  { %351 = vmatpush.bf16.msra.mxu0 %v1518_v1  ;;  %1523 = vmatpush.bf16.msra.mxu1 %v1518_v1  ;;  %v1496_v12 = vld [vmem:[%s2510_s0 + $0x80] sm:$0xff]  ;;  %v1497_v15 = vld [vmem:[%s2510_s0 + $0x88] sm:$0xff]  ;;  %v1491_v17 = vld [vmem:[%s2510_s0 + $0x58] sm:$0xff] }
   0x7   :  { %1524 = vmatpush.bf16.msra.mxu2 %v1518_v1  ;;  %1525 = vmatpush.bf16.msra.mxu3 %v1518_v1  ;;  %v1498_v18 = vld [vmem:[%s2510_s0 + $0x90] sm:$0xff]  ;;  %v1504_v19 = vld [vmem:[%s2510_s0 + $0xc0] sm:$0xff]  ;;  %v1499_v22 = vld [vmem:[%s2510_s0 + $0x98] sm:$0xff] }
   0x8   :  { %v1484_v20 = vld [vmem:[%s2510_s0 + $0x20] sm:$0xff]  ;;  %v1505_v23 = vld [vmem:[%s2510_s0 + $0xc8] sm:$0xff]  ;;  %v1506_v27 = vld [vmem:[%s2510_s0 + $0xd0] sm:$0xff] }
   0x9   :  { %v1492_v21 = vld [vmem:[%s2510_s0 + $0x60] sm:$0xff]  ;;  %v1485_v24 = vld [vmem:[%s2510_s0 + $0x28] sm:$0xff]  ;;  %v1486_v28 = vld [vmem:[%s2510_s0 + $0x30] sm:$0xff] }
   0xa   :  { %352 = vmatpush.bf16.msra.mxu0 %v1517_v2  ;;  %1526 = vmatpush.bf16.msra.mxu1 %v1517_v2  ;;  %v1493_v25 = vld [vmem:[%s2510_s0 + $0x68] sm:$0xff]  ;;  %v1500_v26 = vld [vmem:[%s2510_s0 + $0xa0] sm:$0xff]  ;;  %v1494_v29 = vld [vmem:[%s2510_s0 + $0x70] sm:$0xff] }
   0xb   :  { %1527 = vmatpush.bf16.msra.mxu2 %v1517_v2  ;;  %1528 = vmatpush.bf16.msra.mxu3 %v1517_v2  ;;  %v1501_v30 = vld [vmem:[%s2510_s0 + $0xa8] sm:$0xff]  ;;  %v1507_v31 = vld [vmem:[%s2510_s0 + $0xd8] sm:$0xff]  ;;  %v1502_v34 = vld [vmem:[%s2510_s0 + $0xb0] sm:$0xff] }
   0xc   :  { %v1487_v32 = vld [vmem:[%s2510_s0 + $0x38] sm:$0xff]  ;;  %v1508_v35 = vld [vmem:[%s2510_s0 + $0xe0] sm:$0xff]  ;;  %v1509_v42 = vld [vmem:[%s2510_s0 + $0xe8] sm:$0xff] }
   0xd   :  { %v1495_v33 = vld [vmem:[%s2510_s0 + $0x78] sm:$0xff]  ;;  %v1688_v36 = vld [vmem:[%s2509_s2] ss:$0 sm:$0xff]  ;;  %v1510_v61 = vld [vmem:[%s2510_s0 + $0xf0] sm:$0xff] }
   0xe   :  { %353 = vmatpush.bf16.msra.mxu0 %v1516_v3  ;;  %1529 = vmatpush.bf16.msra.mxu1 %v1516_v3  ;;  %v1503_v41 = vld [vmem:[%s2510_s0 + $0xb8] sm:$0xff] }
   0xf   :  { %1530 = vmatpush.bf16.msra.mxu2 %v1516_v3  ;;  %1531 = vmatpush.bf16.msra.mxu3 %v1516_v3 }
  0x12   :  { %354 = vmatpush.bf16.msra.mxu0 %v1515_v4  ;;  %1532 = vmatpush.bf16.msra.mxu1 %v1515_v4 }
  0x13   :  { %1533 = vmatpush.bf16.msra.mxu2 %v1515_v4  ;;  %1534 = vmatpush.bf16.msra.mxu3 %v1515_v4 }
  0x16   :  { %355 = vmatpush.bf16.msra.mxu0 %v1514_v5  ;;  %1535 = vmatpush.bf16.msra.mxu1 %v1514_v5 }
  0x17   :  { %1536 = vmatpush.bf16.msra.mxu2 %v1514_v5  ;;  %1537 = vmatpush.bf16.msra.mxu3 %v1514_v5 }
  0x1a   :  { %356 = vmatpush.bf16.msra.mxu0 %v1513_v6  ;;  %1538 = vmatpush.bf16.msra.mxu1 %v1513_v6 }
  0x1b   :  { %1539 = vmatpush.bf16.msra.mxu2 %v1513_v6  ;;  %1540 = vmatpush.bf16.msra.mxu3 %v1513_v6 }
  0x1e   :  { %357 = vmatpush.bf16.msra.mxu0 %v1512_v7  ;;  %1541 = vmatpush.bf16.msra.mxu1 %v1512_v7 }
  0x1f   :  { %1542 = vmatpush.bf16.msra.mxu2 %v1512_v7  ;;  %1543 = vmatpush.bf16.msra.mxu3 %v1512_v7 }
  0x21   :  { %358 = vmatmul.bf16.vlgmr.msra.gmra.mxu0 %v1480_v8  ;;  %398 = vmatmul.bf16.vlgmr.msra.gmra.mxu1 %v1488_v9 }
  0x22   :  { %438 = vmatmul.bf16.vlgmr.msra.gmra.mxu2 %v1496_v12  ;;  %478 = vmatmul.bf16.vlgmr.msra.gmra.mxu3 %v1504_v19 }
  0x31   :  { %363 = vmatmul.bf16.gmra.mxu0 %v1481_v10  ;;  %403 = vmatmul.bf16.gmra.mxu1 %v1489_v11 }
  0x32   :  { %443 = vmatmul.bf16.gmra.mxu2 %v1497_v15  ;;  %483 = vmatmul.bf16.gmra.mxu3 %v1505_v23 }
  0x41   :  { %368 = vmatmul.bf16.gmra.mxu0 %v1482_v13  ;;  %408 = vmatmul.bf16.gmra.mxu1 %v1490_v14 }
  0x42   :  { %448 = vmatmul.bf16.gmra.mxu2 %v1498_v18  ;;  %488 = vmatmul.bf16.gmra.mxu3 %v1506_v27 }
  0x51   :  { %373 = vmatmul.bf16.gmra.mxu0 %v1483_v16  ;;  %413 = vmatmul.bf16.gmra.mxu1 %v1491_v17 }
  0x52   :  { %453 = vmatmul.bf16.gmra.mxu2 %v1499_v22  ;;  %493 = vmatmul.bf16.gmra.mxu3 %v1507_v31 }
  0x61   :  { %378 = vmatmul.bf16.gmra.mxu0 %v1484_v20  ;;  %418 = vmatmul.bf16.gmra.mxu1 %v1492_v21  ;;  %v1511_v20 = vld [vmem:[%s2510_s0 + $0xf8] sm:$0xff] }
  0x62   :  { %458 = vmatmul.bf16.gmra.mxu2 %v1500_v26  ;;  %498 = vmatmul.bf16.gmra.mxu3 %v1508_v35 }
  0x71   :  { %383 = vmatmul.bf16.gmra.mxu0 %v1485_v24  ;;  %423 = vmatmul.bf16.gmra.mxu1 %v1493_v25 }
  0x72   :  { %463 = vmatmul.bf16.gmra.mxu2 %v1501_v30  ;;  %503 = vmatmul.bf16.gmra.mxu3 %v1509_v42 }
  0x81   :  { %388 = vmatmul.bf16.gmra.mxu0 %v1486_v28  ;;  %428 = vmatmul.bf16.gmra.mxu1 %v1494_v29 }
  0x82   :  { %468 = vmatmul.bf16.gmra.mxu2 %v1502_v34  ;;  %508 = vmatmul.bf16.gmra.mxu3 %v1510_v61 }
  0x91   :  { %393 = vmatmul.bf16.gmra.mxu0 %v1487_v32  ;;  %433 = vmatmul.bf16.gmra.mxu1 %v1495_v33 }
  0x92   :  { %473 = vmatmul.bf16.gmra.mxu2 %v1503_v41  ;;  %513 = vmatmul.bf16.gmra.mxu3 %v1511_v20 }
  0x9e   :  { %v359_v37 = vpop.f32.mrf.mxu0  ;;  %v399_v38 = vpop.f32.mrf.mxu1 }
  0x9f   :  { %v360_v39 = vadd.f32 %v1688_v36, %v359_v37  ;;  %v1692_v40 = vadd.f32 %v1688_v36, %v399_v38 }
  0xa1   :  { %520 = vst.msk [vmem:[%s2511_s3] sm:$0xff] %vm519_vm0, %v360_v39  ;;  %v1109_v45 = vmul.f32 %v360_v39, %v360_v39  ;;  %v972_v48 = vsel %vm519_vm0, %v360_v39, 0.0 }
  0xa2   :  { %536 = vst.msk [vmem:[%s2511_s3 + $0x80] sm:$0xff] %vm519_vm0, %v1692_v40 }
  0xa3   :  { %v1173_v52 = vsel %vm519_vm0, %v1109_v45, 0.0 }
  0xa5   :  { %v439_v5 = vpop.f32.mrf.mxu2 }
  0xa6   :  { %v361_v43 = vpop.f32.mrf.mxu0  ;;  %v401_v44 = vpop.f32.mrf.mxu1  ;;  %v1760_v11 = vadd.f32 %v1688_v36, %v439_v5 }
  0xa7   :  { %v362_v46 = vadd.f32 %v1688_v36, %v361_v43  ;;  %v1711_v47 = vadd.f32 %v1688_v36, %v401_v44  ;;  %v479_v43 = vpop.f32.mrf.mxu3 }
  0xa8   :  { %552 = vst.msk [vmem:[%s2511_s3 + $0x100] sm:$0xff] %vm519_vm0, %v1760_v11  ;;  %v1865_v45 = vadd.f32 %v1688_v36, %v479_v43 }
  0xa9   :  { %521 = vst.msk [vmem:[%s2511_s3 + $0x8] sm:$0xff] %vm519_vm0, %v362_v46  ;;  %v973_v49 = vsel %vm519_vm0, %v362_v46, 0.0  ;;  %v1110_v50 = vmul.f32 %v362_v46, %v362_v46 }
  0xaa   :  { %v974_v51 = vadd.f32 %v973_v49, %v972_v48  ;;  %537 = vst.msk [vmem:[%s2511_s3 + $0x88] sm:$0xff] %vm519_vm0, %v1711_v47 }
  0xab   :  { %v1174_v53 = vsel %vm519_vm0, %v1110_v50, 0.0  ;;  %568 = vst.msk [vmem:[%s2511_s3 + $0x180] sm:$0xff] %vm519_vm0, %v1865_v45 }
  0xac   :  { %v1175_v54 = vadd.f32 %v1174_v53, %v1173_v52 }
  0xad   :  { %v441_v16 = vpop.f32.mrf.mxu2 }
  0xae   :  { %v364_v55 = vpop.f32.mrf.mxu0  ;;  %v404_v56 = vpop.f32.mrf.mxu1  ;;  %v1772_v17 = vadd.f32 %v1688_v36, %v441_v16 }
  0xaf   :  { %v365_v57 = vadd.f32 %v1688_v36, %v364_v55  ;;  %v1728_v58 = vadd.f32 %v1688_v36, %v404_v56  ;;  %v481_v52 = vpop.f32.mrf.mxu3 }
  0xb0   :  { %553 = vst.msk [vmem:[%s2511_s3 + $0x108] sm:$0xff] %vm519_vm0, %v1772_v17 }
  0xb1   :  { %522 = vst.msk [vmem:[%s2511_s3 + $0x10] sm:$0xff] %vm519_vm0, %v365_v57  ;;  %v975_v59 = vsel %vm519_vm0, %v365_v57, 0.0  ;;  %v1111_v60 = vmul.f32 %v365_v57, %v365_v57 }
  0xb2   :  { %v976_v62 = vadd.f32 %v975_v59, %v974_v51  ;;  %538 = vst.msk [vmem:[%s2511_s3 + $0x90] sm:$0xff] %vm519_vm0, %v1728_v58 }
  0xb3   :  { %v1176_v63 = vsel %vm519_vm0, %v1111_v60, 0.0 }
  0xb4   :  { %v1177_v0 = vadd.f32 %v1176_v63, %v1175_v54  ;;  %v1887_v54 = vadd.f32 %v1688_v36, %v481_v52 }
  0xb5   :  { %v444_v28 = vpop.f32.mrf.mxu2 }
  0xb6   :  { %v366_v1 = vpop.f32.mrf.mxu0  ;;  %v406_v2 = vpop.f32.mrf.mxu1  ;;  %v1814_v29 = vadd.f32 %v1688_v36, %v444_v28  ;;  %569 = vst.msk [vmem:[%s2511_s3 + $0x188] sm:$0xff] %vm519_vm0, %v1887_v54 }
  0xb7   :  { %v367_v3 = vadd.f32 %v1688_v36, %v366_v1  ;;  %v1746_v4 = vadd.f32 %v1688_v36, %v406_v2  ;;  %v484_v61 = vpop.f32.mrf.mxu3 }
  0xb8   :  { %554 = vst.msk [vmem:[%s2511_s3 + $0x110] sm:$0xff] %vm519_vm0, %v1814_v29  ;;  %v1929_v63 = vadd.f32 %v1688_v36, %v484_v61 }
  0xb9   :  { %523 = vst.msk [vmem:[%s2511_s3 + $0x18] sm:$0xff] %vm519_vm0, %v367_v3  ;;  %v977_v6 = vsel %vm519_vm0, %v367_v3, 0.0  ;;  %v1112_v7 = vmul.f32 %v367_v3, %v367_v3 }
  0xba   :  { %v978_v8 = vadd.f32 %v977_v6, %v976_v62  ;;  %539 = vst.msk [vmem:[%s2511_s3 + $0x98] sm:$0xff] %vm519_vm0, %v1746_v4 }
  0xbb   :  { %v1178_v9 = vsel %vm519_vm0, %v1112_v7, 0.0  ;;  %570 = vst.msk [vmem:[%s2511_s3 + $0x190] sm:$0xff] %vm519_vm0, %v1929_v63 }
  0xbc   :  { %v1179_v10 = vadd.f32 %v1178_v9, %v1177_v0 }
  0xbd   :  { %v446_v34 = vpop.f32.mrf.mxu2 }
  0xbe   :  { %v369_v12 = vpop.f32.mrf.mxu0  ;;  %v409_v13 = vpop.f32.mrf.mxu1  ;;  %v1828_v35 = vadd.f32 %v1688_v36, %v446_v34 }
  0xbf   :  { %v370_v14 = vadd.f32 %v1688_v36, %v369_v12  ;;  %v1769_v15 = vadd.f32 %v1688_v36, %v409_v13  ;;  %v486_v6 = vpop.f32.mrf.mxu3 }
  0xc0   :  { %555 = vst.msk [vmem:[%s2511_s3 + $0x118] sm:$0xff] %vm519_vm0, %v1828_v35 }
  0xc1   :  { %524 = vst.msk [vmem:[%s2511_s3 + $0x20] sm:$0xff] %vm519_vm0, %v370_v14  ;;  %v979_v18 = vsel %vm519_vm0, %v370_v14, 0.0  ;;  %v1113_v19 = vmul.f32 %v370_v14, %v370_v14 }
  0xc2   :  { %v1782_v21 = vadd.f32 %v979_v18, %v978_v8  ;;  %540 = vst.msk [vmem:[%s2511_s3 + $0xa0] sm:$0xff] %vm519_vm0, %v1769_v15  ;;  %v1951_v8 = vadd.f32 %v1688_v36, %v486_v6 }
  0xc3   :  { %v1180_v22 = vsel %vm519_vm0, %v1113_v19, 0.0 }
  0xc4   :  { %v1795_v23 = vadd.f32 %v1180_v22, %v1179_v10  ;;  %571 = vst.msk [vmem:[%s2511_s3 + $0x198] sm:$0xff] %vm519_vm0, %v1951_v8 }
  0xc5   :  { %v449_v42 = vpop.f32.mrf.mxu2 }
  0xc6   :  { %v371_v24 = vpop.f32.mrf.mxu0  ;;  %v411_v25 = vpop.f32.mrf.mxu1  ;;  %v1862_v44 = vadd.f32 %v1688_v36, %v449_v42 }
  0xc7   :  { %v1798_v26 = vadd.f32 %v1688_v36, %v371_v24  ;;  %v1801_v27 = vadd.f32 %v1688_v36, %v411_v25  ;;  %v489_v16 = vpop.f32.mrf.mxu3 }
  0xc8   :  { %556 = vst.msk [vmem:[%s2511_s3 + $0x120] sm:$0xff] %vm519_vm0, %v1862_v44 }
  0xc9   :  { %525 = vst.msk [vmem:[%s2511_s3 + $0x28] sm:$0xff] %vm519_vm0, %v1798_v26  ;;  %v981_v42 = vsel %vm519_vm0, %v1798_v26, 0.0 }
  0xca   :  { %541 = vst.msk [vmem:[%s2511_s3 + $0xa8] sm:$0xff] %vm519_vm0, %v1801_v27 }
  0xcd   :  { %v451_v51 = vpop.f32.mrf.mxu2 }
  0xce   :  { %v374_v30 = vpop.f32.mrf.mxu0  ;;  %v414_v31 = vpop.f32.mrf.mxu1  ;;  %v1884_v53 = vadd.f32 %v1688_v36, %v451_v51 }
  0xcf   :  { %v1822_v32 = vadd.f32 %v1688_v36, %v374_v30  ;;  %v1825_v33 = vadd.f32 %v1688_v36, %v414_v31  ;;  %v491_v28 = vpop.f32.mrf.mxu3  ;;  %v1996_v30 = vadd.f32 %v1688_v36, %v489_v16  ;;  %v1114_v31 = vmul.f32 %v1798_v26, %v1798_v26 }
  0xd0   :  { %557 = vst.msk [vmem:[%s2511_s3 + $0x128] sm:$0xff] %vm519_vm0, %v1884_v53 }
  0xd1   :  { %526 = vst.msk [vmem:[%s2511_s3 + $0x30] sm:$0xff] %vm519_vm0, %v1822_v32  ;;  %v1182_v43 = vsel %vm519_vm0, %v1114_v31, 0.0 }
  0xd2   :  { %542 = vst.msk [vmem:[%s2511_s3 + $0xb0] sm:$0xff] %vm519_vm0, %v1825_v33 }
  0xd3   :  { %572 = vst.msk [vmem:[%s2511_s3 + $0x1a0] sm:$0xff] %vm519_vm0, %v1996_v30 }
  0xd5   :  { %v454_v60 = vpop.f32.mrf.mxu2 }
  0xd6   :  { %v376_v37 = vpop.f32.mrf.mxu0  ;;  %v416_v38 = vpop.f32.mrf.mxu1  ;;  %v1926_v62 = vadd.f32 %v1688_v36, %v454_v60 }
  0xd7   :  { %v1846_v39 = vadd.f32 %v1688_v36, %v376_v37  ;;  %v1849_v41 = vadd.f32 %v1688_v36, %v416_v38  ;;  %v1115_v37 = vmul.f32 %v1822_v32, %v1822_v32  ;;  %v2016_v38 = vadd.f32 %v1688_v36, %v491_v28 }
  0xd8   :  { %558 = vst.msk [vmem:[%s2511_s3 + $0x130] sm:$0xff] %vm519_vm0, %v1926_v62 }
  0xd9   :  { %527 = vst.msk [vmem:[%s2511_s3 + $0x38] sm:$0xff] %vm519_vm0, %v1846_v39  ;;  %v1116_v26 = vmul.f32 %v1846_v39, %v1846_v39  ;;  %v1184_v51 = vsel %vm519_vm0, %v1115_v37, 0.0 }
  0xda   :  { %543 = vst.msk [vmem:[%s2511_s3 + $0xb8] sm:$0xff] %vm519_vm0, %v1849_v41 }
  0xdb   :  { %573 = vst.msk [vmem:[%s2511_s3 + $0x1a8] sm:$0xff] %vm519_vm0, %v2016_v38  ;;  %v1186_v6 = vsel %vm519_vm0, %v1116_v26, 0.0 }
  0xdd   :  { %v456_v5 = vpop.f32.mrf.mxu2 }
  0xde   :  { %v379_v46 = vpop.f32.mrf.mxu0  ;;  %v419_v48 = vpop.f32.mrf.mxu1  ;;  %v1948_v7 = vadd.f32 %v1688_v36, %v456_v5 }
  0xdf   :  { %v1873_v49 = vadd.f32 %v1688_v36, %v379_v46  ;;  %v1876_v50 = vadd.f32 %v1688_v36, %v419_v48  ;;  %v983_v46 = vsel %vm519_vm0, %v1822_v32, 0.0  ;;  %v982_v48 = vadd.f32 %v981_v42, %v1782_v21 }
  0xe0   :  { %559 = vst.msk [vmem:[%s2511_s3 + $0x138] sm:$0xff] %vm519_vm0, %v1948_v7  ;;  %v985_v32 = vsel %vm519_vm0, %v1846_v39, 0.0 }
  0xe1   :  { %528 = vst.msk [vmem:[%s2511_s3 + $0x40] sm:$0xff] %vm519_vm0, %v1873_v49  ;;  %v984_v5 = vadd.f32 %v983_v46, %v982_v48 }
  0xe2   :  { %544 = vst.msk [vmem:[%s2511_s3 + $0xc0] sm:$0xff] %vm519_vm0, %v1876_v50 }
  0xe5   :  { %v459_v14 = vpop.f32.mrf.mxu2 }
  0xe6   :  { %v381_v55 = vpop.f32.mrf.mxu0  ;;  %v421_v56 = vpop.f32.mrf.mxu1  ;;  %v1993_v24 = vadd.f32 %v1688_v36, %v459_v14  ;;  %v986_v14 = vadd.f32 %v985_v32, %v984_v5 }
  0xe7   :  { %v1910_v57 = vadd.f32 %v1688_v36, %v381_v55  ;;  %v1913_v59 = vadd.f32 %v1688_v36, %v421_v56  ;;  %v1117_v56 = vmul.f32 %v1873_v49, %v1873_v49 }
  0xe8   :  { %560 = vst.msk [vmem:[%s2511_s3 + $0x140] sm:$0xff] %vm519_vm0, %v1993_v24 }
  0xe9   :  { %529 = vst.msk [vmem:[%s2511_s3 + $0x48] sm:$0xff] %vm519_vm0, %v1910_v57  ;;  %v1118_v39 = vmul.f32 %v1910_v57, %v1910_v57 }
  0xea   :  { %545 = vst.msk [vmem:[%s2511_s3 + $0xc8] sm:$0xff] %vm519_vm0, %v1913_v59 }
  0xed   :  { %v461_v25 = vpop.f32.mrf.mxu2 }
  0xee   :  { %v384_v0 = vpop.f32.mrf.mxu0  ;;  %v424_v1 = vpop.f32.mrf.mxu1  ;;  %v2006_v34 = vadd.f32 %v1688_v36, %v461_v25  ;;  %v1190_v25 = vsel %vm519_vm0, %v1118_v39, 0.0 }
  0xef   :  { %v1937_v2 = vadd.f32 %v1688_v36, %v384_v0  ;;  %v1940_v3 = vadd.f32 %v1688_v36, %v424_v1  ;;  %v494_v0 = vpop.f32.mrf.mxu3  ;;  %v1183_v1 = vadd.f32 %v1182_v43, %v1795_v23  ;;  %v1188_v23 = vsel %vm519_vm0, %v1117_v56, 0.0 }
  0xf0   :  { %561 = vst.msk [vmem:[%s2511_s3 + $0x148] sm:$0xff] %vm519_vm0, %v2006_v34  ;;  %v2090_v5 = vadd.f32 %v1688_v36, %v494_v0 }
  0xf1   :  { %530 = vst.msk [vmem:[%s2511_s3 + $0x50] sm:$0xff] %vm519_vm0, %v1937_v2  ;;  %v1119_v16 = vmul.f32 %v1937_v2, %v1937_v2  ;;  %v991_v28 = vsel %vm519_vm0, %v1937_v2, 0.0 }
  0xf2   :  { %546 = vst.msk [vmem:[%s2511_s3 + $0xd0] sm:$0xff] %vm519_vm0, %v1940_v3 }
  0xf3   :  { %v1192_v43 = vsel %vm519_vm0, %v1119_v16, 0.0  ;;  %574 = vst.msk [vmem:[%s2511_s3 + $0x1b0] sm:$0xff] %vm519_vm0, %v2090_v5 }
  0xf5   :  { %v464_v61 = vpop.f32.mrf.mxu2 }
  0xf6   :  { %v386_v9 = vpop.f32.mrf.mxu0  ;;  %v426_v10 = vpop.f32.mrf.mxu1 }
  0xf7   :  { %v387_v12 = vadd.f32 %v1688_v36, %v386_v9  ;;  %v1975_v13 = vadd.f32 %v1688_v36, %v426_v10  ;;  %v987_v9 = vsel %vm519_vm0, %v1873_v49, 0.0  ;;  %v1185_v10 = vadd.f32 %v1184_v51, %v1183_v1  ;;  %v496_v32 = vpop.f32.mrf.mxu3 }
  0xf8   :  { %v989_v49 = vsel %vm519_vm0, %v1910_v57, 0.0  ;;  %v2108_v0 = vadd.f32 %v1688_v36, %v496_v32 }
  0xf9   :  { %531 = vst.msk [vmem:[%s2511_s3 + $0x58] sm:$0xff] %vm519_vm0, %v387_v12  ;;  %v1120_v31 = vmul.f32 %v387_v12, %v387_v12  ;;  %v993_v46 = vsel %vm519_vm0, %v387_v12, 0.0 }
  0xfa   :  { %547 = vst.msk [vmem:[%s2511_s3 + $0xd8] sm:$0xff] %vm519_vm0, %v1975_v13 }
  0xfb   :  { %v1194_v12 = vsel %vm519_vm0, %v1120_v31, 0.0  ;;  %575 = vst.msk [vmem:[%s2511_s3 + $0x1b8] sm:$0xff] %vm519_vm0, %v2108_v0 }
  0xfd   :  { %v466_v2 = vpop.f32.mrf.mxu2 }
  0xfe   :  { %v389_v18 = vpop.f32.mrf.mxu0  ;;  %v429_v19 = vpop.f32.mrf.mxu1 }
  0xff   :  { %v1987_v20 = vadd.f32 %v1688_v36, %v389_v18  ;;  %v1990_v22 = vadd.f32 %v1688_v36, %v429_v19  ;;  %v1187_v18 = vadd.f32 %v1186_v6, %v1185_v10  ;;  %v988_v19 = vadd.f32 %v987_v9, %v986_v14 }
 0x101   :  { %532 = vst.msk [vmem:[%s2511_s3 + $0x60] sm:$0xff] %vm519_vm0, %v1987_v20  ;;  %v1189_v37 = vadd.f32 %v1188_v23, %v1187_v18  ;;  %v990_v42 = vadd.f32 %v989_v49, %v988_v19  ;;  %v1121_v51 = vmul.f32 %v1987_v20, %v1987_v20  ;;  %v995_v6 = vsel %vm519_vm0, %v1987_v20, 0.0 }
 0x102   :  { %548 = vst.msk [vmem:[%s2511_s3 + $0xe0] sm:$0xff] %vm519_vm0, %v1990_v22 }
 0x103   :  { %v1191_v56 = vadd.f32 %v1190_v25, %v1189_v37  ;;  %v992_v1 = vadd.f32 %v991_v28, %v990_v42  ;;  %v1196_v20 = vsel %vm519_vm0, %v1121_v51, 0.0 }
 0x105   :  { %v1193_v39 = vadd.f32 %v1192_v43, %v1191_v56  ;;  %v994_v10 = vadd.f32 %v993_v46, %v992_v1  ;;  %v469_v46 = vpop.f32.mrf.mxu2  ;;  %v1126_v56 = vmul.f32 %v1711_v47, %v1711_v47 }
 0x106   :  { %v391_v52 = vpop.f32.mrf.mxu0  ;;  %v431_v55 = vpop.f32.mrf.mxu1 }
 0x107   :  { %v392_v60 = vadd.f32 %v1688_v36, %v391_v52  ;;  %v2053_v21 = vadd.f32 %v1688_v36, %v431_v55  ;;  %v2087_v55 = vadd.f32 %v1688_v36, %v464_v61  ;;  %v2100_v61 = vadd.f32 %v1688_v36, %v466_v2 }
 0x108   :  { %v1195_v23 = vadd.f32 %v1194_v12, %v1193_v39  ;;  %v996_v49 = vadd.f32 %v995_v6, %v994_v10  ;;  %v1003_v6 = vsel %vm519_vm0, %v1692_v40, 0.0 }
 0x109   :  { %533 = vst.msk [vmem:[%s2511_s3 + $0x68] sm:$0xff] %vm519_vm0, %v392_v60  ;;  %v1122_v9 = vmul.f32 %v392_v60, %v392_v60  ;;  %v997_v14 = vsel %vm519_vm0, %v392_v60, 0.0 }
 0x10a   :  { %549 = vst.msk [vmem:[%s2511_s3 + $0xe8] sm:$0xff] %vm519_vm0, %v2053_v21  ;;  %v1197_v60 = vadd.f32 %v1196_v20, %v1195_v23  ;;  %v998_v25 = vadd.f32 %v997_v14, %v996_v49  ;;  %v1005_v14 = vsel %vm519_vm0, %v1711_v47, 0.0  ;;  %v1206_v23 = vsel %vm519_vm0, %v1126_v56, 0.0 }
 0x10b   :  { %562 = vst.msk [vmem:[%s2511_s3 + $0x150] sm:$0xff] %vm519_vm0, %v2087_v55  ;;  %v1198_v18 = vsel %vm519_vm0, %v1122_v9, 0.0 }
 0x10c   :  { %563 = vst.msk [vmem:[%s2511_s3 + $0x158] sm:$0xff] %vm519_vm0, %v2100_v61 }
 0x10d   :  { %v471_v47 = vpop.f32.mrf.mxu2 }
 0x10e   :  { %v394_v26 = vpop.f32.mrf.mxu0  ;;  %v434_v48 = vpop.f32.mrf.mxu1 }
 0x10f   :  { %v395_v57 = vadd.f32 %v1688_v36, %v394_v26  ;;  %v2084_v52 = vadd.f32 %v1688_v36, %v434_v48  ;;  %v499_v26 = vpop.f32.mrf.mxu3  ;;  %v1199_v48 = vadd.f32 %v1198_v18, %v1197_v60  ;;  %v2167_v60 = vadd.f32 %v1688_v36, %v469_v46 }
 0x110   :  { %v1129_v46 = vmul.f32 %v1769_v15, %v1769_v15 }
 0x111   :  { %534 = vst.msk [vmem:[%s2511_s3 + $0x70] sm:$0xff] %vm519_vm0, %v395_v57  ;;  %v1123_v16 = vmul.f32 %v395_v57, %v395_v57  ;;  %v999_v19 = vsel %vm519_vm0, %v395_v57, 0.0  ;;  %v1125_v57 = vmul.f32 %v1692_v40, %v1692_v40  ;;  %v1128_v40 = vmul.f32 %v1746_v4, %v1746_v4 }
 0x112   :  { %550 = vst.msk [vmem:[%s2511_s3 + $0xf0] sm:$0xff] %vm519_vm0, %v2084_v52  ;;  %v1000_v51 = vadd.f32 %v999_v19, %v998_v25  ;;  %v1007_v19 = vsel %vm519_vm0, %v1728_v58, 0.0  ;;  %v2170_v25 = vadd.f32 %v1688_v36, %v499_v26 }
 0x113   :  { %v1200_v37 = vsel %vm519_vm0, %v1123_v16, 0.0  ;;  %v1204_v20 = vsel %vm519_vm0, %v1125_v57, 0.0  ;;  %v1127_v16 = vmul.f32 %v1728_v58, %v1728_v58  ;;  %564 = vst.msk [vmem:[%s2511_s3 + $0x160] sm:$0xff] %vm519_vm0, %v2167_v60 }
 0x114   :  { %v1201_v1 = vadd.f32 %v1200_v37, %v1199_v48  ;;  %576 = vst.msk [vmem:[%s2511_s3 + $0x1c0] sm:$0xff] %vm519_vm0, %v2170_v25 }
 0x115   :  { %v1208_v58 = vsel %vm519_vm0, %v1127_v16, 0.0  ;;  %v474_v16 = vpop.f32.mrf.mxu2 }
 0x116   :  { %v396_v28 = vpop.f32.mrf.mxu0  ;;  %v436_v31 = vpop.f32.mrf.mxu1 }
 0x117   :  { %v397_v42 = vadd.f32 %v1688_v36, %v396_v28  ;;  %v2137_v43 = vadd.f32 %v1688_v36, %v436_v31  ;;  %v501_v28 = vpop.f32.mrf.mxu3 }
 0x118   :  { %v2176_v48 = vadd.f32 %v1688_v36, %v501_v28 }
 0x119   :  { %535 = vst.msk [vmem:[%s2511_s3 + $0x78] sm:$0xff] %vm519_vm0, %v397_v42  ;;  %v1001_v2 = vsel %vm519_vm0, %v397_v42, 0.0  ;;  %v1124_v32 = vmul.f32 %v397_v42, %v397_v42  ;;  %v2173_v42 = vadd.f32 %v1688_v36, %v471_v47  ;;  %v1134_v47 = vmul.f32 %v1913_v59, %v1913_v59 }
 0x11a   :  { %v1002_v12 = vadd.f32 %v1001_v2, %v1000_v51  ;;  %551 = vst.msk [vmem:[%s2511_s3 + $0xf8] sm:$0xff] %vm519_vm0, %v2137_v43  ;;  %v1009_v51 = vsel %vm519_vm0, %v1746_v4, 0.0  ;;  %v1210_v2 = vsel %vm519_vm0, %v1128_v40, 0.0  ;;  %v1011_v4 = vsel %vm519_vm0, %v1769_v15, 0.0 }
 0x11b   :  { %v1202_v9 = vsel %vm519_vm0, %v1124_v32, 0.0  ;;  %v1130_v32 = vmul.f32 %v1801_v27, %v1801_v27  ;;  %565 = vst.msk [vmem:[%s2511_s3 + $0x168] sm:$0xff] %vm519_vm0, %v2173_v42  ;;  %v1013_v15 = vsel %vm519_vm0, %v1801_v27, 0.0  ;;  %v1017_v27 = vsel %vm519_vm0, %v1849_v41, 0.0 }
 0x11c   :  { %v1004_v39 = vadd.f32 %v1003_v6, %v1002_v12  ;;  %v1203_v10 = vadd.f32 %v1202_v9, %v1201_v1  ;;  %577 = vst.msk [vmem:[%s2511_s3 + $0x1c8] sm:$0xff] %vm519_vm0, %v2176_v48  ;;  %v1212_v12 = vsel %vm519_vm0, %v1129_v46, 0.0  ;;  %v1131_v6 = vmul.f32 %v1825_v33, %v1825_v33 }
 0x11d   :  { %v1133_v40 = vmul.f32 %v1876_v50, %v1876_v50 }
 0x11e   :  { %v1006_v49 = vadd.f32 %v1005_v14, %v1004_v39  ;;  %v1205_v18 = vadd.f32 %v1204_v20, %v1203_v10  ;;  %v1214_v10 = vsel %vm519_vm0, %v1130_v32, 0.0  ;;  %v1015_v20 = vsel %vm519_vm0, %v1825_v33, 0.0 }
 0x11f   :  { %v1132_v14 = vmul.f32 %v1849_v41, %v1849_v41  ;;  %v1220_v46 = vsel %vm519_vm0, %v1133_v40, 0.0  ;;  %v1021_v41 = vsel %vm519_vm0, %v1913_v59, 0.0  ;;  %v1023_v32 = vsel %vm519_vm0, %v1940_v3, 0.0  ;;  %v476_v59 = vpop.f32.mrf.mxu2 }
 0x120   :  { %v1008_v31 = vadd.f32 %v1007_v19, %v1006_v49  ;;  %v1207_v37 = vadd.f32 %v1206_v23, %v1205_v18  ;;  %v504_v23 = vpop.f32.mrf.mxu3  ;;  %v1216_v19 = vsel %vm519_vm0, %v1131_v6, 0.0  ;;  %v1139_v40 = vmul.f32 %v2084_v52, %v2084_v52 }
 0x122   :  { %v1010_v26 = vadd.f32 %v1009_v51, %v1008_v31  ;;  %v1209_v57 = vadd.f32 %v1208_v58, %v1207_v37  ;;  %v1218_v31 = vsel %vm519_vm0, %v1132_v14, 0.0  ;;  %v1019_v37 = vsel %vm519_vm0, %v1876_v50, 0.0 }
 0x123   :  { %v1136_v50 = vmul.f32 %v1975_v13, %v1975_v13 }
 0x124   :  { %v1012_v56 = vadd.f32 %v1011_v4, %v1010_v26  ;;  %v1211_v1 = vadd.f32 %v1210_v2, %v1209_v57  ;;  %v1135_v26 = vmul.f32 %v1940_v3, %v1940_v3  ;;  %v1222_v57 = vsel %vm519_vm0, %v1134_v47, 0.0 }
 0x126   :  { %v1014_v9 = vadd.f32 %v1013_v15, %v1012_v56  ;;  %v1213_v39 = vadd.f32 %v1212_v12, %v1211_v1  ;;  %v2239_v56 = vadd.f32 %v1688_v36, %v474_v16  ;;  %v2242_v1 = vadd.f32 %v1688_v36, %v504_v23 }
 0x127   :  { %v1224_v3 = vsel %vm519_vm0, %v1135_v26, 0.0  ;;  %v1226_v23 = vsel %vm519_vm0, %v1136_v50, 0.0  ;;  %v1033_v26 = vsel %vm519_vm0, %v2137_v43, 0.0 }
 0x128   :  { %v1215_v49 = vadd.f32 %v1214_v10, %v1213_v39  ;;  %v1016_v18 = vadd.f32 %v1015_v20, %v1014_v9  ;;  %v506_v12 = vpop.f32.mrf.mxu3  ;;  %v2245_v9 = vadd.f32 %v1688_v36, %v476_v59  ;;  %v1025_v10 = vsel %vm519_vm0, %v1975_v13, 0.0  ;;  %566 = vst.msk [vmem:[%s2511_s3 + $0x170] sm:$0xff] %vm519_vm0, %v2239_v56 }
 0x129   :  { %v2248_v39 = vadd.f32 %v1688_v36, %v506_v12  ;;  %v1137_v20 = vmul.f32 %v1990_v22, %v1990_v22  ;;  %578 = vst.msk [vmem:[%s2511_s3 + $0x1d0] sm:$0xff] %vm519_vm0, %v2242_v1  ;;  %v1027_v13 = vsel %vm519_vm0, %v1990_v22, 0.0  ;;  %v1029_v22 = vsel %vm519_vm0, %v2053_v21, 0.0 }
 0x12a   :  { %v1018_v28 = vadd.f32 %v1017_v27, %v1016_v18  ;;  %v1217_v33 = vadd.f32 %v1216_v19, %v1215_v49  ;;  %v1138_v49 = vmul.f32 %v2053_v21, %v2053_v21  ;;  %567 = vst.msk [vmem:[%s2511_s3 + $0x178] sm:$0xff] %vm519_vm0, %v2245_v9  ;;  %v1232_v21 = vsel %vm519_vm0, %v1139_v40, 0.0 }
 0x12b   :  { %579 = vst.msk [vmem:[%s2511_s3 + $0x1d8] sm:$0xff] %vm519_vm0, %v2248_v39  ;;  %v1228_v27 = vsel %vm519_vm0, %v1137_v20, 0.0  ;;  %v1144_v20 = vmul.f32 %v1828_v35, %v1828_v35  ;;  %v1146_v40 = vmul.f32 %v1884_v53, %v1884_v53 }
 0x12c   :  { %v1020_v58 = vadd.f32 %v1019_v37, %v1018_v28  ;;  %v1219_v51 = vadd.f32 %v1218_v31, %v1217_v33  ;;  %v1230_v33 = vsel %vm519_vm0, %v1138_v49, 0.0  ;;  %v1031_v31 = vsel %vm519_vm0, %v2084_v52, 0.0 }
 0x12d   :  { %v1140_v37 = vmul.f32 %v2137_v43, %v2137_v43  ;;  %v1142_v52 = vmul.f32 %v1772_v17, %v1772_v17  ;;  %v1143_v43 = vmul.f32 %v1814_v29, %v1814_v29 }
 0x12e   :  { %v1022_v2 = vadd.f32 %v1021_v41, %v1020_v58  ;;  %v1221_v4 = vadd.f32 %v1220_v46, %v1219_v51  ;;  %v1141_v41 = vmul.f32 %v1760_v11, %v1760_v11 }
 0x12f   :  { %v1240_v49 = vsel %vm519_vm0, %v1143_v43, 0.0 }
 0x130   :  { %v1024_v15 = vadd.f32 %v1023_v32, %v1022_v2  ;;  %v1223_v6 = vadd.f32 %v1222_v57, %v1221_v4  ;;  %v509_v58 = vpop.f32.mrf.mxu3  ;;  %v1035_v4 = vsel %vm519_vm0, %v1760_v11, 0.0  ;;  %v1234_v32 = vsel %vm519_vm0, %v1140_v37, 0.0 }
 0x131   :  { %v1236_v12 = vsel %vm519_vm0, %v1141_v41, 0.0  ;;  %v1039_v11 = vsel %vm519_vm0, %v1814_v29, 0.0  ;;  %v1145_v29 = vmul.f32 %v1862_v44, %v1862_v44  ;;  %v1147_v37 = vmul.f32 %v1926_v62, %v1926_v62 }
 0x132   :  { %v1026_v14 = vadd.f32 %v1025_v10, %v1024_v15  ;;  %v1225_v16 = vadd.f32 %v1224_v3, %v1223_v6  ;;  %v1037_v15 = vsel %vm519_vm0, %v1772_v17, 0.0  ;;  %v1238_v10 = vsel %vm519_vm0, %v1142_v52, 0.0 }
 0x133   :  { %v1148_v41 = vmul.f32 %v1948_v7, %v1948_v7 }
 0x134   :  { %v1028_v18 = vadd.f32 %v1027_v13, %v1026_v14  ;;  %v1227_v19 = vadd.f32 %v1226_v23, %v1225_v16  ;;  %v2311_v14 = vadd.f32 %v1688_v36, %v509_v58 }
 0x136   :  { %v1229_v47 = vadd.f32 %v1228_v27, %v1227_v19  ;;  %v1030_v28 = vadd.f32 %v1029_v22, %v1028_v18  ;;  %v1041_v18 = vsel %vm519_vm0, %v1828_v35, 0.0  ;;  %580 = vst.msk [vmem:[%s2511_s3 + $0x1e0] sm:$0xff] %vm519_vm0, %v2311_v14  ;;  %v1242_v22 = vsel %vm519_vm0, %v1144_v20, 0.0 }
 0x137   :  { %v1043_v35 = vsel %vm519_vm0, %v1862_v44, 0.0  ;;  %v1047_v44 = vsel %vm519_vm0, %v1926_v62, 0.0  ;;  %v1051_v62 = vsel %vm519_vm0, %v1993_v24, 0.0  ;;  %v1152_v20 = vmul.f32 %v2100_v61, %v2100_v61 }
 0x138   :  { %v1231_v51 = vadd.f32 %v1230_v33, %v1229_v47  ;;  %v1032_v46 = vadd.f32 %v1031_v31, %v1030_v28  ;;  %v511_v16 = vpop.f32.mrf.mxu3  ;;  %v1244_v33 = vsel %vm519_vm0, %v1145_v29, 0.0  ;;  %v1045_v31 = vsel %vm519_vm0, %v1884_v53, 0.0 }
 0x139   :  { %v2314_v17 = vadd.f32 %v1688_v36, %v511_v16  ;;  %v1049_v53 = vsel %vm519_vm0, %v1948_v7, 0.0  ;;  %v1053_v7 = vsel %vm519_vm0, %v2006_v34, 0.0  ;;  %v1057_v29 = vsel %vm519_vm0, %v2100_v61, 0.0 }
 0x13a   :  { %v1233_v57 = vadd.f32 %v1232_v21, %v1231_v51  ;;  %v1034_v2 = vadd.f32 %v1033_v26, %v1032_v46  ;;  %v1246_v46 = vsel %vm519_vm0, %v1146_v40, 0.0  ;;  %v1059_v61 = vsel %vm519_vm0, %v2167_v60, 0.0 }
 0x13b   :  { %581 = vst.msk [vmem:[%s2511_s3 + $0x1e8] sm:$0xff] %vm519_vm0, %v2314_v17 }
 0x13c   :  { %v1036_v50 = vadd.f32 %v1035_v4, %v1034_v2  ;;  %v1235_v59 = vadd.f32 %v1234_v32, %v1233_v57  ;;  %v1248_v2 = vsel %vm519_vm0, %v1147_v37, 0.0  ;;  %v1149_v4 = vmul.f32 %v1993_v24, %v1993_v24 }
 0x13d   :  { %v1055_v24 = vsel %vm519_vm0, %v2087_v55, 0.0 }
 0x13e   :  { %v1038_v6 = vadd.f32 %v1037_v15, %v1036_v50  ;;  %v1237_v3 = vadd.f32 %v1236_v12, %v1235_v59  ;;  %v1250_v50 = vsel %vm519_vm0, %v1148_v41, 0.0  ;;  %v1150_v59 = vmul.f32 %v2006_v34, %v2006_v34 }
 0x13f   :  { %v1252_v43 = vsel %vm519_vm0, %v1149_v4, 0.0  ;;  %v1157_v41 = vmul.f32 %v1865_v45, %v1865_v45  ;;  %v1546_v4 = vmov 0.0  }
 0x140   :  { %v1040_v23 = vadd.f32 %v1039_v11, %v1038_v6  ;;  %v1239_v13 = vadd.f32 %v1238_v10, %v1237_v3  ;;  %v514_v21 = vpop.f32.mrf.mxu3  ;;  %v1151_v6 = vmul.f32 %v2087_v55, %v2087_v55  ;;  %v1254_v11 = vsel %vm519_vm0, %v1150_v59, 0.0  ;;  %24 = vst.msk [vmem:[%s2512_s4] sm:$0x1] %vm23_vm1, %v1546_v4 }
 0x141   :  { %v2367_v16 = vadd.f32 %v1688_v36, %v514_v21  ;;  %v1153_v55 = vmul.f32 %v2167_v60, %v2167_v60  ;;  %v1063_v60 = vsel %vm519_vm0, %v2239_v56, 0.0  ;;  %v1065_v21 = vsel %vm519_vm0, %v2245_v9, 0.0  ;;  %25 = vst.msk [vmem:[%s2513_s5] sm:$0x1] %vm23_vm1, %v1546_v4 }
 0x142   :  { %v1042_v19 = vadd.f32 %v1041_v18, %v1040_v23  ;;  %v1241_v27 = vadd.f32 %v1240_v49, %v1239_v13  ;;  %v1256_v18 = vsel %vm519_vm0, %v1151_v6, 0.0 }
 0x143   :  { %582 = vst.msk [vmem:[%s2511_s3 + $0x1f0] sm:$0xff] %vm519_vm0, %v2367_v16 }
 0x144   :  { %v1044_v47 = vadd.f32 %v1043_v35, %v1042_v19  ;;  %v1243_v28 = vadd.f32 %v1242_v22, %v1241_v27  ;;  %v1154_v22 = vmul.f32 %v2173_v42, %v2173_v42 }
 0x146   :  { %v1245_v58 = vadd.f32 %v1244_v33, %v1243_v28  ;;  %v1046_v51 = vadd.f32 %v1045_v31, %v1044_v47  ;;  %v1260_v47 = vsel %vm519_vm0, %v1153_v55, 0.0  ;;  %v1061_v28 = vsel %vm519_vm0, %v2173_v42, 0.0 }
 0x147   :  { %v1155_v33 = vmul.f32 %v2239_v56, %v2239_v56  ;;  %v1158_v56 = vmul.f32 %v1887_v54, %v1887_v54 }
 0x148   :  { %v1048_v26 = vadd.f32 %v1047_v44, %v1046_v51  ;;  %v1247_v57 = vadd.f32 %v1246_v46, %v1245_v58  ;;  %v516_v23 = vpop.f32.mrf.mxu3  ;;  %v1262_v58 = vsel %vm519_vm0, %v1154_v22, 0.0  ;;  %v1156_v51 = vmul.f32 %v2245_v9, %v2245_v9 }
 0x149   :  { %v2370_v34 = vadd.f32 %v1688_v36, %v516_v23  ;;  %v1258_v36 = vsel %vm519_vm0, %v1152_v20, 0.0  ;;  %v1264_v42 = vsel %vm519_vm0, %v1155_v33, 0.0  ;;  %v1069_v9 = vsel %vm519_vm0, %v1887_v54, 0.0 }
 0x14a   :  { %v1050_v52 = vadd.f32 %v1049_v53, %v1048_v26  ;;  %v1249_v32 = vadd.f32 %v1248_v2, %v1247_v57  ;;  %v1067_v2 = vsel %vm519_vm0, %v1865_v45, 0.0  ;;  %v1266_v53 = vsel %vm519_vm0, %v1156_v51, 0.0 }
 0x14b   :  { %583 = vst.msk [vmem:[%s2511_s3 + $0x1f8] sm:$0xff] %vm519_vm0, %v2370_v34  ;;  %v1268_v45 = vsel %vm519_vm0, %v1157_v41, 0.0  ;;  %v1073_v54 = vsel %vm519_vm0, %v1951_v8, 0.0  ;;  %v1162_v23 = vmul.f32 %v2016_v38, %v2016_v38  ;;  %v1167_v51 = vmul.f32 %v2242_v1, %v2242_v1 }
 0x14c   :  { %v1052_v12 = vadd.f32 %v1051_v62, %v1050_v52  ;;  %v1251_v15 = vadd.f32 %v1250_v50, %v1249_v32  ;;  %v1159_v50 = vmul.f32 %v1929_v63, %v1929_v63 }
 0x14e   :  { %v1054_v3 = vadd.f32 %v1053_v7, %v1052_v12  ;;  %v1253_v10 = vadd.f32 %v1252_v43, %v1251_v15  ;;  %v1270_v12 = vsel %vm519_vm0, %v1158_v56, 0.0  ;;  %v1071_v15 = vsel %vm519_vm0, %v1929_v63, 0.0 }
 0x14f   :  { %v1160_v43 = vmul.f32 %v1951_v8, %v1951_v8  ;;  %v1075_v63 = vsel %vm519_vm0, %v1996_v30, 0.0  ;;  %v1077_v8 = vsel %vm519_vm0, %v2016_v38, 0.0  ;;  %v1081_v38 = vsel %vm519_vm0, %v2108_v0, 0.0 }
 0x150   :  { %v1056_v13 = vadd.f32 %v1055_v24, %v1054_v3  ;;  %v1255_v49 = vadd.f32 %v1254_v11, %v1253_v10  ;;  %v1272_v3 = vsel %vm519_vm0, %v1159_v50, 0.0  ;;  %v1161_v10 = vmul.f32 %v1996_v30, %v1996_v30 }
 0x151   :  { %v1274_v20 = vsel %vm519_vm0, %v1160_v43, 0.0  ;;  %v1079_v30 = vsel %vm519_vm0, %v2090_v5, 0.0  ;;  %v1171_v50 = vmul.f32 %v2367_v16, %v2367_v16 }
 0x152   :  { %v1058_v19 = vadd.f32 %v1057_v29, %v1056_v13  ;;  %v1257_v27 = vadd.f32 %v1256_v18, %v1255_v49  ;;  %v1276_v18 = vsel %vm519_vm0, %v1161_v10, 0.0  ;;  %v1163_v29 = vmul.f32 %v2090_v5, %v2090_v5 }
 0x153   :  { %v1083_v5 = vsel %vm519_vm0, %v2170_v25, 0.0 }
 0x154   :  { %v1259_v35 = vadd.f32 %v1258_v36, %v1257_v27  ;;  %v1060_v40 = vadd.f32 %v1059_v61, %v1058_v19  ;;  %v1278_v27 = vsel %vm519_vm0, %v1162_v23, 0.0  ;;  %v1164_v36 = vmul.f32 %v2108_v0, %v2108_v0 }
 0x155   :  { %v1085_v0 = vsel %vm519_vm0, %v2176_v48, 0.0 }
 0x156   :  { %v1261_v31 = vadd.f32 %v1260_v47, %v1259_v35  ;;  %v1062_v37 = vadd.f32 %v1061_v28, %v1060_v40  ;;  %v1280_v35 = vsel %vm519_vm0, %v1163_v29, 0.0  ;;  %v1165_v40 = vmul.f32 %v2170_v25, %v2170_v25  ;;  %v971_v29 = vld [vmem:[%s2512_s4] sm:$0x1] }
 0x157   :  { %v1282_v33 = vsel %vm519_vm0, %v1164_v36, 0.0  ;;  %v1087_v25 = vsel %vm519_vm0, %v2242_v1, 0.0  ;;  %v1091_v1 = vsel %vm519_vm0, %v2311_v14, 0.0 }
 0x158   :  { %v1263_v46 = vadd.f32 %v1262_v58, %v1261_v31  ;;  %v1064_v44 = vadd.f32 %v1063_v60, %v1062_v37  ;;  %v1166_v31 = vmul.f32 %v2176_v48, %v2176_v48  ;;  %v1284_v60 = vsel %vm519_vm0, %v1165_v40, 0.0 }
 0x159   :  { %v1089_v48 = vsel %vm519_vm0, %v2248_v39, 0.0 }
 0x15a   :  { %v1265_v26 = vadd.f32 %v1264_v42, %v1263_v46  ;;  %v1066_v57 = vadd.f32 %v1065_v21, %v1064_v44  ;;  %v1286_v41 = vsel %vm519_vm0, %v1166_v31, 0.0  ;;  %v1168_v42 = vmul.f32 %v2248_v39, %v2248_v39 }
 0x15b   :  { %v1093_v39 = vsel %vm519_vm0, %v2314_v17, 0.0 }
 0x15c   :  { %v1068_v52 = vadd.f32 %v1067_v2, %v1066_v57  ;;  %v1267_v32 = vadd.f32 %v1266_v53, %v1265_v26  ;;  %v1288_v57 = vsel %vm519_vm0, %v1167_v51, 0.0  ;;  %v1169_v2 = vmul.f32 %v2311_v14, %v2311_v14 }
 0x15d   :  { %v1290_v4 = vsel %vm519_vm0, %v1168_v42, 0.0  ;;  %v1095_v14 = vsel %vm519_vm0, %v2367_v16, 0.0 }
 0x15e   :  { %v1070_v62 = vadd.f32 %v1069_v9, %v1068_v52  ;;  %v1269_v59 = vadd.f32 %v1268_v45, %v1267_v32  ;;  %v1170_v52 = vmul.f32 %v2314_v17, %v2314_v17  ;;  %v1292_v9 = vsel %vm519_vm0, %v1169_v2, 0.0 }
 0x15f   :  { %v1097_v17 = vsel %vm519_vm0, %v2370_v34, 0.0 }
 0x160   :  { %v1072_v7 = vadd.f32 %v1071_v15, %v1070_v62  ;;  %v1271_v6 = vadd.f32 %v1270_v12, %v1269_v59  ;;  %v1294_v12 = vsel %vm519_vm0, %v1170_v52, 0.0  ;;  %v1172_v15 = vmul.f32 %v2370_v34, %v2370_v34 }
 0x162   :  { %v1074_v11 = vadd.f32 %v1073_v54, %v1072_v7  ;;  %v1273_v24 = vadd.f32 %v1272_v3, %v1271_v6  ;;  %v1296_v6 = vsel %vm519_vm0, %v1171_v50, 0.0  ;;  %v1298_v10 = vsel %vm519_vm0, %v1172_v15, 0.0 }
 0x164   :  { %v1076_v13 = vadd.f32 %v1075_v63, %v1074_v11  ;;  %v1275_v49 = vadd.f32 %v1274_v20, %v1273_v24 }
 0x166   :  { %v1277_v55 = vadd.f32 %v1276_v18, %v1275_v49  ;;  %v1078_v19 = vadd.f32 %v1077_v8, %v1076_v13 }
 0x168   :  { %v1080_v61 = vadd.f32 %v1079_v30, %v1078_v19  ;;  %v1279_v22 = vadd.f32 %v1278_v27, %v1277_v55  ;;  %v1108_v19 = vld [vmem:[%s2513_s5] sm:$0x1] }
 0x16a   :  { %v1082_v47 = vadd.f32 %v1081_v38, %v1080_v61  ;;  %v1281_v28 = vadd.f32 %v1280_v35, %v1279_v22 }
 0x16c   :  { %v1084_v37 = vadd.f32 %v1083_v5, %v1082_v47  ;;  %v1283_v58 = vadd.f32 %v1282_v33, %v1281_v28 }
 0x16e   :  { %v1086_v46 = vadd.f32 %v1085_v0, %v1084_v37  ;;  %v1285_v44 = vadd.f32 %v1284_v60, %v1283_v58 }
 0x170   :  { %v1088_v21 = vadd.f32 %v1087_v25, %v1086_v46  ;;  %v1287_v26 = vadd.f32 %v1286_v41, %v1285_v44 }
 0x172   :  { %v1090_v56 = vadd.f32 %v1089_v48, %v1088_v21  ;;  %v1289_v53 = vadd.f32 %v1288_v57, %v1287_v26 }
 0x174   :  { %v1291_v32 = vadd.f32 %v1290_v4, %v1289_v53  ;;  %v1092_v45 = vadd.f32 %v1091_v1, %v1090_v56 }
 0x176   :  { %v1293_v62 = vadd.f32 %v1292_v9, %v1291_v32  ;;  %v1094_v59 = vadd.f32 %v1093_v39, %v1092_v45 }
 0x178   :  { %v1295_v43 = vadd.f32 %v1294_v12, %v1293_v62  ;;  %v1096_v7 = vadd.f32 %v1095_v14, %v1094_v59 }
 0x17a   :  { %v1297_v3 = vadd.f32 %v1296_v6, %v1295_v43  ;;  %v1098_v54 = vadd.f32 %v1097_v17, %v1096_v7 }
 0x17c   :  { %v1099_v11 = vrot.slane %v1098_v54, 4  ;;  %v1299_v24 = vadd.f32 %v1298_v10, %v1297_v3 }
 0x17e   :  { %v1100_v20 = vadd.f32 %v1099_v11, %v1098_v54  ;;  %v1300_v63 = vrot.slane %v1299_v24, 4 }
 0x180   :  { %v1101_v23 = vrot.slane %v1100_v20, 2  ;;  %v1301_v16 = vadd.f32 %v1300_v63, %v1299_v24 }
 0x182   :  { %v1102_v13 = vadd.f32 %v1101_v23, %v1100_v20  ;;  %v1302_v49 = vrot.slane %v1301_v16, 2 }
 0x184   :  { %v1103_v18 = vrot.slane %v1102_v13, 1  ;;  %v1303_v8 = vadd.f32 %v1302_v49, %v1301_v16 }
 0x186   :  { %v1104_v55 = vadd.f32 %v1103_v18, %v1102_v13  ;;  %v1304_v34 = vrot.slane %v1303_v8, 1 }
 0x188   :  { %v1105_v27 = vadd.f32 %v1104_v55, %v971_v29  ;;  %v1305_v30 = vadd.f32 %v1304_v34, %v1303_v8 }
 0x18a   :  { %1107 = vst.msk [vmem:[%s2512_s4] sm:$0x1] %vm23_vm1, %v1105_v27  ;;  %v1306_v36 = vadd.f32 %v1305_v30, %v1108_v19 }
 0x18c   :  { %1307 = vst.msk [vmem:[%s2513_s5] sm:$0x1] %vm23_vm1, %v1306_v36 }

// kernel: conditional_discriminator_forward.7
= control target key start
LH: loop header
LB: loop body
LE: loop exit
PB: predicated region body
PF: predicated region fallthrough
CT: control target
= control target key end

     0   :  { %vm352_vm0 = vcmask 261120   ;;  %vm23_vm1 = vcmask 253952   ;;  %s1111_s1 = inlined_call_operand.vmem [shape: bf16[256,32], index: 1, kind: input, shape index: {}]   ;;  %s1112_s2 = inlined_call_operand.vmem [shape: f32[1,32], index: 2, kind: input, shape index: {}]   ;;  %s1113_s0 = inlined_call_operand.vmem [shape: bf16[128,256], index: 0, kind: input, shape index: {}]   ;;  %s1114_s3 = inlined_call_operand.vmem [shape: f32[128,32], index: 3, kind: output, shape index: {0}]   ;;  %s1115_s4 = inlined_call_operand.vmem [shape: f32[1,32], index: 4, kind: output, shape index: {1}]   ;;  %s1116_s5 = inlined_call_operand.vmem [shape: f32[1,32], index: 5, kind: output, shape index: {2}]  }
   0x1   :  { %v728_v0 = vld [vmem:[%s1111_s1 + $0x38] sm:$0xff]  ;;  %v727_v2 = vld [vmem:[%s1111_s1 + $0x30] sm:$0xff]  ;;  %v726_v4 = vld [vmem:[%s1111_s1 + $0x28] sm:$0xff] }
   0x2   :  { %v736_v1 = vld [vmem:[%s1111_s1 + $0x78] sm:$0xff]  ;;  %254 = vmatpush.bf16.msra.mxu0 %v728_v0  ;;  %v735_v3 = vld [vmem:[%s1111_s1 + $0x70] sm:$0xff]  ;;  %737 = vmatpush.bf16.msra.mxu2 %v728_v0  ;;  %v734_v5 = vld [vmem:[%s1111_s1 + $0x68] sm:$0xff] }
   0x3   :  { %303 = vmatpush.bf16.msra.mxu1 %v736_v1  ;;  %745 = vmatpush.bf16.msra.mxu3 %v736_v1  ;;  %v725_v6 = vld [vmem:[%s1111_s1 + $0x20] sm:$0xff]  ;;  %v724_v8 = vld [vmem:[%s1111_s1 + $0x18] sm:$0xff]  ;;  %v723_v10 = vld [vmem:[%s1111_s1 + $0x10] sm:$0xff] }
   0x4   :  { %v733_v7 = vld [vmem:[%s1111_s1 + $0x60] sm:$0xff]  ;;  %v732_v9 = vld [vmem:[%s1111_s1 + $0x58] sm:$0xff]  ;;  %v731_v11 = vld [vmem:[%s1111_s1 + $0x50] sm:$0xff] }
   0x5   :  { %v722_v12 = vld [vmem:[%s1111_s1 + $0x8] sm:$0xff]  ;;  %v721_v14 = vld [vmem:[%s1111_s1] sm:$0xff]  ;;  %v587_v28 = vld [vmem:[%s1113_s0 + $0x10] sm:$0xf] }
   0x6   :  { %255 = vmatpush.bf16.msra.mxu0 %v727_v2  ;;  %738 = vmatpush.bf16.msra.mxu2 %v727_v2  ;;  %v730_v13 = vld [vmem:[%s1111_s1 + $0x48] sm:$0xff]  ;;  %v729_v15 = vld [vmem:[%s1111_s1 + $0x40] sm:$0xff]  ;;  %v708_v29 = vld [vmem:[%s1113_s0 + $0x14] sm:$0xf0] }
   0x7   :  { %304 = vmatpush.bf16.msra.mxu1 %v735_v3  ;;  %746 = vmatpush.bf16.msra.mxu3 %v735_v3  ;;  %v579_v16 = vld [vmem:[%s1113_s0] sm:$0xf]  ;;  %v706_v17 = vld [vmem:[%s1113_s0 + $0x4] sm:$0xf0]  ;;  %v705_v18 = vld [vmem:[%s1113_s0 + $0x4] sm:$0xf]  ;;  %v588_v36 = vor.u32 %v708_v29, %v587_v28 }
   0x8   :  { %v581_v19 = vld [vmem:[%s1113_s0 + $0x8] sm:$0xf0]  ;;  %v611_v20 = vld [vmem:[%s1113_s0 + $0x40] sm:$0xf]  ;;  %v714_v21 = vld [vmem:[%s1113_s0 + $0x44] sm:$0xf0]  ;;  %v580_v24 = vor.u32 %v706_v17, %v579_v16 }
   0x9   :  { %v713_v22 = vld [vmem:[%s1113_s0 + $0x44] sm:$0xf]  ;;  %v613_v23 = vld [vmem:[%s1113_s0 + $0x48] sm:$0xf0]  ;;  %v584_v25 = vor.u32 %v705_v18, %v581_v19  ;;  %v612_v26 = vor.u32 %v714_v21, %v611_v20  ;;  %v707_v30 = vld [vmem:[%s1113_s0 + $0x14] sm:$0xf] }
   0xa   :  { %256 = vmatpush.bf16.msra.mxu0 %v726_v4  ;;  %739 = vmatpush.bf16.msra.mxu2 %v726_v4  ;;  %v616_v27 = vor.u32 %v713_v22, %v613_v23  ;;  %v589_v31 = vld [vmem:[%s1113_s0 + $0x18] sm:$0xf0]  ;;  %v619_v32 = vld [vmem:[%s1113_s0 + $0x50] sm:$0xf]  ;;  %v716_v33 = vld [vmem:[%s1113_s0 + $0x54] sm:$0xf0] }
   0xb   :  { %305 = vmatpush.bf16.msra.mxu1 %v734_v5  ;;  %747 = vmatpush.bf16.msra.mxu3 %v734_v5  ;;  %v715_v34 = vld [vmem:[%s1113_s0 + $0x54] sm:$0xf]  ;;  %v621_v35 = vld [vmem:[%s1113_s0 + $0x58] sm:$0xf0]  ;;  %v592_v37 = vor.u32 %v707_v30, %v589_v31  ;;  %v620_v38 = vor.u32 %v716_v33, %v619_v32  ;;  %v595_v40 = vld [vmem:[%s1113_s0 + $0x20] sm:$0xf] }
   0xc   :  { %v624_v39 = vor.u32 %v715_v34, %v621_v35  ;;  %v710_v41 = vld [vmem:[%s1113_s0 + $0x24] sm:$0xf0]  ;;  %v709_v42 = vld [vmem:[%s1113_s0 + $0x24] sm:$0xf]  ;;  %v597_v43 = vld [vmem:[%s1113_s0 + $0x28] sm:$0xf0] }
   0xd   :  { %v627_v44 = vld [vmem:[%s1113_s0 + $0x60] sm:$0xf]  ;;  %v718_v45 = vld [vmem:[%s1113_s0 + $0x64] sm:$0xf0]  ;;  %v717_v46 = vld [vmem:[%s1113_s0 + $0x64] sm:$0xf]  ;;  %v596_v48 = vor.u32 %v710_v41, %v595_v40  ;;  %v600_v49 = vor.u32 %v709_v42, %v597_v43 }
   0xe   :  { %257 = vmatpush.bf16.msra.mxu0 %v725_v6  ;;  %740 = vmatpush.bf16.msra.mxu2 %v725_v6  ;;  %v629_v47 = vld [vmem:[%s1113_s0 + $0x68] sm:$0xf0]  ;;  %v628_v50 = vor.u32 %v718_v45, %v627_v44  ;;  %v603_v52 = vld [vmem:[%s1113_s0 + $0x30] sm:$0xf]  ;;  %v712_v53 = vld [vmem:[%s1113_s0 + $0x34] sm:$0xf0] }
   0xf   :  { %306 = vmatpush.bf16.msra.mxu1 %v733_v7  ;;  %748 = vmatpush.bf16.msra.mxu3 %v733_v7  ;;  %v632_v51 = vor.u32 %v717_v46, %v629_v47  ;;  %v711_v54 = vld [vmem:[%s1113_s0 + $0x34] sm:$0xf]  ;;  %v605_v55 = vld [vmem:[%s1113_s0 + $0x38] sm:$0xf0]  ;;  %v635_v56 = vld [vmem:[%s1113_s0 + $0x70] sm:$0xf]  ;;  %v604_v60 = vor.u32 %v712_v53, %v603_v52 }
  0x10   :  { %v720_v57 = vld [vmem:[%s1113_s0 + $0x74] sm:$0xf0]  ;;  %v719_v58 = vld [vmem:[%s1113_s0 + $0x74] sm:$0xf]  ;;  %v637_v59 = vld [vmem:[%s1113_s0 + $0x78] sm:$0xf0]  ;;  %v608_v61 = vor.u32 %v711_v54, %v605_v55 }
  0x11   :  { %v636_v62 = vor.u32 %v720_v57, %v635_v56  ;;  %v640_v63 = vor.u32 %v719_v58, %v637_v59  ;;  %v933_v0 = vld [vmem:[%s1112_s2] ss:$0 sm:$0xff] }
  0x12   :  { %258 = vmatpush.bf16.msra.mxu0 %v724_v8  ;;  %741 = vmatpush.bf16.msra.mxu2 %v724_v8 }
  0x13   :  { %307 = vmatpush.bf16.msra.mxu1 %v732_v9  ;;  %749 = vmatpush.bf16.msra.mxu3 %v732_v9 }
  0x16   :  { %259 = vmatpush.bf16.msra.mxu0 %v723_v10  ;;  %742 = vmatpush.bf16.msra.mxu2 %v723_v10 }
  0x17   :  { %308 = vmatpush.bf16.msra.mxu1 %v731_v11  ;;  %750 = vmatpush.bf16.msra.mxu3 %v731_v11 }
  0x1a   :  { %260 = vmatpush.bf16.msra.mxu0 %v722_v12  ;;  %743 = vmatpush.bf16.msra.mxu2 %v722_v12 }
  0x1b   :  { %309 = vmatpush.bf16.msra.mxu1 %v730_v13  ;;  %751 = vmatpush.bf16.msra.mxu3 %v730_v13 }
  0x1e   :  { %261 = vmatpush.bf16.msra.mxu0 %v721_v14  ;;  %744 = vmatpush.bf16.msra.mxu2 %v721_v14 }
  0x1f   :  { %310 = vmatpush.bf16.msra.mxu1 %v729_v15  ;;  %752 = vmatpush.bf16.msra.mxu3 %v729_v15 }
  0x21   :  { %262 = vmatmul.bf16.vlgmr.msra.gmra.mxu0 %v580_v24  ;;  %282 = vmatmul.bf16.vlgmr.msra.gmra.mxu2 %v612_v26 }
  0x22   :  { %311 = vmatmul.bf16.vlgmr.msra.gmra.mxu1 %v584_v25  ;;  %331 = vmatmul.bf16.vlgmr.msra.gmra.mxu3 %v616_v27 }
  0x31   :  { %267 = vmatmul.bf16.gmra.mxu0 %v588_v36  ;;  %287 = vmatmul.bf16.gmra.mxu2 %v620_v38 }
  0x32   :  { %316 = vmatmul.bf16.gmra.mxu1 %v592_v37  ;;  %336 = vmatmul.bf16.gmra.mxu3 %v624_v39 }
  0x41   :  { %272 = vmatmul.bf16.gmra.mxu0 %v596_v48  ;;  %292 = vmatmul.bf16.gmra.mxu2 %v628_v50 }
  0x42   :  { %321 = vmatmul.bf16.gmra.mxu1 %v600_v49  ;;  %341 = vmatmul.bf16.gmra.mxu3 %v632_v51  ;;  %v755_v51 = vmov 0.0  }
  0x43   :  { %24 = vst.msk [vmem:[%s1115_s4] sm:$0x1] %vm23_vm1, %v755_v51 }
  0x44   :  { %25 = vst.msk [vmem:[%s1116_s5] sm:$0x1] %vm23_vm1, %v755_v51 }
  0x51   :  { %277 = vmatmul.bf16.gmra.mxu0 %v604_v60  ;;  %297 = vmatmul.bf16.gmra.mxu2 %v636_v62 }
  0x52   :  { %326 = vmatmul.bf16.gmra.mxu1 %v608_v61  ;;  %346 = vmatmul.bf16.gmra.mxu3 %v640_v63 }
  0x9e   :  { %v263_v1 = vpop.f32.mrf.mxu0 }
  0x9f   :  { %v312_v2 = vpop.f32.mrf.mxu1  ;;  %v264_v3 = vadd.f32 %v933_v0, %v263_v1 }
  0xa1   :  { %v936_v4 = vadd.f32 %v312_v2, %v264_v3 }
  0xa3   :  { %353 = vst.msk [vmem:[%s1114_s3] sm:$0xff] %vm352_vm0, %v936_v4  ;;  %v510_v46 = vmul.f32 %v936_v4, %v936_v4  ;;  %v469_v52 = vsel %vm352_vm0, %v936_v4, 0.0 }
  0xa4   :  { %v283_v5 = vpop.f32.mrf.mxu2 }
  0xa5   :  { %v332_v6 = vpop.f32.mrf.mxu3  ;;  %v284_v8 = vadd.f32 %v933_v0, %v283_v5  ;;  %v526_v60 = vsel %vm352_vm0, %v510_v46, 0.0 }
  0xa6   :  { %v265_v7 = vpop.f32.mrf.mxu0 }
  0xa7   :  { %v314_v9 = vpop.f32.mrf.mxu1  ;;  %v266_v10 = vadd.f32 %v933_v0, %v265_v7  ;;  %v945_v11 = vadd.f32 %v332_v6, %v284_v8 }
  0xa9   :  { %v315_v12 = vadd.f32 %v314_v9, %v266_v10  ;;  %361 = vst.msk [vmem:[%s1114_s3 + $0x40] sm:$0xff] %vm352_vm0, %v945_v11 }
  0xab   :  { %354 = vst.msk [vmem:[%s1114_s3 + $0x8] sm:$0xff] %vm352_vm0, %v315_v12  ;;  %v511_v45 = vmul.f32 %v315_v12, %v315_v12  ;;  %v470_v47 = vsel %vm352_vm0, %v315_v12, 0.0 }
  0xac   :  { %v285_v13 = vpop.f32.mrf.mxu2  ;;  %v471_v61 = vadd.f32 %v470_v47, %v469_v52 }
  0xad   :  { %v334_v14 = vpop.f32.mrf.mxu3  ;;  %v286_v16 = vadd.f32 %v933_v0, %v285_v13  ;;  %v527_v56 = vsel %vm352_vm0, %v511_v45, 0.0 }
  0xae   :  { %v268_v15 = vpop.f32.mrf.mxu0  ;;  %v528_v4 = vadd.f32 %v527_v56, %v526_v60 }
  0xaf   :  { %v317_v17 = vpop.f32.mrf.mxu1  ;;  %v269_v18 = vadd.f32 %v933_v0, %v268_v15  ;;  %v958_v19 = vadd.f32 %v334_v14, %v286_v16 }
  0xb1   :  { %v318_v20 = vadd.f32 %v317_v17, %v269_v18  ;;  %362 = vst.msk [vmem:[%s1114_s3 + $0x48] sm:$0xff] %vm352_vm0, %v958_v19 }
  0xb3   :  { %355 = vst.msk [vmem:[%s1114_s3 + $0x10] sm:$0xff] %vm352_vm0, %v318_v20  ;;  %v512_v48 = vmul.f32 %v318_v20, %v318_v20  ;;  %v472_v57 = vsel %vm352_vm0, %v318_v20, 0.0 }
  0xb4   :  { %v288_v21 = vpop.f32.mrf.mxu2  ;;  %v473_v5 = vadd.f32 %v472_v57, %v471_v61 }
  0xb5   :  { %v337_v22 = vpop.f32.mrf.mxu3  ;;  %v289_v24 = vadd.f32 %v933_v0, %v288_v21  ;;  %v529_v63 = vsel %vm352_vm0, %v512_v48, 0.0 }
  0xb6   :  { %v270_v23 = vpop.f32.mrf.mxu0  ;;  %v530_v9 = vadd.f32 %v529_v63, %v528_v4 }
  0xb7   :  { %v319_v25 = vpop.f32.mrf.mxu1  ;;  %v271_v26 = vadd.f32 %v933_v0, %v270_v23  ;;  %v971_v27 = vadd.f32 %v337_v22, %v289_v24 }
  0xb9   :  { %v320_v28 = vadd.f32 %v319_v25, %v271_v26  ;;  %363 = vst.msk [vmem:[%s1114_s3 + $0x50] sm:$0xff] %vm352_vm0, %v971_v27  ;;  %v520_v51 = vmul.f32 %v971_v27, %v971_v27 }
  0xbb   :  { %356 = vst.msk [vmem:[%s1114_s3 + $0x18] sm:$0xff] %vm352_vm0, %v320_v28  ;;  %v513_v58 = vmul.f32 %v320_v28, %v320_v28  ;;  %v474_v1 = vsel %vm352_vm0, %v320_v28, 0.0 }
  0xbc   :  { %v290_v29 = vpop.f32.mrf.mxu2  ;;  %v475_v10 = vadd.f32 %v474_v1, %v473_v5 }
  0xbd   :  { %v339_v30 = vpop.f32.mrf.mxu3  ;;  %v291_v32 = vadd.f32 %v933_v0, %v290_v29  ;;  %v531_v6 = vsel %vm352_vm0, %v513_v58, 0.0 }
  0xbe   :  { %v273_v31 = vpop.f32.mrf.mxu0  ;;  %v532_v17 = vadd.f32 %v531_v6, %v530_v9 }
  0xbf   :  { %v322_v33 = vpop.f32.mrf.mxu1  ;;  %v274_v34 = vadd.f32 %v933_v0, %v273_v31  ;;  %v984_v35 = vadd.f32 %v339_v30, %v291_v32 }
  0xc1   :  { %v323_v36 = vadd.f32 %v322_v33, %v274_v34  ;;  %364 = vst.msk [vmem:[%s1114_s3 + $0x58] sm:$0xff] %vm352_vm0, %v984_v35  ;;  %v518_v34 = vmul.f32 %v945_v11, %v945_v11  ;;  %v521_v56 = vmul.f32 %v984_v35, %v984_v35  ;;  %v490_v58 = vsel %vm352_vm0, %v984_v35, 0.0 }
  0xc3   :  { %357 = vst.msk [vmem:[%s1114_s3 + $0x20] sm:$0xff] %vm352_vm0, %v323_v36  ;;  %v514_v2 = vmul.f32 %v323_v36, %v323_v36  ;;  %v476_v7 = vsel %vm352_vm0, %v323_v36, 0.0  ;;  %v547_v61 = vsel %vm352_vm0, %v521_v56, 0.0 }
  0xc4   :  { %v293_v37 = vpop.f32.mrf.mxu2  ;;  %v477_v18 = vadd.f32 %v476_v7, %v475_v10 }
  0xc5   :  { %v342_v38 = vpop.f32.mrf.mxu3  ;;  %v294_v40 = vadd.f32 %v933_v0, %v293_v37  ;;  %v533_v12 = vsel %vm352_vm0, %v514_v2, 0.0 }
  0xc6   :  { %v275_v39 = vpop.f32.mrf.mxu0  ;;  %v534_v25 = vadd.f32 %v533_v12, %v532_v17 }
  0xc7   :  { %v324_v41 = vpop.f32.mrf.mxu1  ;;  %v276_v42 = vadd.f32 %v933_v0, %v275_v39  ;;  %v997_v43 = vadd.f32 %v342_v38, %v294_v40  ;;  %v484_v40 = vsel %vm352_vm0, %v945_v11, 0.0 }
  0xc9   :  { %v325_v44 = vadd.f32 %v324_v41, %v276_v42  ;;  %365 = vst.msk [vmem:[%s1114_s3 + $0x60] sm:$0xff] %vm352_vm0, %v997_v43  ;;  %v519_v41 = vmul.f32 %v958_v19, %v958_v19  ;;  %v492_v63 = vsel %vm352_vm0, %v997_v43, 0.0 }
  0xcb   :  { %358 = vst.msk [vmem:[%s1114_s3 + $0x28] sm:$0xff] %vm352_vm0, %v325_v44  ;;  %v515_v8 = vmul.f32 %v325_v44, %v325_v44  ;;  %v478_v13 = vsel %vm352_vm0, %v325_v44, 0.0 }
  0xcc   :  { %v295_v49 = vpop.f32.mrf.mxu2  ;;  %v479_v26 = vadd.f32 %v478_v13, %v477_v18 }
  0xcd   :  { %v344_v50 = vpop.f32.mrf.mxu3  ;;  %v296_v54 = vadd.f32 %v933_v0, %v295_v49  ;;  %v535_v22 = vsel %vm352_vm0, %v515_v8, 0.0  ;;  %v541_v49 = vsel %vm352_vm0, %v518_v34, 0.0 }
  0xce   :  { %v278_v53 = vpop.f32.mrf.mxu0  ;;  %v536_v32 = vadd.f32 %v535_v22, %v534_v25 }
  0xcf   :  { %v327_v55 = vpop.f32.mrf.mxu1  ;;  %v279_v59 = vadd.f32 %v933_v0, %v278_v53  ;;  %v1026_v62 = vadd.f32 %v344_v50, %v296_v54  ;;  %v486_v50 = vsel %vm352_vm0, %v958_v19, 0.0  ;;  %v543_v54 = vsel %vm352_vm0, %v519_v41, 0.0 }
  0xd0   :  { %v545_v19 = vsel %vm352_vm0, %v520_v51, 0.0 }
  0xd1   :  { %v328_v3 = vadd.f32 %v327_v55, %v279_v59  ;;  %366 = vst.msk [vmem:[%s1114_s3 + $0x68] sm:$0xff] %vm352_vm0, %v1026_v62  ;;  %v488_v55 = vsel %vm352_vm0, %v971_v27, 0.0  ;;  %v522_v59 = vmul.f32 %v997_v43, %v997_v43  ;;  %v523_v1 = vmul.f32 %v1026_v62, %v1026_v62 }
  0xd2   :  { %v494_v35 = vsel %vm352_vm0, %v1026_v62, 0.0 }
  0xd3   :  { %359 = vst.msk [vmem:[%s1114_s3 + $0x30] sm:$0xff] %vm352_vm0, %v328_v3  ;;  %v516_v14 = vmul.f32 %v328_v3, %v328_v3  ;;  %v480_v23 = vsel %vm352_vm0, %v328_v3, 0.0  ;;  %v549_v4 = vsel %vm352_vm0, %v522_v59, 0.0  ;;  %v551_v8 = vsel %vm352_vm0, %v523_v1, 0.0 }
  0xd4   :  { %v298_v15 = vpop.f32.mrf.mxu2  ;;  %v481_v33 = vadd.f32 %v480_v23, %v479_v26 }
  0xd5   :  { %v347_v16 = vpop.f32.mrf.mxu3  ;;  %v299_v21 = vadd.f32 %v933_v0, %v298_v15  ;;  %v537_v30 = vsel %vm352_vm0, %v516_v14, 0.0 }
  0xd6   :  { %v280_v20 = vpop.f32.mrf.mxu0  ;;  %v538_v38 = vadd.f32 %v537_v30, %v536_v32  ;;  %v509_v32 = vld [vmem:[%s1116_s5] sm:$0x1] }
  0xd7   :  { %v281_v24 = vadd.f32 %v933_v0, %v280_v20  ;;  %v329_v28 = vpop.f32.mrf.mxu1  ;;  %v348_v29 = vadd.f32 %v347_v16, %v299_v21 }
  0xd9   :  { %v330_v31 = vadd.f32 %v329_v28, %v281_v24  ;;  %367 = vst.msk [vmem:[%s1114_s3 + $0x70] sm:$0xff] %vm352_vm0, %v348_v29  ;;  %v524_v5 = vmul.f32 %v348_v29, %v348_v29  ;;  %v496_v9 = vsel %vm352_vm0, %v348_v29, 0.0  ;;  %v468_v29 = vld [vmem:[%s1115_s4] sm:$0x1] }
  0xdb   :  { %360 = vst.msk [vmem:[%s1114_s3 + $0x38] sm:$0xff] %vm352_vm0, %v330_v31  ;;  %v482_v36 = vsel %vm352_vm0, %v330_v31, 0.0  ;;  %v517_v37 = vmul.f32 %v330_v31, %v330_v31  ;;  %v553_v13 = vsel %vm352_vm0, %v524_v5, 0.0 }
  0xdc   :  { %v483_v39 = vadd.f32 %v482_v36, %v481_v33  ;;  %v300_v44 = vpop.f32.mrf.mxu2 }
  0xdd   :  { %v539_v42 = vsel %vm352_vm0, %v517_v37, 0.0  ;;  %v349_v45 = vpop.f32.mrf.mxu3  ;;  %v301_v48 = vadd.f32 %v933_v0, %v300_v44 }
  0xde   :  { %v485_v46 = vadd.f32 %v484_v40, %v483_v39  ;;  %v540_v47 = vadd.f32 %v539_v42, %v538_v38 }
  0xdf   :  { %v350_v53 = vadd.f32 %v349_v45, %v301_v48 }
  0xe0   :  { %v487_v11 = vadd.f32 %v486_v50, %v485_v46  ;;  %v542_v52 = vadd.f32 %v541_v49, %v540_v47 }
  0xe1   :  { %368 = vst.msk [vmem:[%s1114_s3 + $0x78] sm:$0xff] %vm352_vm0, %v350_v53  ;;  %v525_v10 = vmul.f32 %v350_v53, %v350_v53  ;;  %v498_v14 = vsel %vm352_vm0, %v350_v53, 0.0 }
  0xe2   :  { %v489_v0 = vadd.f32 %v488_v55, %v487_v11  ;;  %v544_v57 = vadd.f32 %v543_v54, %v542_v52 }
  0xe3   :  { %v555_v17 = vsel %vm352_vm0, %v525_v10, 0.0 }
  0xe4   :  { %v546_v60 = vadd.f32 %v545_v19, %v544_v57  ;;  %v491_v27 = vadd.f32 %v490_v58, %v489_v0 }
  0xe6   :  { %v493_v2 = vadd.f32 %v492_v63, %v491_v27  ;;  %v548_v3 = vadd.f32 %v547_v61, %v546_v60 }
  0xe8   :  { %v495_v6 = vadd.f32 %v494_v35, %v493_v2  ;;  %v550_v7 = vadd.f32 %v549_v4, %v548_v3 }
  0xea   :  { %v497_v12 = vadd.f32 %v496_v9, %v495_v6  ;;  %v552_v43 = vadd.f32 %v551_v8, %v550_v7 }
  0xec   :  { %v554_v15 = vadd.f32 %v553_v13, %v552_v43  ;;  %v499_v16 = vadd.f32 %v498_v14, %v497_v12 }
  0xee   :  { %v500_v18 = vrot.slane %v499_v16, 4  ;;  %v556_v62 = vadd.f32 %v555_v17, %v554_v15 }
  0xf0   :  { %v501_v20 = vadd.f32 %v500_v18, %v499_v16  ;;  %v557_v21 = vrot.slane %v556_v62, 4 }
  0xf2   :  { %v502_v22 = vrot.slane %v501_v20, 2  ;;  %v558_v23 = vadd.f32 %v557_v21, %v556_v62 }
  0xf4   :  { %v503_v24 = vadd.f32 %v502_v22, %v501_v20  ;;  %v559_v25 = vrot.slane %v558_v23, 2 }
  0xf6   :  { %v504_v26 = vrot.slane %v503_v24, 1  ;;  %v560_v28 = vadd.f32 %v559_v25, %v558_v23 }
  0xf8   :  { %v505_v30 = vadd.f32 %v504_v26, %v503_v24  ;;  %v561_v31 = vrot.slane %v560_v28, 1 }
  0xfa   :  { %v506_v33 = vadd.f32 %v505_v30, %v468_v29  ;;  %v562_v34 = vadd.f32 %v561_v31, %v560_v28 }
  0xfc   :  { %508 = vst.msk [vmem:[%s1115_s4] sm:$0x1] %vm23_vm1, %v506_v33  ;;  %v563_v36 = vadd.f32 %v562_v34, %v509_v32 }
  0xfe   :  { %564 = vst.msk [vmem:[%s1116_s5] sm:$0x1] %vm23_vm1, %v563_v36 }

// kernel: conditional_discriminator_forward.8
= control target key start
LH: loop header
LB: loop body
LE: loop exit
PB: predicated region body
PF: predicated region fallthrough
CT: control target
= control target key end

     0   :  { %vm23_vm0 = vcmask 516096   ;;  %v693_v60 = vmov 0.0   ;;  %vm410_vm1 = vcmask 523264   ;;  %s917_s1 = inlined_call_operand.vmem [shape: bf16[512,64], index: 1, kind: input, shape index: {}]   ;;  %s918_s2 = inlined_call_operand.vmem [shape: f32[1,64], index: 2, kind: input, shape index: {}]   ;;  %s919_s0 = inlined_call_operand.vmem [shape: bf16[32,512], index: 0, kind: input, shape index: {}]   ;;  %s920_s4 = inlined_call_operand.vmem [shape: f32[1,64], index: 4, kind: output, shape index: {1}]   ;;  %s921_s5 = inlined_call_operand.vmem [shape: f32[1,64], index: 5, kind: output, shape index: {2}]   ;;  %s922_s3 = inlined_call_operand.vmem [shape: f32[32,64], index: 3, kind: output, shape index: {0}]  }
   0x1   :  { %v666_v0 = vld [vmem:[%s917_s1 + $0x38] sm:$0xff]  ;;  %v665_v4 = vld [vmem:[%s917_s1 + $0x30] sm:$0xff]  ;;  %v664_v8 = vld [vmem:[%s917_s1 + $0x28] sm:$0xff]  ;;  %24 = vst.msk [vmem:[%s920_s4] sm:$0x1] %vm23_vm0, %v693_v60 }
   0x2   :  { %v674_v1 = vld [vmem:[%s917_s1 + $0x78] sm:$0xff]  ;;  %334 = vmatpush.bf16.msra.mxu0 %v666_v0  ;;  %v673_v5 = vld [vmem:[%s917_s1 + $0x70] sm:$0xff]  ;;  %v672_v9 = vld [vmem:[%s917_s1 + $0x68] sm:$0xff]  ;;  %25 = vst.msk [vmem:[%s921_s5] sm:$0x1] %vm23_vm0, %v693_v60 }
   0x3   :  { %v682_v2 = vld [vmem:[%s917_s1 + $0xb8] sm:$0xff]  ;;  %353 = vmatpush.bf16.msra.mxu1 %v674_v1  ;;  %v681_v6 = vld [vmem:[%s917_s1 + $0xb0] sm:$0xff]  ;;  %v680_v10 = vld [vmem:[%s917_s1 + $0xa8] sm:$0xff] }
   0x4   :  { %v690_v3 = vld [vmem:[%s917_s1 + $0xf8] sm:$0xff]  ;;  %372 = vmatpush.bf16.msra.mxu2 %v682_v2  ;;  %v689_v7 = vld [vmem:[%s917_s1 + $0xf0] sm:$0xff]  ;;  %v688_v11 = vld [vmem:[%s917_s1 + $0xe8] sm:$0xff] }
   0x5   :  { %391 = vmatpush.bf16.msra.mxu3 %v690_v3  ;;  %v663_v12 = vld [vmem:[%s917_s1 + $0x20] sm:$0xff]  ;;  %v662_v16 = vld [vmem:[%s917_s1 + $0x18] sm:$0xff]  ;;  %v661_v20 = vld [vmem:[%s917_s1 + $0x10] sm:$0xff] }
   0x6   :  { %335 = vmatpush.bf16.msra.mxu0 %v665_v4  ;;  %v671_v13 = vld [vmem:[%s917_s1 + $0x60] sm:$0xff]  ;;  %v670_v17 = vld [vmem:[%s917_s1 + $0x58] sm:$0xff]  ;;  %v669_v21 = vld [vmem:[%s917_s1 + $0x50] sm:$0xff] }
   0x7   :  { %354 = vmatpush.bf16.msra.mxu1 %v673_v5  ;;  %v679_v14 = vld [vmem:[%s917_s1 + $0xa0] sm:$0xff]  ;;  %v678_v18 = vld [vmem:[%s917_s1 + $0x98] sm:$0xff]  ;;  %v677_v22 = vld [vmem:[%s917_s1 + $0x90] sm:$0xff] }
   0x8   :  { %373 = vmatpush.bf16.msra.mxu2 %v681_v6  ;;  %v687_v15 = vld [vmem:[%s917_s1 + $0xe0] sm:$0xff]  ;;  %v686_v19 = vld [vmem:[%s917_s1 + $0xd8] sm:$0xff]  ;;  %v685_v23 = vld [vmem:[%s917_s1 + $0xd0] sm:$0xff] }
   0x9   :  { %392 = vmatpush.bf16.msra.mxu3 %v689_v7  ;;  %v660_v24 = vld [vmem:[%s917_s1 + $0x8] sm:$0xff]  ;;  %v659_v28 = vld [vmem:[%s917_s1] sm:$0xff]  ;;  %v653_v33 = vld [vmem:[%s919_s0 + $0xc] sm:$0xf0] }
   0xa   :  { %336 = vmatpush.bf16.msra.mxu0 %v664_v8  ;;  %v668_v25 = vld [vmem:[%s917_s1 + $0x48] sm:$0xff]  ;;  %v667_v29 = vld [vmem:[%s917_s1 + $0x40] sm:$0xff]  ;;  %v495_v35 = vld [vmem:[%s919_s0 + $0x10] sm:$0xf0] }
   0xb   :  { %355 = vmatpush.bf16.msra.mxu1 %v672_v9  ;;  %v676_v26 = vld [vmem:[%s917_s1 + $0x88] sm:$0xff]  ;;  %v675_v30 = vld [vmem:[%s917_s1 + $0x80] sm:$0xff]  ;;  %v654_v37 = vld [vmem:[%s919_s0 + $0x14] sm:$0xf0] }
   0xc   :  { %374 = vmatpush.bf16.msra.mxu2 %v680_v10  ;;  %v684_v27 = vld [vmem:[%s917_s1 + $0xc8] sm:$0xff]  ;;  %v683_v31 = vld [vmem:[%s917_s1 + $0xc0] sm:$0xff]  ;;  %v503_v39 = vld [vmem:[%s919_s0 + $0x18] sm:$0xf0] }
   0xd   :  { %393 = vmatpush.bf16.msra.mxu3 %v688_v11  ;;  %v493_v32 = vld [vmem:[%s919_s0] sm:$0xf]  ;;  %v651_v34 = vld [vmem:[%s919_s0 + $0x4] sm:$0xf]  ;;  %v501_v36 = vld [vmem:[%s919_s0 + $0x8] sm:$0xf] }
   0xe   :  { %337 = vmatpush.bf16.msra.mxu0 %v663_v12  ;;  %v652_v38 = vld [vmem:[%s919_s0 + $0xc] sm:$0xf]  ;;  %v494_v40 = vor.u32 %v653_v33, %v493_v32  ;;  %v498_v41 = vor.u32 %v651_v34, %v495_v35  ;;  %v502_v42 = vor.u32 %v654_v37, %v501_v36  ;;  %v509_v44 = vld [vmem:[%s919_s0 + $0x20] sm:$0xf]  ;;  %v657_v45 = vld [vmem:[%s919_s0 + $0x2c] sm:$0xf0] }
   0xf   :  { %356 = vmatpush.bf16.msra.mxu1 %v671_v13  ;;  %v506_v43 = vor.u32 %v652_v38, %v503_v39  ;;  %v655_v46 = vld [vmem:[%s919_s0 + $0x24] sm:$0xf]  ;;  %v511_v47 = vld [vmem:[%s919_s0 + $0x30] sm:$0xf0]  ;;  %v517_v48 = vld [vmem:[%s919_s0 + $0x28] sm:$0xf]  ;;  %v510_v52 = vor.u32 %v657_v45, %v509_v44 }
  0x10   :  { %375 = vmatpush.bf16.msra.mxu2 %v679_v14  ;;  %v658_v49 = vld [vmem:[%s919_s0 + $0x34] sm:$0xf0]  ;;  %v656_v50 = vld [vmem:[%s919_s0 + $0x2c] sm:$0xf]  ;;  %v519_v51 = vld [vmem:[%s919_s0 + $0x38] sm:$0xf0]  ;;  %v514_v53 = vor.u32 %v655_v46, %v511_v47 }
  0x11   :  { %394 = vmatpush.bf16.msra.mxu3 %v687_v15  ;;  %v518_v54 = vor.u32 %v658_v49, %v517_v48  ;;  %v522_v55 = vor.u32 %v656_v50, %v519_v51  ;;  %v692_v56 = vld [vmem:[%s918_s2] ss:$0 sm:$0xff] }
  0x12   :  { %338 = vmatpush.bf16.msra.mxu0 %v662_v16 }
  0x13   :  { %357 = vmatpush.bf16.msra.mxu1 %v670_v17 }
  0x14   :  { %376 = vmatpush.bf16.msra.mxu2 %v678_v18 }
  0x15   :  { %395 = vmatpush.bf16.msra.mxu3 %v686_v19 }
  0x16   :  { %339 = vmatpush.bf16.msra.mxu0 %v661_v20 }
  0x17   :  { %358 = vmatpush.bf16.msra.mxu1 %v669_v21 }
  0x18   :  { %377 = vmatpush.bf16.msra.mxu2 %v677_v22 }
  0x19   :  { %396 = vmatpush.bf16.msra.mxu3 %v685_v23 }
  0x1a   :  { %340 = vmatpush.bf16.msra.mxu0 %v660_v24 }
  0x1b   :  { %359 = vmatpush.bf16.msra.mxu1 %v668_v25 }
  0x1c   :  { %378 = vmatpush.bf16.msra.mxu2 %v676_v26 }
  0x1d   :  { %397 = vmatpush.bf16.msra.mxu3 %v684_v27 }
  0x1e   :  { %341 = vmatpush.bf16.msra.mxu0 %v659_v28 }
  0x1f   :  { %360 = vmatpush.bf16.msra.mxu1 %v667_v29 }
  0x20   :  { %379 = vmatpush.bf16.msra.mxu2 %v675_v30 }
  0x21   :  { %398 = vmatpush.bf16.msra.mxu3 %v683_v31  ;;  %342 = vmatmul.bf16.vlgmr.msra.gmra.mxu0 %v494_v40 }
  0x22   :  { %361 = vmatmul.bf16.vlgmr.msra.gmra.mxu1 %v498_v41 }
  0x23   :  { %380 = vmatmul.bf16.vlgmr.msra.gmra.mxu2 %v502_v42 }
  0x24   :  { %399 = vmatmul.bf16.vlgmr.msra.gmra.mxu3 %v506_v43 }
  0x31   :  { %347 = vmatmul.bf16.gmra.mxu0 %v510_v52 }
  0x32   :  { %366 = vmatmul.bf16.gmra.mxu1 %v514_v53  ;;  %v442_v53 = vld [vmem:[%s920_s4] sm:$0x1] }
  0x33   :  { %385 = vmatmul.bf16.gmra.mxu2 %v518_v54 }
  0x34   :  { %404 = vmatmul.bf16.gmra.mxu3 %v522_v55 }
  0x9e   :  { %v343_v57 = vpop.f32.mrf.mxu0 }
  0x9f   :  { %v362_v58 = vpop.f32.mrf.mxu1  ;;  %v344_v59 = vadd.f32 %v692_v56, %v343_v57 }
  0xa1   :  { %v363_v61 = vadd.f32 %v362_v58, %v344_v59 }
  0xa6   :  { %v381_v62 = vpop.f32.mrf.mxu2  ;;  %v345_v1 = vpop.f32.mrf.mxu0 }
  0xa7   :  { %v400_v63 = vpop.f32.mrf.mxu3  ;;  %v382_v0 = vadd.f32 %v381_v62, %v363_v61  ;;  %v364_v2 = vpop.f32.mrf.mxu1  ;;  %v346_v4 = vadd.f32 %v692_v56, %v345_v1 }
  0xa9   :  { %v401_v3 = vadd.f32 %v400_v63, %v382_v0  ;;  %v365_v5 = vadd.f32 %v364_v2, %v346_v4 }
  0xab   :  { %411 = vst.msk [vmem:[%s922_s3] sm:$0xff] %vm410_vm1, %v401_v3  ;;  %v460_v22 = vmul.f32 %v401_v3, %v401_v3  ;;  %v443_v27 = vsel %vm410_vm1, %v401_v3, 0.0 }
  0xad   :  { %v464_v33 = vsel %vm410_vm1, %v460_v22, 0.0 }
  0xae   :  { %v383_v6 = vpop.f32.mrf.mxu2  ;;  %v348_v9 = vpop.f32.mrf.mxu0 }
  0xaf   :  { %v402_v7 = vpop.f32.mrf.mxu3  ;;  %v384_v8 = vadd.f32 %v383_v6, %v365_v5  ;;  %v349_v10 = vadd.f32 %v692_v56, %v348_v9  ;;  %v367_v12 = vpop.f32.mrf.mxu1 }
  0xb1   :  { %v403_v11 = vadd.f32 %v402_v7, %v384_v8  ;;  %v368_v13 = vadd.f32 %v367_v12, %v349_v10 }
  0xb3   :  { %412 = vst.msk [vmem:[%s922_s3 + $0x8] sm:$0xff] %vm410_vm1, %v403_v11  ;;  %v461_v20 = vmul.f32 %v403_v11, %v403_v11  ;;  %v444_v23 = vsel %vm410_vm1, %v403_v11, 0.0 }
  0xb4   :  { %v445_v31 = vadd.f32 %v444_v23, %v443_v27 }
  0xb5   :  { %v465_v28 = vsel %vm410_vm1, %v461_v20, 0.0 }
  0xb6   :  { %v386_v14 = vpop.f32.mrf.mxu2  ;;  %v350_v17 = vpop.f32.mrf.mxu0  ;;  %v466_v36 = vadd.f32 %v465_v28, %v464_v33 }
  0xb7   :  { %v405_v15 = vpop.f32.mrf.mxu3  ;;  %v387_v16 = vadd.f32 %v386_v14, %v368_v13  ;;  %v351_v19 = vadd.f32 %v692_v56, %v350_v17  ;;  %v369_v21 = vpop.f32.mrf.mxu1  ;;  %v459_v56 = vld [vmem:[%s921_s5] sm:$0x1] }
  0xb9   :  { %v406_v18 = vadd.f32 %v405_v15, %v387_v16  ;;  %v370_v25 = vadd.f32 %v369_v21, %v351_v19 }
  0xbb   :  { %413 = vst.msk [vmem:[%s922_s3 + $0x10] sm:$0xff] %vm410_vm1, %v406_v18  ;;  %v462_v24 = vmul.f32 %v406_v18, %v406_v18  ;;  %v446_v29 = vsel %vm410_vm1, %v406_v18, 0.0 }
  0xbc   :  { %v447_v37 = vadd.f32 %v446_v29, %v445_v31 }
  0xbd   :  { %v467_v34 = vsel %vm410_vm1, %v462_v24, 0.0 }
  0xbe   :  { %v388_v26 = vpop.f32.mrf.mxu2  ;;  %v468_v40 = vadd.f32 %v467_v34, %v466_v36 }
  0xbf   :  { %v389_v30 = vadd.f32 %v388_v26, %v370_v25  ;;  %v407_v32 = vpop.f32.mrf.mxu3 }
  0xc1   :  { %v408_v35 = vadd.f32 %v407_v32, %v389_v30 }
  0xc3   :  { %414 = vst.msk [vmem:[%s922_s3 + $0x18] sm:$0xff] %vm410_vm1, %v408_v35  ;;  %v448_v38 = vsel %vm410_vm1, %v408_v35, 0.0  ;;  %v463_v39 = vmul.f32 %v408_v35, %v408_v35 }
  0xc4   :  { %v449_v41 = vadd.f32 %v448_v38, %v447_v37 }
  0xc5   :  { %v469_v42 = vsel %vm410_vm1, %v463_v39, 0.0 }
  0xc6   :  { %v450_v43 = vrot.slane %v449_v41, 4  ;;  %v470_v44 = vadd.f32 %v469_v42, %v468_v40 }
  0xc8   :  { %v451_v45 = vadd.f32 %v450_v43, %v449_v41  ;;  %v471_v46 = vrot.slane %v470_v44, 4 }
  0xca   :  { %v452_v47 = vrot.slane %v451_v45, 2  ;;  %v472_v48 = vadd.f32 %v471_v46, %v470_v44 }
  0xcc   :  { %v453_v49 = vadd.f32 %v452_v47, %v451_v45  ;;  %v473_v50 = vrot.slane %v472_v48, 2 }
  0xce   :  { %v454_v51 = vrot.slane %v453_v49, 1  ;;  %v474_v52 = vadd.f32 %v473_v50, %v472_v48 }
  0xd0   :  { %v455_v54 = vadd.f32 %v454_v51, %v453_v49  ;;  %v475_v55 = vrot.slane %v474_v52, 1 }
  0xd2   :  { %v456_v57 = vadd.f32 %v455_v54, %v442_v53  ;;  %v476_v58 = vadd.f32 %v475_v55, %v474_v52 }
  0xd4   :  { %458 = vst.msk [vmem:[%s920_s4] sm:$0x1] %vm23_vm0, %v456_v57  ;;  %v477_v59 = vadd.f32 %v476_v58, %v459_v56 }
  0xd6   :  { %478 = vst.msk [vmem:[%s921_s5] sm:$0x1] %vm23_vm0, %v477_v59 }

// kernel: conditional_discriminator_forward.9
= control target key start
LH: loop header
LB: loop body
LE: loop exit
PB: predicated region body
PF: predicated region fallthrough
CT: control target
= control target key end

     0   :  { %vm690_vm5 = vcmask 7168   ;;  %s1251_s1 = inlined_call_operand.vmem [shape: bf16[1024,1], index: 1, kind: input, shape index: {}]   ;;  %s1252_s0 = inlined_call_operand.vmem [shape: bf16[8,1024], index: 0, kind: input, shape index: {}]   ;;  %s1253_s2 = inlined_call_operand.<no memory space> [shape: f32[1,1], index: 2, kind: input, shape index: {}]   ;;  %s1254_s3 = inlined_call_operand.vmem [shape: f32[8,1], index: 3, kind: output, shape index: {}]  }
   0x1   :  { %v959_v0 = vld [vmem:[%s1251_s1 + $0x38] sm:$0xff]  ;;  %v958_v4 = vld [vmem:[%s1251_s1 + $0x30] sm:$0xff]  ;;  %v957_v8 = vld [vmem:[%s1251_s1 + $0x28] sm:$0xff]  ;;  %v8_v48 = vstv %s1253_s2 }
   0x2   :  { %v967_v1 = vld [vmem:[%s1251_s1 + $0x78] sm:$0xff]  ;;  %564 = vmatpush.bf16.msra.mxu0 %v959_v0  ;;  %v966_v5 = vld [vmem:[%s1251_s1 + $0x70] sm:$0xff]  ;;  %v965_v9 = vld [vmem:[%s1251_s1 + $0x68] sm:$0xff]  ;;  %9 = vst [vmem:[#allocation2] sm:$0x1] %v8_v48 }
   0x3   :  { %v975_v2 = vld [vmem:[%s1251_s1 + $0xb8] sm:$0xff]  ;;  %577 = vmatpush.bf16.msra.mxu1 %v967_v1  ;;  %v974_v6 = vld [vmem:[%s1251_s1 + $0xb0] sm:$0xff]  ;;  %v973_v10 = vld [vmem:[%s1251_s1 + $0xa8] sm:$0xff] }
   0x4   :  { %v983_v3 = vld [vmem:[%s1251_s1 + $0xf8] sm:$0xff]  ;;  %590 = vmatpush.bf16.msra.mxu2 %v975_v2  ;;  %v982_v7 = vld [vmem:[%s1251_s1 + $0xf0] sm:$0xff]  ;;  %v981_v11 = vld [vmem:[%s1251_s1 + $0xe8] sm:$0xff] }
   0x5   :  { %603 = vmatpush.bf16.msra.mxu3 %v983_v3  ;;  %v956_v12 = vld [vmem:[%s1251_s1 + $0x20] sm:$0xff]  ;;  %v955_v16 = vld [vmem:[%s1251_s1 + $0x18] sm:$0xff]  ;;  %v954_v20 = vld [vmem:[%s1251_s1 + $0x10] sm:$0xff] }
   0x6   :  { %565 = vmatpush.bf16.msra.mxu0 %v958_v4  ;;  %v964_v13 = vld [vmem:[%s1251_s1 + $0x60] sm:$0xff]  ;;  %v963_v17 = vld [vmem:[%s1251_s1 + $0x58] sm:$0xff]  ;;  %v962_v21 = vld [vmem:[%s1251_s1 + $0x50] sm:$0xff] }
   0x7   :  { %578 = vmatpush.bf16.msra.mxu1 %v966_v5  ;;  %v972_v14 = vld [vmem:[%s1251_s1 + $0xa0] sm:$0xff]  ;;  %v971_v18 = vld [vmem:[%s1251_s1 + $0x98] sm:$0xff]  ;;  %v970_v22 = vld [vmem:[%s1251_s1 + $0x90] sm:$0xff] }
   0x8   :  { %591 = vmatpush.bf16.msra.mxu2 %v974_v6  ;;  %v980_v15 = vld [vmem:[%s1251_s1 + $0xe0] sm:$0xff]  ;;  %v979_v19 = vld [vmem:[%s1251_s1 + $0xd8] sm:$0xff]  ;;  %v978_v23 = vld [vmem:[%s1251_s1 + $0xd0] sm:$0xff] }
   0x9   :  { %604 = vmatpush.bf16.msra.mxu3 %v982_v7  ;;  %v953_v24 = vld [vmem:[%s1251_s1 + $0x8] sm:$0xff]  ;;  %v16_v29 = vld [vmem:[%s1252_s0] sm:$0xff]  ;;  %v991_v38 = vld [vmem:[%s1251_s1 + $0x138] sm:$0xff] }
   0xa   :  { %566 = vmatpush.bf16.msra.mxu0 %v957_v8  ;;  %v961_v25 = vld [vmem:[%s1251_s1 + $0x48] sm:$0xff]  ;;  %v952_v30 = vld [vmem:[%s1251_s1] sm:$0xff]  ;;  %v156_v33 = vunpack.c.l.b16 %v16_v29  ;;  %v157_v37 = vunpack.c.h.b16 %v16_v29  ;;  %v999_v39 = vld [vmem:[%s1251_s1 + $0x178] sm:$0xff] }
   0xb   :  { %579 = vmatpush.bf16.msra.mxu1 %v965_v9  ;;  %v969_v26 = vld [vmem:[%s1251_s1 + $0x88] sm:$0xff]  ;;  %v960_v31 = vld [vmem:[%s1251_s1 + $0x40] sm:$0xff]  ;;  %v1007_v40 = vld [vmem:[%s1251_s1 + $0x1b8] sm:$0xff] }
   0xc   :  { %592 = vmatpush.bf16.msra.mxu2 %v973_v10  ;;  %v977_v27 = vld [vmem:[%s1251_s1 + $0xc8] sm:$0xff]  ;;  %v968_v34 = vld [vmem:[%s1251_s1 + $0x80] sm:$0xff]  ;;  %v1015_v41 = vld [vmem:[%s1251_s1 + $0x1f8] sm:$0xff]  ;;  %v164_v43 = vpack.c.b16 %v156_v33, %v156_v33  ;;  %v165_v45 = vpack.c.b16 %v157_v37, %v157_v37 }
   0xd   :  { %605 = vmatpush.bf16.msra.mxu3 %v981_v11  ;;  %v17_v28 = vld [vmem:[%s1252_s0 + $0x8] sm:$0xff]  ;;  %v976_v35 = vld [vmem:[%s1251_s1 + $0xc0] sm:$0xff]  ;;  %v990_v46 = vld [vmem:[%s1251_s1 + $0x130] sm:$0xff] }
   0xe   :  { %567 = vmatpush.bf16.msra.mxu0 %v956_v12  ;;  %v158_v32 = vunpack.c.l.b16 %v17_v28  ;;  %v159_v36 = vunpack.c.h.b16 %v17_v28  ;;  %v998_v47 = vld [vmem:[%s1251_s1 + $0x170] sm:$0xff]  ;;  %v989_v51 = vld [vmem:[%s1251_s1 + $0x128] sm:$0xff]  ;;  %v988_v55 = vld [vmem:[%s1251_s1 + $0x120] sm:$0xff] }
   0xf   :  { %580 = vmatpush.bf16.msra.mxu1 %v964_v13  ;;  %v1006_v49 = vld [vmem:[%s1251_s1 + $0x1b0] sm:$0xff]  ;;  %v997_v52 = vld [vmem:[%s1251_s1 + $0x168] sm:$0xff]  ;;  %v996_v56 = vld [vmem:[%s1251_s1 + $0x160] sm:$0xff] }
  0x10   :  { %593 = vmatpush.bf16.msra.mxu2 %v972_v14  ;;  %v166_v42 = vpack.c.b16 %v158_v32, %v158_v32  ;;  %v167_v44 = vpack.c.b16 %v159_v36, %v159_v36  ;;  %v1014_v50 = vld [vmem:[%s1251_s1 + $0x1f0] sm:$0xff]  ;;  %v1005_v53 = vld [vmem:[%s1251_s1 + $0x1a8] sm:$0xff]  ;;  %v1004_v57 = vld [vmem:[%s1251_s1 + $0x1a0] sm:$0xff] }
  0x11   :  { %606 = vmatpush.bf16.msra.mxu3 %v980_v15  ;;  %v1013_v54 = vld [vmem:[%s1251_s1 + $0x1e8] sm:$0xff]  ;;  %v1012_v58 = vld [vmem:[%s1251_s1 + $0x1e0] sm:$0xff]  ;;  %v987_v59 = vld [vmem:[%s1251_s1 + $0x118] sm:$0xff] }
  0x12   :  { %568 = vmatpush.bf16.msra.mxu0 %v955_v16  ;;  %v995_v60 = vld [vmem:[%s1251_s1 + $0x158] sm:$0xff]  ;;  %v986_v63 = vld [vmem:[%s1251_s1 + $0x110] sm:$0xff]  ;;  %v985_v3 = vld [vmem:[%s1251_s1 + $0x108] sm:$0xff] }
  0x13   :  { %581 = vmatpush.bf16.msra.mxu1 %v963_v17  ;;  %v1003_v61 = vld [vmem:[%s1251_s1 + $0x198] sm:$0xff]  ;;  %v994_v0 = vld [vmem:[%s1251_s1 + $0x150] sm:$0xff]  ;;  %v993_v4 = vld [vmem:[%s1251_s1 + $0x148] sm:$0xff] }
  0x14   :  { %594 = vmatpush.bf16.msra.mxu2 %v971_v18  ;;  %v1011_v62 = vld [vmem:[%s1251_s1 + $0x1d8] sm:$0xff]  ;;  %v1002_v1 = vld [vmem:[%s1251_s1 + $0x190] sm:$0xff]  ;;  %v1001_v6 = vld [vmem:[%s1251_s1 + $0x188] sm:$0xff] }
  0x15   :  { %607 = vmatpush.bf16.msra.mxu3 %v979_v19  ;;  %v1010_v2 = vld [vmem:[%s1251_s1 + $0x1d0] sm:$0xff]  ;;  %v1009_v7 = vld [vmem:[%s1251_s1 + $0x1c8] sm:$0xff]  ;;  %v19_v8 = vld [vmem:[%s1252_s0 + $0x18] sm:$0xff] }
  0x16   :  { %569 = vmatpush.bf16.msra.mxu0 %v954_v20  ;;  %v18_v5 = vld [vmem:[%s1252_s0 + $0x10] sm:$0xff]  ;;  %v984_v11 = vld [vmem:[%s1251_s1 + $0x100] sm:$0xff]  ;;  %v162_v13 = vunpack.c.l.b16 %v19_v8  ;;  %v163_v14 = vunpack.c.h.b16 %v19_v8 }
  0x17   :  { %582 = vmatpush.bf16.msra.mxu1 %v962_v21  ;;  %v160_v9 = vunpack.c.l.b16 %v18_v5  ;;  %v161_v10 = vunpack.c.h.b16 %v18_v5  ;;  %v992_v12 = vld [vmem:[%s1251_s1 + $0x140] sm:$0xff] }
  0x18   :  { %595 = vmatpush.bf16.msra.mxu2 %v970_v22  ;;  %v1000_v15 = vld [vmem:[%s1251_s1 + $0x180] sm:$0xff]  ;;  %v170_v19 = vpack.c.b16 %v162_v13, %v162_v13  ;;  %v171_v20 = vpack.c.b16 %v163_v14, %v163_v14 }
  0x19   :  { %608 = vmatpush.bf16.msra.mxu3 %v978_v23  ;;  %v1008_v16 = vld [vmem:[%s1251_s1 + $0x1c0] sm:$0xff]  ;;  %v168_v17 = vpack.c.b16 %v160_v9, %v160_v9  ;;  %v169_v18 = vpack.c.b16 %v161_v10, %v161_v10 }
  0x1a   :  { %570 = vmatpush.bf16.msra.mxu0 %v953_v24 }
  0x1b   :  { %583 = vmatpush.bf16.msra.mxu1 %v961_v25 }
  0x1c   :  { %596 = vmatpush.bf16.msra.mxu2 %v969_v26 }
  0x1d   :  { %609 = vmatpush.bf16.msra.mxu3 %v977_v27  ;;  %v1016_v27 = vld [vmem:[#allocation2] ss:$0 sm:$0xff] }
  0x1e   :  { %571 = vmatpush.bf16.msra.mxu0 %v952_v30 }
  0x1f   :  { %584 = vmatpush.bf16.msra.mxu1 %v960_v31 }
  0x20   :  { %597 = vmatpush.bf16.msra.mxu2 %v968_v34 }
  0x21   :  { %610 = vmatpush.bf16.msra.mxu3 %v976_v35  ;;  %572 = vmatmul.bf16.vlgmr.msra.gmra.mxu0 %v164_v43 }
  0x22   :  { %616 = vmatpush.bf16.msrb.mxu0 %v991_v38  ;;  %585 = vmatmul.bf16.vlgmr.msra.gmra.mxu1 %v165_v45 }
  0x23   :  { %629 = vmatpush.bf16.msrb.mxu1 %v999_v39  ;;  %598 = vmatmul.bf16.vlgmr.msra.gmra.mxu2 %v166_v42 }
  0x24   :  { %642 = vmatpush.bf16.msrb.mxu2 %v1007_v40  ;;  %611 = vmatmul.bf16.vlgmr.msra.gmra.mxu3 %v167_v44 }
  0x25   :  { %655 = vmatpush.bf16.msrb.mxu3 %v1015_v41 }
  0x26   :  { %617 = vmatpush.bf16.msrb.mxu0 %v990_v46 }
  0x27   :  { %630 = vmatpush.bf16.msrb.mxu1 %v998_v47 }
  0x28   :  { %643 = vmatpush.bf16.msrb.mxu2 %v1006_v49 }
  0x29   :  { %656 = vmatpush.bf16.msrb.mxu3 %v1014_v50 }
  0x2a   :  { %618 = vmatpush.bf16.msrb.mxu0 %v989_v51 }
  0x2b   :  { %631 = vmatpush.bf16.msrb.mxu1 %v997_v52 }
  0x2c   :  { %644 = vmatpush.bf16.msrb.mxu2 %v1005_v53 }
  0x2d   :  { %657 = vmatpush.bf16.msrb.mxu3 %v1013_v54 }
  0x2e   :  { %619 = vmatpush.bf16.msrb.mxu0 %v988_v55 }
  0x2f   :  { %632 = vmatpush.bf16.msrb.mxu1 %v996_v56 }
  0x30   :  { %645 = vmatpush.bf16.msrb.mxu2 %v1004_v57 }
  0x31   :  { %658 = vmatpush.bf16.msrb.mxu3 %v1012_v58 }
  0x32   :  { %620 = vmatpush.bf16.msrb.mxu0 %v987_v59 }
  0x33   :  { %633 = vmatpush.bf16.msrb.mxu1 %v995_v60 }
  0x34   :  { %646 = vmatpush.bf16.msrb.mxu2 %v1003_v61 }
  0x35   :  { %659 = vmatpush.bf16.msrb.mxu3 %v1011_v62 }
  0x36   :  { %621 = vmatpush.bf16.msrb.mxu0 %v986_v63 }
  0x37   :  { %634 = vmatpush.bf16.msrb.mxu1 %v994_v0 }
  0x38   :  { %647 = vmatpush.bf16.msrb.mxu2 %v1002_v1 }
  0x39   :  { %660 = vmatpush.bf16.msrb.mxu3 %v1010_v2 }
  0x3a   :  { %622 = vmatpush.bf16.msrb.mxu0 %v985_v3 }
  0x3b   :  { %635 = vmatpush.bf16.msrb.mxu1 %v993_v4 }
  0x3c   :  { %648 = vmatpush.bf16.msrb.mxu2 %v1001_v6 }
  0x3d   :  { %661 = vmatpush.bf16.msrb.mxu3 %v1009_v7 }
  0x3e   :  { %623 = vmatpush.bf16.msrb.mxu0 %v984_v11 }
  0x3f   :  { %636 = vmatpush.bf16.msrb.mxu1 %v992_v12 }
  0x40   :  { %649 = vmatpush.bf16.msrb.mxu2 %v1000_v15 }
  0x41   :  { %662 = vmatpush.bf16.msrb.mxu3 %v1008_v16  ;;  %624 = vmatmul.bf16.vlgmr.msrb.gmra.mxu0 %v168_v17 }
  0x42   :  { %637 = vmatmul.bf16.vlgmr.msrb.gmra.mxu1 %v169_v18 }
  0x43   :  { %650 = vmatmul.bf16.vlgmr.msrb.gmra.mxu2 %v170_v19 }
  0x44   :  { %663 = vmatmul.bf16.vlgmr.msrb.gmra.mxu3 %v171_v20 }
  0x9e   :  { %v573_v21 = vpop.f32.mrf.mxu0 }
  0x9f   :  { %v586_v22 = vpop.f32.mrf.mxu1  ;;  %v574_v30 = vadd.f32 %v1016_v27, %v573_v21 }
  0xa1   :  { %v587_v31 = vadd.f32 %v586_v22, %v574_v30 }
  0xa6   :  { %v599_v23 = vpop.f32.mrf.mxu2  ;;  %v575_v25 = vpop.f32.mrf.mxu0 }
  0xa7   :  { %v612_v24 = vpop.f32.mrf.mxu3  ;;  %v588_v26 = vpop.f32.mrf.mxu1  ;;  %v600_v32 = vadd.f32 %v599_v23, %v587_v31 }
  0xa9   :  { %v613_v33 = vadd.f32 %v612_v24, %v600_v32 }
  0xae   :  { %v601_v28 = vpop.f32.mrf.mxu2 }
  0xaf   :  { %v614_v29 = vpop.f32.mrf.mxu3 }
  0xbe   :  { %v625_v34 = vpop.f32.mrf.mxu0 }
  0xbf   :  { %v638_v35 = vpop.f32.mrf.mxu1  ;;  %v626_v36 = vadd.f32 %v625_v34, %v613_v33 }
  0xc1   :  { %v639_v37 = vadd.f32 %v638_v35, %v626_v36 }
  0xc6   :  { %v651_v38 = vpop.f32.mrf.mxu2  ;;  %v627_v41 = vpop.f32.mrf.mxu0 }
  0xc7   :  { %v664_v39 = vpop.f32.mrf.mxu3  ;;  %v652_v40 = vadd.f32 %v651_v38, %v639_v37  ;;  %v640_v42 = vpop.f32.mrf.mxu1 }
  0xc9   :  { %v665_v43 = vadd.f32 %v664_v39, %v652_v40 }
  0xcb   :  { %v668_v44 = vand.u32 2147483647, %v665_v43  ;;  %vm672_vm3 = vcmp.ge.f32.partialorder %v665_v43, 0.0 }
  0xcd   :  { %v669_v45 = vsub.f32 0.0, %v668_v44 }
  0xce   :  { %v653_v46 = vpop.f32.mrf.mxu2 }
  0xcf   :  { %v666_v47 = vpop.f32.mrf.mxu3  ;;  %v670_v48 = vmul.f32 1.442695, %v669_v45 }
  0xd1   :  { %1017 = vpow2.f32 %v670_v48 }
  0xd7   :  { %v1018_v49 = vpop.eup %1017 }
  0xd8   :  { %v674_v50 = vadd.f32 1.0, %v1018_v49  ;;  %v673_v60 = vsel %vm672_vm3, 1.0, %v1018_v49 }
  0xda   :  { %1019 = vrcp.f32 %v674_v50  ;;  %v686_v54 = vand.u32 2147483648, %v674_v50  ;;  %v684_v56 = vand.u32 2147483647, %v674_v50  ;;  %vm680_vm1 = vweird.f32 %v674_v50 }
  0xdc   :  { %v687_v58 = vor.u32 1.1754944e-38, %v686_v54  ;;  %vm685_vm4 = vcmp.eq.f32.partialorder %v684_v56, 8.507059e+37 }
  0xe0   :  { %v1020_v51 = vpop.eup %1019 }
  0xe1   :  { %v676_v52 = vmul.f32 %v1020_v51, %v674_v50  ;;  %vm681_vm0 = vweird.f32 %v1020_v51 }
  0xe2   :  { %vm682_vm2 = vmor %vm680_vm1, %vm681_vm0 }
  0xe3   :  { %v677_v53 = vsub.f32 1.0, %v676_v52 }
  0xe5   :  { %v678_v55 = vmul.f32 %v1020_v51, %v677_v53 }
  0xe7   :  { %v679_v57 = vadd.f32 %v1020_v51, %v678_v55 }
  0xe9   :  { %v683_v59 = vsel %vm682_vm2, %v1020_v51, %v679_v57 }
  0xea   :  { %v688_v61 = vsel %vm685_vm4, %v687_v58, %v683_v59 }
  0xeb   :  { %v689_v62 = vmul.f32 %v688_v61, %v673_v60 }
  0xed   :  { %691 = vst.msk [vmem:[%s1254_s3] sm:$0xff] %vm690_vm5, %v689_v62 }

</bundles_post_ra>
